<compile_context>
chip_gen: v5e
topology: v5e:2x2
jax: 0.10.0
libtpu: 0.0.40
codegen_flags: <defaults>
</compile_context>

<pallas_src>
import functools

import jax
import jax.numpy as jnp
from jax import lax
from jax.experimental import pallas as pl
from jax.experimental.pallas import tpu as pltpu


# ----------------------------------------------------------------------------
# Pallas kernels
# ----------------------------------------------------------------------------
def _proj_gap_kernel(x_ref, wc_ref, sc_ref, bc_ref, w1_ref, s1_ref, b1_ref,
                     feat2_ref, qk_ref, val_ref, f1_ref, sum_ref,
                     *, inner, key_ch, inv_l):
    """Fused shared-x projections (conv2 | f_key | f_value) + GAP conv1 branch."""
    l = pl.program_id(1)

    x = x_ref[0]                                         # (TL, Cin) f32

    # ---- GAP partial sum (reduction over the L-tile grid axis) ----
    @pl.when(l == 0)
    def _():
        sum_ref[...] = jnp.zeros_like(sum_ref)
    sum_ref[...] += jnp.sum(x, axis=0, keepdims=True)    # (1, Cin) f32 accum

    # ---- one matmul for all three 1x1 projections (bf16 operands, f32 acc) ----
    y = jnp.dot(x.astype(jnp.bfloat16), wc_ref[...],
                preferred_element_type=jnp.float32)      # (TL, inner+kc+vc)
    y = y * sc_ref[...] + bc_ref[...]                    # folded BN / identity
    feat2 = jnp.maximum(y[:, :inner], 0.0)               # conv2 + BNReLU
    qk = jnp.maximum(y[:, inner:inner + key_ch], 0.0)    # f_key/f_query + BNReLU
    val = y[:, inner + key_ch:]                          # f_value (plain 1x1)
    feat2_ref[0] = feat2.astype(feat2_ref.dtype)
    qk_ref[0] = qk.astype(qk_ref.dtype)
    val_ref[0] = val.astype(val_ref.dtype)

    # ---- finalize GAP -> conv1 -> BNReLU at the last L-tile ----
    @pl.when(l == pl.num_programs(1) - 1)
    def _():
        m = sum_ref[...] * inv_l                         # mean over HW, (1, Cin)
        f1 = jnp.dot(m.astype(jnp.bfloat16), w1_ref[...],
                     preferred_element_type=jnp.float32)
        f1 = jnp.maximum(f1 * s1_ref[...] + b1_ref[...], 0.0)
        f1_ref[0] = f1.astype(f1_ref.dtype)


def _flash_attn_kernel(q_ref, k_ref, v_ref, o_ref, m_sc, l_sc, acc_sc, *, scale):
    """Flash-style attention: online softmax over streamed K/V tiles."""
    kv = pl.program_id(2)

    @pl.when(kv == 0)
    def _():
        m_sc[...] = jnp.full_like(m_sc, -jnp.inf)
        l_sc[...] = jnp.zeros_like(l_sc)
        acc_sc[...] = jnp.zeros_like(acc_sc)

    q = q_ref[0]                                         # (Tq, Kc) bf16
    k = k_ref[0]                                         # (Tk, Kc) bf16
    v = v_ref[0]                                         # (Tk, Vc) bf16

    # Q K^T without an explicit transpose (contract last dims on the MXU).
    s = lax.dot_general(q, k, (((1,), (1,)), ((), ())),
                        preferred_element_type=jnp.float32) * scale   # (Tq, Tk)

    m_prev = m_sc[...]
    m_new = jnp.maximum(m_prev, jnp.max(s, axis=-1, keepdims=True))
    alpha = jnp.exp(m_prev - m_new)
    p = jnp.exp(s - m_new)
    l_sc[...] = alpha * l_sc[...] + jnp.sum(p, axis=-1, keepdims=True)
    acc_sc[...] = alpha * acc_sc[...] + jnp.dot(
        p.astype(jnp.bfloat16), v, preferred_element_type=jnp.float32)
    m_sc[...] = m_new

    @pl.when(kv == pl.num_programs(2) - 1)
    def _():
        o_ref[0] = (acc_sc[...] * pl.reciprocal(l_sc[...], approx=True)
                    ).astype(o_ref.dtype)


def _fuse_kernel(ctx_ref, feat2_ref, f1_ref,
                 wA_ref, s3_ref, b3_ref,
                 w1_ref, w2_ref, w3_ref, sF_ref, bF_ref, o_ref):
    """Attention W-proj + BNReLU fused with the final 3*inner->out conv + BNReLU.

    The concat is eliminated: fuse_w is split into W1/W2/W3 column blocks and
    the broadcast GAP-branch contribution is a rank-1 (1, out) add.
    """
    ctx = ctx_ref[0]                                      # (TL, Vc) bf16
    feat2 = feat2_ref[0]                                  # (TL, inner) bf16
    f1 = f1_ref[0]                                        # (1, inner) f32

    feat3 = jnp.dot(ctx, wA_ref[...], preferred_element_type=jnp.float32)
    feat3 = jnp.maximum(feat3 * s3_ref[...] + b3_ref[...], 0.0)   # conv3 BNReLU

    y = jnp.dot(f1.astype(jnp.bfloat16), w1_ref[...],
                preferred_element_type=jnp.float32)               # (1, out)
    y = y + jnp.dot(feat2, w2_ref[...], preferred_element_type=jnp.float32)
    y = y + jnp.dot(feat3.astype(jnp.bfloat16), w3_ref[...],
                    preferred_element_type=jnp.float32)
    y = jnp.maximum(y * sF_ref[...] + bF_ref[...], 0.0)           # fuse BNReLU
    o_ref[0] = y.astype(o_ref.dtype)


# ----------------------------------------------------------------------------
# pallas_call wrappers
# ----------------------------------------------------------------------------
def _choose_tile(L, max_tile=512):
    if L <= max_tile:
        return L
    for t in (max_tile, 256, 128, 64, 32, 16, 8):
        if L % t == 0:
            return t
    return L


def _shared_proj_gap(x, wc, sc, bc, w1, s1, b1, *, inner, key_ch, val_ch, tl):
    N, L, Cin = x.shape
    ctot = inner + key_ch + val_ch
    kern = functools.partial(_proj_gap_kernel, inner=inner, key_ch=key_ch,
                             inv_l=1.0 / float(L))
    return pl.pallas_call(
        kern,
        out_shape=(
            jax.ShapeDtypeStruct((N, L, inner), jnp.bfloat16),   # feat2
            jax.ShapeDtypeStruct((N, L, key_ch), jnp.bfloat16),  # qk
            jax.ShapeDtypeStruct((N, L, val_ch), jnp.bfloat16),  # value
            jax.ShapeDtypeStruct((N, 1, inner), jnp.float32),    # GAP branch
        ),
        grid=(N, L // tl),
        in_specs=[
            pl.BlockSpec((1, tl, Cin), lambda n, l: (n, l, 0)),
            pl.BlockSpec((Cin, ctot), lambda n, l: (0, 0)),
            pl.BlockSpec((1, ctot), lambda n, l: (0, 0)),
            pl.BlockSpec((1, ctot), lambda n, l: (0, 0)),
            pl.BlockSpec((Cin, inner), lambda n, l: (0, 0)),
            pl.BlockSpec((1, inner), lambda n, l: (0, 0)),
            pl.BlockSpec((1, inner), lambda n, l: (0, 0)),
        ],
        out_specs=(
            pl.BlockSpec((1, tl, inner), lambda n, l: (n, l, 0)),
            pl.BlockSpec((1, tl, key_ch), lambda n, l: (n, l, 0)),
            pl.BlockSpec((1, tl, val_ch), lambda n, l: (n, l, 0)),
            pl.BlockSpec((1, 1, inner), lambda n, l: (n, 0, 0)),
        ),
        scratch_shapes=[pltpu.VMEM((1, Cin), jnp.float32)],
        compiler_params=pltpu.CompilerParams(
            dimension_semantics=("parallel", "arbitrary")),
    )(x, wc, sc.reshape(1, -1), bc.reshape(1, -1),
      w1, s1.reshape(1, -1), b1.reshape(1, -1))


def _flash_attention(q, k, v, *, key_ch, tq, tk):
    N, L, Kc = q.shape
    Vc = v.shape[-1]
    kern = functools.partial(_flash_attn_kernel, scale=float(key_ch) ** -0.5)
    return pl.pallas_call(
        kern,
        out_shape=jax.ShapeDtypeStruct((N, L, Vc), jnp.bfloat16),
        grid=(N, L // tq, L // tk),
        in_specs=[
            pl.BlockSpec((1, tq, Kc), lambda n, i, j: (n, i, 0)),
            pl.BlockSpec((1, tk, Kc), lambda n, i, j: (n, j, 0)),
            pl.BlockSpec((1, tk, Vc), lambda n, i, j: (n, j, 0)),
        ],
        out_specs=pl.BlockSpec((1, tq, Vc), lambda n, i, j: (n, i, 0)),
        scratch_shapes=[
            pltpu.VMEM((tq, 1), jnp.float32),
            pltpu.VMEM((tq, 1), jnp.float32),
            pltpu.VMEM((tq, Vc), jnp.float32),
        ],
        compiler_params=pltpu.CompilerParams(
            dimension_semantics=("parallel", "parallel", "arbitrary")),
    )(q, k, v)


def _fused_output(ctx, feat2, f1, wA, s3, b3, w1, w2, w3, sF, bF, *, tl):
    N, L, Vc = ctx.shape
    inner = feat2.shape[-1]
    out_ch = w2.shape[1]
    return pl.pallas_call(
        _fuse_kernel,
        out_shape=jax.ShapeDtypeStruct((N, L, out_ch), jnp.float32),
        grid=(N, L // tl),
        in_specs=[
            pl.BlockSpec((1, tl, Vc), lambda n, l: (n, l, 0)),
            pl.BlockSpec((1, tl, inner), lambda n, l: (n, l, 0)),
            pl.BlockSpec((1, 1, inner), lambda n, l: (n, 0, 0)),
            pl.BlockSpec((Vc, inner), lambda n, l: (0, 0)),
            pl.BlockSpec((1, inner), lambda n, l: (0, 0)),
            pl.BlockSpec((1, inner), lambda n, l: (0, 0)),
            pl.BlockSpec((inner, out_ch), lambda n, l: (0, 0)),
            pl.BlockSpec((inner, out_ch), lambda n, l: (0, 0)),
            pl.BlockSpec((inner, out_ch), lambda n, l: (0, 0)),
            pl.BlockSpec((1, out_ch), lambda n, l: (0, 0)),
            pl.BlockSpec((1, out_ch), lambda n, l: (0, 0)),
        ],
        out_specs=pl.BlockSpec((1, tl, out_ch), lambda n, l: (n, l, 0)),
        compiler_params=pltpu.CompilerParams(
            dimension_semantics=("parallel", "parallel")),
    )(ctx, feat2, f1, wA, s3.reshape(1, -1), b3.reshape(1, -1),
      w1, w2, w3, sF.reshape(1, -1), bF.reshape(1, -1))


# ----------------------------------------------------------------------------
# Parameter construction (deterministic, synthetic)
# ----------------------------------------------------------------------------
def _fold_bn(gamma, beta, mean, var, eps=1e-5):
    scale = gamma / jnp.sqrt(var + eps)
    shift = beta - mean * scale
    return scale, shift


def _bn_params(key, c):
    k1, k2, k3, k4 = jax.random.split(key, 4)
    gamma = 1.0 + 0.1 * jax.random.normal(k1, (c,), jnp.float32)
    beta = 0.1 * jax.random.normal(k2, (c,), jnp.float32)
    mean = 0.1 * jax.random.normal(k3, (c,), jnp.float32)
    var = 1.0 + 0.1 * jax.random.uniform(k4, (c,), jnp.float32)
    return _fold_bn(gamma, beta, mean, var)


def make_params(key, features, inner_features, out_features):
    key_ch = out_features // 2
    val_ch = out_features // 2
    ks = jax.random.split(key, 12)

    def w(k, cin, cout):
        return 0.1 * jax.random.normal(k, (cin, cout), jnp.float32)

    p = {}
    # conv1: GAP -> 1x1 conv -> BNReLU
    p["conv1_w"] = w(ks[0], features, inner_features)
    p["conv1_s"], p["conv1_b"] = _bn_params(ks[1], inner_features)
    # conv2: 1x1 conv -> BNReLU
    p["conv2_w"] = w(ks[2], features, inner_features)
    p["conv2_s"], p["conv2_b"] = _bn_params(ks[3], inner_features)
    # conv3: self-attention (shared f_key/f_query, f_value, W) -> BNReLU
    p["fkey_w"] = w(ks[4], features, key_ch)
    p["fkey_s"], p["fkey_b"] = _bn_params(ks[5], key_ch)
    p["fval_w"] = w(ks[6], features, val_ch)
    p["attW_w"] = w(ks[7], val_ch, inner_features)
    p["bn3_s"], p["bn3_b"] = _bn_params(ks[8], inner_features)
    # conv_bn_dropout: 1x1 conv (3*inner -> out) -> BNReLU -> Dropout2d (eval: id)
    p["fuse_w"] = w(ks[9], 3 * inner_features, out_features)
    p["fuse_s"], p["fuse_b"] = _bn_params(ks[10], out_features)
    return p


# ----------------------------------------------------------------------------
# Forward pass
# ----------------------------------------------------------------------------
def asp_oc_module_v5_forward(x_nchw, p, *, tile_l=None):
    N, C, H, W = x_nchw.shape
    L = H * W
    # All channel counts are static (derived from weight shapes, not traced).
    inner = p["conv2_w"].shape[1]
    key_ch = p["fkey_w"].shape[1]
    val_ch = p["fval_w"].shape[1]
    out_ch = p["fuse_w"].shape[1]

    tl = tile_l if tile_l is not None else _choose_tile(L)
    assert L % tl == 0, (L, tl)

    # NCHW -> (N, HW, C)
    x = jnp.transpose(x_nchw, (0, 2, 3, 1)).reshape(N, L, C)

    # Fused RHS for the three shared-x projections: conv2 | f_key | f_value.
    wc = jnp.concatenate(
        [p["conv2_w"], p["fkey_w"], p["fval_w"]], axis=1).astype(jnp.bfloat16)
    sc = jnp.concatenate([p["conv2_s"], p["fkey_s"],
                          jnp.ones((val_ch,), jnp.float32)])
    bc = jnp.concatenate([p["conv2_b"], p["fkey_b"],
                          jnp.zeros((val_ch,), jnp.float32)])

    # Kernel A: one HBM pass over x -> feat2, qk, value, GAP(conv1) branch.
    feat2, qk, val, f1 = _shared_proj_gap(
        x, wc, sc, bc,
        p["conv1_w"].astype(jnp.bfloat16), p["conv1_s"], p["conv1_b"],
        inner=inner, key_ch=key_ch, val_ch=val_ch, tl=tl)

    # Kernel B: flash-style self-attention (shared key/query).
    ctx = _flash_attention(qk, qk, val, key_ch=key_ch, tq=tl, tk=tl)

    # Kernel C: W-proj + BNReLU + split fuse conv + BNReLU (no concat/broadcast).
    out = _fused_output(
        ctx, feat2, f1,
        p["attW_w"].astype(jnp.bfloat16), p["bn3_s"], p["bn3_b"],
        p["fuse_w"][:inner].astype(jnp.bfloat16),
        p["fuse_w"][inner:2 * inner].astype(jnp.bfloat16),
        p["fuse_w"][2 * inner:].astype(jnp.bfloat16),
        p["fuse_s"], p["fuse_b"], tl=tl)

    # (N, HW, Cout) -> NCHW
    return jnp.transpose(out.reshape(N, H, W, out_ch), (0, 3, 1, 2))


# ----------------------------------------------------------------------------
if __name__ == "__main__":
    # Small shapes consistent with the module (features -> inner -> out).
    N, FEATURES, H, W = 2, 4, 16, 16
    INNER, OUT = 32, 32

    key = jax.random.PRNGKey(0)
    kx, kp = jax.random.split(key)
    x = jax.random.normal(kx, (N, FEATURES, H, W), jnp.float32)
    params = make_params(kp, FEATURES, INNER, OUT)

    # tile_l=128 exercises the multi-tile GAP accumulation and the
    # flash-attention K/V streaming path (L = 256 -> 2 L-tiles, 2x2 attn tiles).
    fwd = jax.jit(functools.partial(asp_oc_module_v5_forward, tile_l=128))
    y = jax.block_until_ready(fwd(x, params))

    assert y.shape == (N, OUT, H, W), y.shape
    assert bool(jnp.all(jnp.isfinite(y)))
    print("KERNEL_OK")
</pallas_src>

<mosaic_0001>
module attributes {stable_mosaic.version = 11 : i64} {
  func.func @_flash_attn_kernel(%arg0: i32, %arg1: i32, %arg2: i32, %arg3: memref<1x128x16xbf16, #tpu.memory_space<vmem>>, %arg4: memref<1x128x16xbf16, #tpu.memory_space<vmem>>, %arg5: memref<1x128x16xbf16, #tpu.memory_space<vmem>>, %arg6: memref<1x128x16xbf16, #tpu.memory_space<vmem>>, %arg7: memref<128x1xf32, #tpu.memory_space<vmem>>, %arg8: memref<128x1xf32, #tpu.memory_space<vmem>>, %arg9: memref<128x16xf32, #tpu.memory_space<vmem>>) attributes {dimension_semantics = [#tpu.dimension_semantics<parallel>, #tpu.dimension_semantics<parallel>, #tpu.dimension_semantics<arbitrary>], iteration_bounds = array<i64: 2, 2, 2>, scalar_prefetch = 0 : i64, scratch_operands = 3 : i64, tpu.core_type = #tpu.core_type<tc>, window_params = [{transform_indices = @transform_0, window_bounds = array<i64: 1, 128, 16>}, {transform_indices = @transform_1, window_bounds = array<i64: 1, 128, 16>}, {transform_indices = @transform_2, window_bounds = array<i64: 1, 128, 16>}, {transform_indices = @transform_3, window_bounds = array<i64: 1, 128, 16>}]} {
    %c0_i32 = arith.constant 0 : i32
    %0 = arith.cmpi eq, %arg2, %c0_i32 : i32
    %1 = arith.extui %0 : i1 to i32
    %c0_i32_0 = arith.constant 0 : i32
    %2 = arith.cmpi ne, %1, %c0_i32_0 : i32
    scf.if %2 {
      %cst_26 = arith.constant 0xFF800000 : f32
      %38 = vector.broadcast %cst_26 : f32 to vector<128x1xf32>
      %c0_27 = arith.constant 0 : index
      %c0_28 = arith.constant 0 : index
      %39 = vector.load %arg7[%c0_27, %c0_28] : memref<128x1xf32, #tpu.memory_space<vmem>>, vector<128x1xf32>
      tpu.vector_store %arg7[%c0_27, %c0_28], %38 {strides = array<i32>} : memref<128x1xf32, #tpu.memory_space<vmem>>, vector<128x1xf32>,
      %cst_29 = arith.constant 0.000000e+00 : f32
      %40 = vector.broadcast %cst_29 : f32 to vector<128x1xf32>
      %c0_30 = arith.constant 0 : index
      %c0_31 = arith.constant 0 : index
      %41 = vector.load %arg8[%c0_30, %c0_31] : memref<128x1xf32, #tpu.memory_space<vmem>>, vector<128x1xf32>
      tpu.vector_store %arg8[%c0_30, %c0_31], %40 {strides = array<i32>} : memref<128x1xf32, #tpu.memory_space<vmem>>, vector<128x1xf32>,
      %cst_32 = arith.constant 0.000000e+00 : f32
      %42 = vector.broadcast %cst_32 : f32 to vector<128x16xf32>
      %c0_33 = arith.constant 0 : index
      %c0_34 = arith.constant 0 : index
      %43 = vector.load %arg9[%c0_33, %c0_34] : memref<128x16xf32, #tpu.memory_space<vmem>>, vector<128x16xf32>
      tpu.vector_store %arg9[%c0_33, %c0_34], %42 {strides = array<i32>} : memref<128x16xf32, #tpu.memory_space<vmem>>, vector<128x16xf32>,
    } else {
    }
    %c0 = arith.constant 0 : index
    %c0_1 = arith.constant 0 : index
    %c0_2 = arith.constant 0 : index
    %3 = vector.load %arg3[%c0, %c0_1, %c0_2] : memref<1x128x16xbf16, #tpu.memory_space<vmem>>, vector<1x128x16xbf16>
    %4 = vector.shape_cast %3 : vector<1x128x16xbf16> to vector<128x16xbf16>
    %c0_3 = arith.constant 0 : index
    %c0_4 = arith.constant 0 : index
    %c0_5 = arith.constant 0 : index
    %5 = vector.load %arg4[%c0_3, %c0_4, %c0_5] : memref<1x128x16xbf16, #tpu.memory_space<vmem>>, vector<1x128x16xbf16>
    %6 = vector.shape_cast %5 : vector<1x128x16xbf16> to vector<128x16xbf16>
    %c0_6 = arith.constant 0 : index
    %c0_7 = arith.constant 0 : index
    %c0_8 = arith.constant 0 : index
    %7 = vector.load %arg5[%c0_6, %c0_7, %c0_8] : memref<1x128x16xbf16, #tpu.memory_space<vmem>>, vector<1x128x16xbf16>
    %8 = vector.shape_cast %7 : vector<1x128x16xbf16> to vector<128x16xbf16>
    %cst = arith.constant dense<0.000000e+00> : vector<128x128xf32>
    %9 = tpu.matmul %4, %6, %cst {dimension_numbers = #tpu.dot_dimension_numbers<[1], [1], [0], [0], [0, 0, 1, 0], [], []>} : vector<128x16xbf16>, vector<128x16xbf16>, vector<128x128xf32> -> vector<128x128xf32>
    %cst_9 = arith.constant 2.500000e-01 : f32
    %10 = vector.broadcast %cst_9 : f32 to vector<128x128xf32>
    %11 = arith.mulf %9, %10 : vector<128x128xf32>
    %c0_10 = arith.constant 0 : index
    %c0_11 = arith.constant 0 : index
    %12 = vector.load %arg7[%c0_10, %c0_11] : memref<128x1xf32, #tpu.memory_space<vmem>>, vector<128x1xf32>
    %cst_12 = arith.constant dense<0xFF800000> : vector<128xf32>
    %13 = vector.multi_reduction <maximumf>, %11, %cst_12 [1] : vector<128x128xf32> to vector<128xf32>
    %14 = vector.shape_cast %13 : vector<128xf32> to vector<128x1xf32>
    %15 = arith.maximumf %12, %14 : vector<128x1xf32>
    %16 = arith.subf %12, %15 : vector<128x1xf32>
    %17 = math.exp %16 : vector<128x1xf32>
    %18 = vector.broadcast %15 : vector<128x1xf32> to vector<128x128xf32>
    %19 = arith.subf %11, %18 : vector<128x128xf32>
    %20 = math.exp %19 : vector<128x128xf32>
    %c0_13 = arith.constant 0 : index
    %c0_14 = arith.constant 0 : index
    %21 = vector.load %arg8[%c0_13, %c0_14] : memref<128x1xf32, #tpu.memory_space<vmem>>, vector<128x1xf32>
    %22 = arith.mulf %17, %21 : vector<128x1xf32>
    %cst_15 = arith.constant dense<0.000000e+00> : vector<128xf32>
    %23 = vector.multi_reduction <add>, %20, %cst_15 [1] : vector<128x128xf32> to vector<128xf32>
    %24 = vector.shape_cast %23 : vector<128xf32> to vector<128x1xf32>
    %25 = arith.addf %22, %24 : vector<128x1xf32>
    %c0_16 = arith.constant 0 : index
    %c0_17 = arith.constant 0 : index
    %26 = vector.load %arg8[%c0_16, %c0_17] : memref<128x1xf32, #tpu.memory_space<vmem>>, vector<128x1xf32>
    tpu.vector_store %arg8[%c0_16, %c0_17], %25 {strides = array<i32>} : memref<128x1xf32, #tpu.memory_space<vmem>>, vector<128x1xf32>,
    %c0_18 = arith.constant 0 : index
    %c0_19 = arith.constant 0 : index
    %27 = vector.load %arg9[%c0_18, %c0_19] : memref<128x16xf32, #tpu.memory_space<vmem>>, vector<128x16xf32>
    %28 = vector.broadcast %17 : vector<128x1xf32> to vector<128x16xf32>
    %29 = arith.mulf %28, %27 : vector<128x16xf32>
    %30 = arith.truncf %20 : vector<128x128xf32> to vector<128x128xbf16>
    %cst_20 = arith.constant dense<0.000000e+00> : vector<128x16xf32>
    %31 = tpu.matmul %30, %8, %cst_20 {dimension_numbers = #tpu.dot_dimension_numbers<[1], [0], [0], [1], [0, 0, 1, 1], [], []>} : vector<128x128xbf16>, vector<128x16xbf16>, vector<128x16xf32> -> vector<128x16xf32>
    %32 = arith.addf %29, %31 : vector<128x16xf32>
    %c0_21 = arith.constant 0 : index
    %c0_22 = arith.constant 0 : index
    %33 = vector.load %arg9[%c0_21, %c0_22] : memref<128x16xf32, #tpu.memory_space<vmem>>, vector<128x16xf32>
    tpu.vector_store %arg9[%c0_21, %c0_22], %32 {strides = array<i32>} : memref<128x16xf32, #tpu.memory_space<vmem>>, vector<128x16xf32>,
    %c0_23 = arith.constant 0 : index
    %c0_24 = arith.constant 0 : index
    %34 = vector.load %arg7[%c0_23, %c0_24] : memref<128x1xf32, #tpu.memory_space<vmem>>, vector<128x1xf32>
    tpu.vector_store %arg7[%c0_23, %c0_24], %15 {strides = array<i32>} : memref<128x1xf32, #tpu.memory_space<vmem>>, vector<128x1xf32>,
    %c1_i32 = arith.constant 1 : i32
    %35 = arith.cmpi eq, %arg2, %c1_i32 : i32
    %36 = arith.extui %35 : i1 to i32
    %c0_i32_25 = arith.constant 0 : i32
    %37 = arith.cmpi ne, %36, %c0_i32_25 : i32
    scf.if %37 {
      %c0_26 = arith.constant 0 : index
      %c0_27 = arith.constant 0 : index
      %38 = vector.load %arg9[%c0_26, %c0_27] : memref<128x16xf32, #tpu.memory_space<vmem>>, vector<128x16xf32>
      %c0_28 = arith.constant 0 : index
      %c0_29 = arith.constant 0 : index
      %39 = vector.load %arg8[%c0_28, %c0_29] : memref<128x1xf32, #tpu.memory_space<vmem>>, vector<128x1xf32>
      %40 = tpu.reciprocal %39 {approx = true} : vector<128x1xf32> -> vector<128x1xf32>
      %41 = vector.broadcast %40 : vector<128x1xf32> to vector<128x16xf32>
      %42 = arith.mulf %38, %41 : vector<128x16xf32>
      %43 = arith.truncf %42 : vector<128x16xf32> to vector<128x16xbf16>
      %c0_30 = arith.constant 0 : index
      %c0_31 = arith.constant 0 : index
      %c0_32 = arith.constant 0 : index
      %44 = vector.load %arg6[%c0_30, %c0_31, %c0_32] : memref<1x128x16xbf16, #tpu.memory_space<vmem>>, vector<1x128x16xbf16>
      %45 = vector.shape_cast %44 : vector<1x128x16xbf16> to vector<128x16xbf16>
      %46 = vector.shape_cast %43 : vector<128x16xbf16> to vector<1x128x16xbf16>
      tpu.vector_store %arg6[%c0_30, %c0_31, %c0_32], %46 {strides = array<i32>} : memref<1x128x16xbf16, #tpu.memory_space<vmem>>, vector<1x128x16xbf16>,
    } else {
    }
    return
  }
  func.func @transform_0(%arg0: i32, %arg1: i32, %arg2: i32) -> (i32, i32, i32) {
    %c0_i32 = arith.constant 0 : i32
    %c0_i32_0 = arith.constant 0 : i32
    return %arg0, %arg1, %c0_i32 : i32, i32, i32
  }
  func.func @transform_1(%arg0: i32, %arg1: i32, %arg2: i32) -> (i32, i32, i32) {
    %c0_i32 = arith.constant 0 : i32
    %c0_i32_0 = arith.constant 0 : i32
    return %arg0, %arg2, %c0_i32 : i32, i32, i32
  }
  func.func @transform_2(%arg0: i32, %arg1: i32, %arg2: i32) -> (i32, i32, i32) {
    %c0_i32 = arith.constant 0 : i32
    %c0_i32_0 = arith.constant 0 : i32
    return %arg0, %arg2, %c0_i32 : i32, i32, i32
  }
  func.func @transform_3(%arg0: i32, %arg1: i32, %arg2: i32) -> (i32, i32, i32) {
    %c0_i32 = arith.constant 0 : i32
    %c0_i32_0 = arith.constant 0 : i32
    return %arg0, %arg1, %c0_i32 : i32, i32, i32
  }
}

module attributes {stable_mosaic.version = 11 : i64} {
  func.func @_proj_gap_kernel(%arg0: i32, %arg1: i32, %arg2: memref<1x128x4xf32, #tpu.memory_space<vmem>>, %arg3: memref<4x64xbf16, #tpu.memory_space<vmem>>, %arg4: memref<1x64xf32, #tpu.memory_space<vmem>>, %arg5: memref<1x64xf32, #tpu.memory_space<vmem>>, %arg6: memref<4x32xbf16, #tpu.memory_space<vmem>>, %arg7: memref<1x32xf32, #tpu.memory_space<vmem>>, %arg8: memref<1x32xf32, #tpu.memory_space<vmem>>, %arg9: memref<1x128x32xbf16, #tpu.memory_space<vmem>>, %arg10: memref<1x128x16xbf16, #tpu.memory_space<vmem>>, %arg11: memref<1x128x16xbf16, #tpu.memory_space<vmem>>, %arg12: memref<1x1x32xf32, #tpu.memory_space<vmem>>, %arg13: memref<1x4xf32, #tpu.memory_space<vmem>>) attributes {dimension_semantics = [#tpu.dimension_semantics<parallel>, #tpu.dimension_semantics<arbitrary>], iteration_bounds = array<i64: 2, 2>, scalar_prefetch = 0 : i64, scratch_operands = 1 : i64, tpu.core_type = #tpu.core_type<tc>, window_params = [{transform_indices = @transform_0, window_bounds = array<i64: 1, 128, 4>}, {pipeline_mode = #tpu.pipeline_mode<synchronous>, transform_indices = @transform_1, window_bounds = array<i64: 4, 64>}, {pipeline_mode = #tpu.pipeline_mode<synchronous>, transform_indices = @transform_2, window_bounds = array<i64: 1, 64>}, {pipeline_mode = #tpu.pipeline_mode<synchronous>, transform_indices = @transform_3, window_bounds = array<i64: 1, 64>}, {pipeline_mode = #tpu.pipeline_mode<synchronous>, transform_indices = @transform_4, window_bounds = array<i64: 4, 32>}, {pipeline_mode = #tpu.pipeline_mode<synchronous>, transform_indices = @transform_5, window_bounds = array<i64: 1, 32>}, {pipeline_mode = #tpu.pipeline_mode<synchronous>, transform_indices = @transform_6, window_bounds = array<i64: 1, 32>}, {transform_indices = @transform_7, window_bounds = array<i64: 1, 128, 32>}, {transform_indices = @transform_8, window_bounds = array<i64: 1, 128, 16>}, {transform_indices = @transform_9, window_bounds = array<i64: 1, 128, 16>}, {transform_indices = @transform_10, window_bounds = array<i64: 1, 1, 32>}]} {
    %c0 = arith.constant 0 : index
    %c0_0 = arith.constant 0 : index
    %c0_1 = arith.constant 0 : index
    %0 = vector.load %arg2[%c0, %c0_0, %c0_1] : memref<1x128x4xf32, #tpu.memory_space<vmem>>, vector<1x128x4xf32>
    %1 = vector.shape_cast %0 : vector<1x128x4xf32> to vector<128x4xf32>
    %c0_i32 = arith.constant 0 : i32
    %2 = arith.cmpi eq, %arg1, %c0_i32 : i32
    %3 = arith.extui %2 : i1 to i32
    %c0_i32_2 = arith.constant 0 : i32
    %4 = arith.cmpi ne, %3, %c0_i32_2 : i32
    scf.if %4 {
      %cst_26 = arith.constant 0.000000e+00 : f32
      %41 = vector.broadcast %cst_26 : f32 to vector<1x4xf32>
      %c0_27 = arith.constant 0 : index
      %c0_28 = arith.constant 0 : index
      %42 = vector.load %arg13[%c0_27, %c0_28] : memref<1x4xf32, #tpu.memory_space<vmem>>, vector<1x4xf32>
      tpu.vector_store %arg13[%c0_27, %c0_28], %41 {strides = array<i32>} : memref<1x4xf32, #tpu.memory_space<vmem>>, vector<1x4xf32>,
    } else {
    }
    %c0_3 = arith.constant 0 : index
    %c0_4 = arith.constant 0 : index
    %5 = vector.load %arg13[%c0_3, %c0_4] : memref<1x4xf32, #tpu.memory_space<vmem>>, vector<1x4xf32>
    %cst = arith.constant dense<0.000000e+00> : vector<4xf32>
    %6 = vector.multi_reduction <add>, %1, %cst [0] : vector<128x4xf32> to vector<4xf32>
    %7 = vector.shape_cast %6 : vector<4xf32> to vector<1x4xf32>
    %8 = arith.addf %5, %7 : vector<1x4xf32>
    %c0_5 = arith.constant 0 : index
    %c0_6 = arith.constant 0 : index
    %9 = vector.load %arg13[%c0_5, %c0_6] : memref<1x4xf32, #tpu.memory_space<vmem>>, vector<1x4xf32>
    tpu.vector_store %arg13[%c0_5, %c0_6], %8 {strides = array<i32>} : memref<1x4xf32, #tpu.memory_space<vmem>>, vector<1x4xf32>,
    %10 = arith.truncf %1 : vector<128x4xf32> to vector<128x4xbf16>
    %c0_7 = arith.constant 0 : index
    %c0_8 = arith.constant 0 : index
    %11 = vector.load %arg3[%c0_7, %c0_8] : memref<4x64xbf16, #tpu.memory_space<vmem>>, vector<4x64xbf16>
    %cst_9 = arith.constant dense<0.000000e+00> : vector<128x64xf32>
    %12 = tpu.matmul %10, %11, %cst_9 {dimension_numbers = #tpu.dot_dimension_numbers<[1], [0], [0], [1], [0, 0, 1, 1], [], []>} : vector<128x4xbf16>, vector<4x64xbf16>, vector<128x64xf32> -> vector<128x64xf32>
    %c0_10 = arith.constant 0 : index
    %c0_11 = arith.constant 0 : index
    %13 = vector.load %arg4[%c0_10, %c0_11] : memref<1x64xf32, #tpu.memory_space<vmem>>, vector<1x64xf32>
    %14 = vector.broadcast %13 : vector<1x64xf32> to vector<128x64xf32>
    %15 = arith.mulf %12, %14 : vector<128x64xf32>
    %c0_12 = arith.constant 0 : index
    %c0_13 = arith.constant 0 : index
    %16 = vector.load %arg5[%c0_12, %c0_13] : memref<1x64xf32, #tpu.memory_space<vmem>>, vector<1x64xf32>
    %17 = vector.broadcast %16 : vector<1x64xf32> to vector<128x64xf32>
    %18 = arith.addf %15, %17 : vector<128x64xf32>
    %19 = vector.extract_strided_slice %18 {offsets = [0, 0], sizes = [128, 32], strides = [1, 1]} : vector<128x64xf32> to vector<128x32xf32>
    %cst_14 = arith.constant 0.000000e+00 : f32
    %20 = vector.broadcast %cst_14 : f32 to vector<128x32xf32>
    %21 = arith.maximumf %19, %20 : vector<128x32xf32>
    %22 = vector.extract_strided_slice %18 {offsets = [0, 32], sizes = [128, 16], strides = [1, 1]} : vector<128x64xf32> to vector<128x16xf32>
    %cst_15 = arith.constant 0.000000e+00 : f32
    %23 = vector.broadcast %cst_15 : f32 to vector<128x16xf32>
    %24 = arith.maximumf %22, %23 : vector<128x16xf32>
    %25 = vector.extract_strided_slice %18 {offsets = [0, 48], sizes = [128, 16], strides = [1, 1]} : vector<128x64xf32> to vector<128x16xf32>
    %26 = arith.truncf %21 : vector<128x32xf32> to vector<128x32xbf16>
    %c0_16 = arith.constant 0 : index
    %c0_17 = arith.constant 0 : index
    %c0_18 = arith.constant 0 : index
    %27 = vector.load %arg9[%c0_16, %c0_17, %c0_18] : memref<1x128x32xbf16, #tpu.memory_space<vmem>>, vector<1x128x32xbf16>
    %28 = vector.shape_cast %27 : vector<1x128x32xbf16> to vector<128x32xbf16>
    %29 = vector.shape_cast %26 : vector<128x32xbf16> to vector<1x128x32xbf16>
    tpu.vector_store %arg9[%c0_16, %c0_17, %c0_18], %29 {strides = array<i32>} : memref<1x128x32xbf16, #tpu.memory_space<vmem>>, vector<1x128x32xbf16>,
    %30 = arith.truncf %24 : vector<128x16xf32> to vector<128x16xbf16>
    %c0_19 = arith.constant 0 : index
    %c0_20 = arith.constant 0 : index
    %c0_21 = arith.constant 0 : index
    %31 = vector.load %arg10[%c0_19, %c0_20, %c0_21] : memref<1x128x16xbf16, #tpu.memory_space<vmem>>, vector<1x128x16xbf16>
    %32 = vector.shape_cast %31 : vector<1x128x16xbf16> to vector<128x16xbf16>
    %33 = vector.shape_cast %30 : vector<128x16xbf16> to vector<1x128x16xbf16>
    tpu.vector_store %arg10[%c0_19, %c0_20, %c0_21], %33 {strides = array<i32>} : memref<1x128x16xbf16, #tpu.memory_space<vmem>>, vector<1x128x16xbf16>,
    %34 = arith.truncf %25 : vector<128x16xf32> to vector<128x16xbf16>
    %c0_22 = arith.constant 0 : index
    %c0_23 = arith.constant 0 : index
    %c0_24 = arith.constant 0 : index
    %35 = vector.load %arg11[%c0_22, %c0_23, %c0_24] : memref<1x128x16xbf16, #tpu.memory_space<vmem>>, vector<1x128x16xbf16>
    %36 = vector.shape_cast %35 : vector<1x128x16xbf16> to vector<128x16xbf16>
    %37 = vector.shape_cast %34 : vector<128x16xbf16> to vector<1x128x16xbf16>
    tpu.vector_store %arg11[%c0_22, %c0_23, %c0_24], %37 {strides = array<i32>} : memref<1x128x16xbf16, #tpu.memory_space<vmem>>, vector<1x128x16xbf16>,
    %c1_i32 = arith.constant 1 : i32
    %38 = arith.cmpi eq, %arg1, %c1_i32 : i32
    %39 = arith.extui %38 : i1 to i32
    %c0_i32_25 = arith.constant 0 : i32
    %40 = arith.cmpi ne, %39, %c0_i32_25 : i32
    scf.if %40 {
      %c0_26 = arith.constant 0 : index
      %c0_27 = arith.constant 0 : index
      %41 = vector.load %arg13[%c0_26, %c0_27] : memref<1x4xf32, #tpu.memory_space<vmem>>, vector<1x4xf32>
      %cst_28 = arith.constant 3.906250e-03 : f32
      %42 = vector.broadcast %cst_28 : f32 to vector<1x4xf32>
      %43 = arith.mulf %41, %42 : vector<1x4xf32>
      %44 = arith.truncf %43 : vector<1x4xf32> to vector<1x4xbf16>
      %c0_29 = arith.constant 0 : index
      %c0_30 = arith.constant 0 : index
      %45 = vector.load %arg6[%c0_29, %c0_30] : memref<4x32xbf16, #tpu.memory_space<vmem>>, vector<4x32xbf16>
      %cst_31 = arith.constant dense<0.000000e+00> : vector<1x32xf32>
      %46 = tpu.matmul %44, %45, %cst_31 {dimension_numbers = #tpu.dot_dimension_numbers<[1], [0], [0], [1], [0, 0, 1, 1], [], []>} : vector<1x4xbf16>, vector<4x32xbf16>, vector<1x32xf32> -> vector<1x32xf32>
      %c0_32 = arith.constant 0 : index
      %c0_33 = arith.constant 0 : index
      %47 = vector.load %arg7[%c0_32, %c0_33] : memref<1x32xf32, #tpu.memory_space<vmem>>, vector<1x32xf32>
      %48 = arith.mulf %46, %47 : vector<1x32xf32>
      %c0_34 = arith.constant 0 : index
      %c0_35 = arith.constant 0 : index
      %49 = vector.load %arg8[%c0_34, %c0_35] : memref<1x32xf32, #tpu.memory_space<vmem>>, vector<1x32xf32>
      %50 = arith.addf %48, %49 : vector<1x32xf32>
      %cst_36 = arith.constant 0.000000e+00 : f32
      %51 = vector.broadcast %cst_36 : f32 to vector<1x32xf32>
      %52 = arith.maximumf %50, %51 : vector<1x32xf32>
      %c0_37 = arith.constant 0 : index
      %c0_38 = arith.constant 0 : index
      %c0_39 = arith.constant 0 : index
      %53 = vector.load %arg12[%c0_37, %c0_38, %c0_39] : memref<1x1x32xf32, #tpu.memory_space<vmem>>, vector<1x1x32xf32>
      %54 = vector.shape_cast %53 : vector<1x1x32xf32> to vector<1x32xf32>
      %55 = vector.shape_cast %52 : vector<1x32xf32> to vector<1x1x32xf32>
      tpu.vector_store %arg12[%c0_37, %c0_38, %c0_39], %55 {strides = array<i32>} : memref<1x1x32xf32, #tpu.memory_space<vmem>>, vector<1x1x32xf32>,
    } else {
    }
    return
  }
  func.func @transform_0(%arg0: i32, %arg1: i32) -> (i32, i32, i32) {
    %c0_i32 = arith.constant 0 : i32
    %c0_i32_0 = arith.constant 0 : i32
    return %arg0, %arg1, %c0_i32 : i32, i32, i32
  }
  func.func @transform_1(%arg0: i32, %arg1: i32) -> (i32, i32) {
    %c0_i32 = arith.constant 0 : i32
    %c0_i32_0 = arith.constant 0 : i32
    %c0_i32_1 = arith.constant 0 : i32
    return %c0_i32, %c0_i32_0 : i32, i32
  }
  func.func @transform_2(%arg0: i32, %arg1: i32) -> (i32, i32) {
    %c0_i32 = arith.constant 0 : i32
    %c0_i32_0 = arith.constant 0 : i32
    %c0_i32_1 = arith.constant 0 : i32
    return %c0_i32, %c0_i32_0 : i32, i32
  }
  func.func @transform_3(%arg0: i32, %arg1: i32) -> (i32, i32) {
    %c0_i32 = arith.constant 0 : i32
    %c0_i32_0 = arith.constant 0 : i32
    %c0_i32_1 = arith.constant 0 : i32
    return %c0_i32, %c0_i32_0 : i32, i32
  }
  func.func @transform_4(%arg0: i32, %arg1: i32) -> (i32, i32) {
    %c0_i32 = arith.constant 0 : i32
    %c0_i32_0 = arith.constant 0 : i32
    %c0_i32_1 = arith.constant 0 : i32
    return %c0_i32, %c0_i32_0 : i32, i32
  }
  func.func @transform_5(%arg0: i32, %arg1: i32) -> (i32, i32) {
    %c0_i32 = arith.constant 0 : i32
    %c0_i32_0 = arith.constant 0 : i32
    %c0_i32_1 = arith.constant 0 : i32
    return %c0_i32, %c0_i32_0 : i32, i32
  }
  func.func @transform_6(%arg0: i32, %arg1: i32) -> (i32, i32) {
    %c0_i32 = arith.constant 0 : i32
    %c0_i32_0 = arith.constant 0 : i32
    %c0_i32_1 = arith.constant 0 : i32
    return %c0_i32, %c0_i32_0 : i32, i32
  }
  func.func @transform_7(%arg0: i32, %arg1: i32) -> (i32, i32, i32) {
    %c0_i32 = arith.constant 0 : i32
    %c0_i32_0 = arith.constant 0 : i32
    return %arg0, %arg1, %c0_i32 : i32, i32, i32
  }
  func.func @transform_8(%arg0: i32, %arg1: i32) -> (i32, i32, i32) {
    %c0_i32 = arith.constant 0 : i32
    %c0_i32_0 = arith.constant 0 : i32
    return %arg0, %arg1, %c0_i32 : i32, i32, i32
  }
  func.func @transform_9(%arg0: i32, %arg1: i32) -> (i32, i32, i32) {
    %c0_i32 = arith.constant 0 : i32
    %c0_i32_0 = arith.constant 0 : i32
    return %arg0, %arg1, %c0_i32 : i32, i32, i32
  }
  func.func @transform_10(%arg0: i32, %arg1: i32) -> (i32, i32, i32) {
    %c0_i32 = arith.constant 0 : i32
    %c0_i32_0 = arith.constant 0 : i32
    %c0_i32_1 = arith.constant 0 : i32
    return %arg0, %c0_i32, %c0_i32_0 : i32, i32, i32
  }
}

module attributes {stable_mosaic.version = 11 : i64} {
  func.func @_fuse_kernel(%arg0: i32, %arg1: i32, %arg2: memref<1x128x16xbf16, #tpu.memory_space<vmem>>, %arg3: memref<1x128x32xbf16, #tpu.memory_space<vmem>>, %arg4: memref<1x1x32xf32, #tpu.memory_space<vmem>>, %arg5: memref<16x32xbf16, #tpu.memory_space<vmem>>, %arg6: memref<1x32xf32, #tpu.memory_space<vmem>>, %arg7: memref<1x32xf32, #tpu.memory_space<vmem>>, %arg8: memref<32x32xbf16, #tpu.memory_space<vmem>>, %arg9: memref<32x32xbf16, #tpu.memory_space<vmem>>, %arg10: memref<32x32xbf16, #tpu.memory_space<vmem>>, %arg11: memref<1x32xf32, #tpu.memory_space<vmem>>, %arg12: memref<1x32xf32, #tpu.memory_space<vmem>>, %arg13: memref<1x128x32xf32, #tpu.memory_space<vmem>>) attributes {dimension_semantics = [#tpu.dimension_semantics<parallel>, #tpu.dimension_semantics<parallel>], iteration_bounds = array<i64: 2, 2>, scalar_prefetch = 0 : i64, scratch_operands = 0 : i64, tpu.core_type = #tpu.core_type<tc>, window_params = [{transform_indices = @transform_0, window_bounds = array<i64: 1, 128, 16>}, {transform_indices = @transform_1, window_bounds = array<i64: 1, 128, 32>}, {transform_indices = @transform_2, window_bounds = array<i64: 1, 1, 32>}, {pipeline_mode = #tpu.pipeline_mode<synchronous>, transform_indices = @transform_3, window_bounds = array<i64: 16, 32>}, {pipeline_mode = #tpu.pipeline_mode<synchronous>, transform_indices = @transform_4, window_bounds = array<i64: 1, 32>}, {pipeline_mode = #tpu.pipeline_mode<synchronous>, transform_indices = @transform_5, window_bounds = array<i64: 1, 32>}, {pipeline_mode = #tpu.pipeline_mode<synchronous>, transform_indices = @transform_6, window_bounds = array<i64: 32, 32>}, {pipeline_mode = #tpu.pipeline_mode<synchronous>, transform_indices = @transform_7, window_bounds = array<i64: 32, 32>}, {pipeline_mode = #tpu.pipeline_mode<synchronous>, transform_indices = @transform_8, window_bounds = array<i64: 32, 32>}, {pipeline_mode = #tpu.pipeline_mode<synchronous>, transform_indices = @transform_9, window_bounds = array<i64: 1, 32>}, {pipeline_mode = #tpu.pipeline_mode<synchronous>, transform_indices = @transform_10, window_bounds = array<i64: 1, 32>}, {transform_indices = @transform_11, window_bounds = array<i64: 1, 128, 32>}]} {
    %c0 = arith.constant 0 : index
    %c0_0 = arith.constant 0 : index
    %c0_1 = arith.constant 0 : index
    %0 = vector.load %arg2[%c0, %c0_0, %c0_1] : memref<1x128x16xbf16, #tpu.memory_space<vmem>>, vector<1x128x16xbf16>
    %1 = vector.shape_cast %0 : vector<1x128x16xbf16> to vector<128x16xbf16>
    %c0_2 = arith.constant 0 : index
    %c0_3 = arith.constant 0 : index
    %c0_4 = arith.constant 0 : index
    %2 = vector.load %arg3[%c0_2, %c0_3, %c0_4] : memref<1x128x32xbf16, #tpu.memory_space<vmem>>, vector<1x128x32xbf16>
    %3 = vector.shape_cast %2 : vector<1x128x32xbf16> to vector<128x32xbf16>
    %c0_5 = arith.constant 0 : index
    %c0_6 = arith.constant 0 : index
    %c0_7 = arith.constant 0 : index
    %4 = vector.load %arg4[%c0_5, %c0_6, %c0_7] : memref<1x1x32xf32, #tpu.memory_space<vmem>>, vector<1x1x32xf32>
    %5 = vector.shape_cast %4 : vector<1x1x32xf32> to vector<1x32xf32>
    %c0_8 = arith.constant 0 : index
    %c0_9 = arith.constant 0 : index
    %6 = vector.load %arg5[%c0_8, %c0_9] : memref<16x32xbf16, #tpu.memory_space<vmem>>, vector<16x32xbf16>
    %cst = arith.constant dense<0.000000e+00> : vector<128x32xf32>
    %7 = tpu.matmul %1, %6, %cst {dimension_numbers = #tpu.dot_dimension_numbers<[1], [0], [0], [1], [0, 0, 1, 1], [], []>} : vector<128x16xbf16>, vector<16x32xbf16>, vector<128x32xf32> -> vector<128x32xf32>
    %c0_10 = arith.constant 0 : index
    %c0_11 = arith.constant 0 : index
    %8 = vector.load %arg6[%c0_10, %c0_11] : memref<1x32xf32, #tpu.memory_space<vmem>>, vector<1x32xf32>
    %9 = vector.broadcast %8 : vector<1x32xf32> to vector<128x32xf32>
    %10 = arith.mulf %7, %9 : vector<128x32xf32>
    %c0_12 = arith.constant 0 : index
    %c0_13 = arith.constant 0 : index
    %11 = vector.load %arg7[%c0_12, %c0_13] : memref<1x32xf32, #tpu.memory_space<vmem>>, vector<1x32xf32>
    %12 = vector.broadcast %11 : vector<1x32xf32> to vector<128x32xf32>
    %13 = arith.addf %10, %12 : vector<128x32xf32>
    %cst_14 = arith.constant 0.000000e+00 : f32
    %14 = vector.broadcast %cst_14 : f32 to vector<128x32xf32>
    %15 = arith.maximumf %13, %14 : vector<128x32xf32>
    %16 = arith.truncf %5 : vector<1x32xf32> to vector<1x32xbf16>
    %c0_15 = arith.constant 0 : index
    %c0_16 = arith.constant 0 : index
    %17 = vector.load %arg8[%c0_15, %c0_16] : memref<32x32xbf16, #tpu.memory_space<vmem>>, vector<32x32xbf16>
    %cst_17 = arith.constant dense<0.000000e+00> : vector<1x32xf32>
    %18 = tpu.matmul %16, %17, %cst_17 {dimension_numbers = #tpu.dot_dimension_numbers<[1], [0], [0], [1], [0, 0, 1, 1], [], []>} : vector<1x32xbf16>, vector<32x32xbf16>, vector<1x32xf32> -> vector<1x32xf32>
    %c0_18 = arith.constant 0 : index
    %c0_19 = arith.constant 0 : index
    %19 = vector.load %arg9[%c0_18, %c0_19] : memref<32x32xbf16, #tpu.memory_space<vmem>>, vector<32x32xbf16>
    %cst_20 = arith.constant dense<0.000000e+00> : vector<128x32xf32>
    %20 = tpu.matmul %3, %19, %cst_20 {dimension_numbers = #tpu.dot_dimension_numbers<[1], [0], [0], [1], [0, 0, 1, 1], [], []>} : vector<128x32xbf16>, vector<32x32xbf16>, vector<128x32xf32> -> vector<128x32xf32>
    %21 = vector.broadcast %18 : vector<1x32xf32> to vector<128x32xf32>
    %22 = arith.addf %21, %20 : vector<128x32xf32>
    %23 = arith.truncf %15 : vector<128x32xf32> to vector<128x32xbf16>
    %c0_21 = arith.constant 0 : index
    %c0_22 = arith.constant 0 : index
    %24 = vector.load %arg10[%c0_21, %c0_22] : memref<32x32xbf16, #tpu.memory_space<vmem>>, vector<32x32xbf16>
    %cst_23 = arith.constant dense<0.000000e+00> : vector<128x32xf32>
    %25 = tpu.matmul %23, %24, %cst_23 {dimension_numbers = #tpu.dot_dimension_numbers<[1], [0], [0], [1], [0, 0, 1, 1], [], []>} : vector<128x32xbf16>, vector<32x32xbf16>, vector<128x32xf32> -> vector<128x32xf32>
    %26 = arith.addf %22, %25 : vector<128x32xf32>
    %c0_24 = arith.constant 0 : index
    %c0_25 = arith.constant 0 : index
    %27 = vector.load %arg11[%c0_24, %c0_25] : memref<1x32xf32, #tpu.memory_space<vmem>>, vector<1x32xf32>
    %28 = vector.broadcast %27 : vector<1x32xf32> to vector<128x32xf32>
    %29 = arith.mulf %26, %28 : vector<128x32xf32>
    %c0_26 = arith.constant 0 : index
    %c0_27 = arith.constant 0 : index
    %30 = vector.load %arg12[%c0_26, %c0_27] : memref<1x32xf32, #tpu.memory_space<vmem>>, vector<1x32xf32>
    %31 = vector.broadcast %30 : vector<1x32xf32> to vector<128x32xf32>
    %32 = arith.addf %29, %31 : vector<128x32xf32>
    %cst_28 = arith.constant 0.000000e+00 : f32
    %33 = vector.broadcast %cst_28 : f32 to vector<128x32xf32>
    %34 = arith.maximumf %32, %33 : vector<128x32xf32>
    %c0_29 = arith.constant 0 : index
    %c0_30 = arith.constant 0 : index
    %c0_31 = arith.constant 0 : index
    %35 = vector.load %arg13[%c0_29, %c0_30, %c0_31] : memref<1x128x32xf32, #tpu.memory_space<vmem>>, vector<1x128x32xf32>
    %36 = vector.shape_cast %35 : vector<1x128x32xf32> to vector<128x32xf32>
    %37 = vector.shape_cast %34 : vector<128x32xf32> to vector<1x128x32xf32>
    tpu.vector_store %arg13[%c0_29, %c0_30, %c0_31], %37 {strides = array<i32>} : memref<1x128x32xf32, #tpu.memory_space<vmem>>, vector<1x128x32xf32>,
    return
  }
  func.func @transform_0(%arg0: i32, %arg1: i32) -> (i32, i32, i32) {
    %c0_i32 = arith.constant 0 : i32
    %c0_i32_0 = arith.constant 0 : i32
    return %arg0, %arg1, %c0_i32 : i32, i32, i32
  }
  func.func @transform_1(%arg0: i32, %arg1: i32) -> (i32, i32, i32) {
    %c0_i32 = arith.constant 0 : i32
    %c0_i32_0 = arith.constant 0 : i32
    return %arg0, %arg1, %c0_i32 : i32, i32, i32
  }
  func.func @transform_2(%arg0: i32, %arg1: i32) -> (i32, i32, i32) {
    %c0_i32 = arith.constant 0 : i32
    %c0_i32_0 = arith.constant 0 : i32
    %c0_i32_1 = arith.constant 0 : i32
    return %arg0, %c0_i32, %c0_i32_0 : i32, i32, i32
  }
  func.func @transform_3(%arg0: i32, %arg1: i32) -> (i32, i32) {
    %c0_i32 = arith.constant 0 : i32
    %c0_i32_0 = arith.constant 0 : i32
    %c0_i32_1 = arith.constant 0 : i32
    return %c0_i32, %c0_i32_0 : i32, i32
  }
  func.func @transform_4(%arg0: i32, %arg1: i32) -> (i32, i32) {
    %c0_i32 = arith.constant 0 : i32
    %c0_i32_0 = arith.constant 0 : i32
    %c0_i32_1 = arith.constant 0 : i32
    return %c0_i32, %c0_i32_0 : i32, i32
  }
  func.func @transform_5(%arg0: i32, %arg1: i32) -> (i32, i32) {
    %c0_i32 = arith.constant 0 : i32
    %c0_i32_0 = arith.constant 0 : i32
    %c0_i32_1 = arith.constant 0 : i32
    return %c0_i32, %c0_i32_0 : i32, i32
  }
  func.func @transform_6(%arg0: i32, %arg1: i32) -> (i32, i32) {
    %c0_i32 = arith.constant 0 : i32
    %c0_i32_0 = arith.constant 0 : i32
    %c0_i32_1 = arith.constant 0 : i32
    return %c0_i32, %c0_i32_0 : i32, i32
  }
  func.func @transform_7(%arg0: i32, %arg1: i32) -> (i32, i32) {
    %c0_i32 = arith.constant 0 : i32
    %c0_i32_0 = arith.constant 0 : i32
    %c0_i32_1 = arith.constant 0 : i32
    return %c0_i32, %c0_i32_0 : i32, i32
  }
  func.func @transform_8(%arg0: i32, %arg1: i32) -> (i32, i32) {
    %c0_i32 = arith.constant 0 : i32
    %c0_i32_0 = arith.constant 0 : i32
    %c0_i32_1 = arith.constant 0 : i32
    return %c0_i32, %c0_i32_0 : i32, i32
  }
  func.func @transform_9(%arg0: i32, %arg1: i32) -> (i32, i32) {
    %c0_i32 = arith.constant 0 : i32
    %c0_i32_0 = arith.constant 0 : i32
    %c0_i32_1 = arith.constant 0 : i32
    return %c0_i32, %c0_i32_0 : i32, i32
  }
  func.func @transform_10(%arg0: i32, %arg1: i32) -> (i32, i32) {
    %c0_i32 = arith.constant 0 : i32
    %c0_i32_0 = arith.constant 0 : i32
    %c0_i32_1 = arith.constant 0 : i32
    return %c0_i32, %c0_i32_0 : i32, i32
  }
  func.func @transform_11(%arg0: i32, %arg1: i32) -> (i32, i32, i32) {
    %c0_i32 = arith.constant 0 : i32
    %c0_i32_0 = arith.constant 0 : i32
    return %arg0, %arg1, %c0_i32 : i32, i32, i32
  }
}

</mosaic_0001>

<bundles_post_ra>
// kernel: asp_oc_module_v5_forward.3
= control target key start
LH: loop header
LB: loop body
LE: loop exit
PB: predicated region body
PF: predicated region fallthrough
CT: control target
= control target key end

     0   :  { %s1296_s13 = smov 0   ;;  %s1298_s14 = smov 0   ;;  %s1621_s0 = inlined_call_operand.vmem [shape: f32[2,256,4], index: 0, kind: input, shape index: {}]   ;;  %s1622_s1 = inlined_call_operand.vmem [shape: bf16[4,64], index: 1, kind: input, shape index: {}]   ;;  %s1623_s2 = inlined_call_operand.vmem [shape: f32[1,64], index: 2, kind: input, shape index: {}]   ;;  %s1624_s3 = inlined_call_operand.vmem [shape: f32[1,64], index: 3, kind: input, shape index: {}]   ;;  %s1625_s4 = inlined_call_operand.vmem [shape: bf16[4,32], index: 4, kind: input, shape index: {}]   ;;  %s1626_s5 = inlined_call_operand.vmem [shape: f32[1,32], index: 5, kind: input, shape index: {}]   ;;  %s1627_s6 = inlined_call_operand.vmem [shape: f32[1,32], index: 6, kind: input, shape index: {}]   ;;  %s1628_s7 = inlined_call_operand.vmem [shape: bf16[2,256,32], index: 7, kind: output, shape index: {0}]   ;;  %s1629_s8 = inlined_call_operand.vmem [shape: bf16[2,256,16], index: 8, kind: output, shape index: {1}]   ;;  %s1630_s9 = inlined_call_operand.vmem [shape: bf16[2,256,16], index: 9, kind: output, shape index: {2}]   ;;  %s1631_s10 = inlined_call_operand.vmem [shape: f32[2,1,32], index: 10, kind: output, shape index: {3}]  }
   0x1   :  { %s1300_s15 = smov 0   ;;  %s1302_s16 = smov 0  }
   0x2   :  { %s1304_s17 = smov 0  }
   0x3 LB: > { %1635 = sst [smem:[#allocation3_spill]] %s1228_s15  ;;  %s30_s18 = sadd.s32 1, %s1228_s15  ;;  %s1236_s17 = sphi %s1304_s17, %s21_s17   ;;  %s1232_s16 = sphi %s1302_s16, %s1644_s16   ;;  %s1228_s15 = sphi %s1300_s15, %s1643_s15   ;;  %s1224_s14 = sphi %s1298_s14, %s1642_s14   ;;  %s1220_s13 = sphi %s1296_s13, %s1641_s13  }
   0x4   : > { %1636 = sst [smem:[#allocation4_spill]] %s1232_s16  ;;  %s33_s19 = sadd.s32 1, %s1232_s16 }
   0x5   : > { %1637 = sst [smem:[#allocation5_spill]] %s1236_s17  ;;  %p31_p0 = scmp.ge.s32.totalorder %s30_s18, 2 }
   0x6   : > { %p1124_p1 = scmp.ge.s32.totalorder %s1236_s17, 1  ;;  %p344_p2 = scmp.lt.s32.totalorder %s1236_s17, 5 }
   0x7   : > { %s1646_s18 = smov (%p31_p0, %s30_s18), 0  ;;  %s1648_s19 = smov (!%p31_p0, %s33_s19), %s1232_s16 }
   0x8   : > { %1638 = sst [smem:[#allocation6_spill]] %s1646_s18  ;;  %p345_p3 = pnand %p1124_p1, %p344_p2 }
   0x9   : > { %p35_p4 = scmp.ge.s32.totalorder %s1648_s19, 2  ;;  %s1125_s20 = sshll.u32 (!%p345_p3), %s1220_s13, 4 }
   0xa   : > { %348 = sbr.rel (%p345_p3) target bundleno = 503 (0x1f7), region = 48  ;;  %p412_p5 = scmp.lt.s32.totalorder (!%p345_p3), %s1224_s14, 1 }
   0xb   : > { %s1650_s19 = smov (%p35_p4, %s1648_s19), 0  ;;  %p414_p6 = scmp.lt.s32.totalorder (!%p345_p3), %s1125_s20, 31 }
   0xc   : > { %1639 = sst [smem:[#allocation7_spill]] %s1650_s19  ;;  %p1137_p7 = scmp.ne.s32.totalorder (!%p345_p3), %s1220_s13, 0 }
   0xf   : > { %s1652_s14 = smov (!%p412_p5, %s1224_s14), 1  ;;  %s1654_s20 = smov (!%p414_p6, %s1125_s20), 31 }
  0x10   : > { %s1126_s21 = sshll.u32 %s1652_s14, 5  ;;  %s453_s24 = scalar_lea.vmem %s1631_s10, %s1652_s14 }
  0x11   : > { %s417_s25 = sadd.s32 %s1126_s21, %s1654_s20 }
  0x12   : > { %s1127_s26 = sshll.u32 %s417_s25, 3  ;;  %s1130_s27 = sshll.u32 %s417_s25, 2 }
  0x13   : > { %s419_s30 = scalar_lea.vmem %s1621_s0, %s1127_s26  ;;  %s1342_s19 = scalar_lea.vmem %s1628_s7, %s1130_s27 }
  0x14   : > { %s1347_s15 = scalar_lea.vmem %s1629_s8, %s1130_s27  ;;  %s1352_s20 = scalar_lea.vmem %s1630_s9, %s1130_s27  ;;  %v455_v0 = vld [vmem:[%s419_s30] sm:$0xff]  ;;  %v456_v1 = vld [vmem:[%s419_s30 + $0x8] sm:$0xff]  ;;  %v1354_v2 = vld [vmem:[%s419_s30 + $0x10] sm:$0xff] }
  0x15   : > { %v1356_v3 = vld [vmem:[%s419_s30 + $0x18] sm:$0xff]  ;;  %v459_v4 = vld [vmem:[%s419_s30 + $0x20] sm:$0xff]  ;;  %v460_v5 = vld [vmem:[%s419_s30 + $0x28] sm:$0xff]  ;;  %474 = sbr.rel (%p1137_p7) target bundleno = 28 (0x1c), region = 52 }
  0x16   : > { %v461_v6 = vld [vmem:[%s419_s30 + $0x30] sm:$0xff]  ;;  %v462_v7 = vld [vmem:[%s419_s30 + $0x38] sm:$0xff]  ;;  %v463_v8 = vld [vmem:[%s419_s30 + $0x40] sm:$0xff] }
  0x17   : > { %v464_v9 = vld [vmem:[%s419_s30 + $0x48] sm:$0xff]  ;;  %v465_v10 = vld [vmem:[%s419_s30 + $0x50] sm:$0xff]  ;;  %v466_v11 = vld [vmem:[%s419_s30 + $0x58] sm:$0xff] }
  0x18   : > { %v467_v12 = vld [vmem:[%s419_s30 + $0x60] sm:$0xff]  ;;  %v468_v13 = vld [vmem:[%s419_s30 + $0x68] sm:$0xff]  ;;  %v469_v14 = vld [vmem:[%s419_s30 + $0x70] sm:$0xff] }
  0x19   : > { %v470_v15 = vld [vmem:[%s419_s30 + $0x78] sm:$0xff] }
  0x1a   : > { %vm475_vm0 = vcmask 24576   ;;  %v1238_v16 = vmov 0.0  }
  0x1b   : > { %476 = vst.msk [vmem:[#allocation2] sm:$0x1] %vm475_vm0, %v1238_v16 }
  0x1c PF: > { %v527_v17 = vld [vmem:[%s1622_s1] sm:$0x3]  ;;  %vm552_vm1 = vcmask 1041408   ;;  %vm478_vm2 = vcmask 31744   ;;  %v519_v18 = vpack.c.bf16 %v456_v1, %v455_v0  ;;  %v521_v19 = vpack.c.bf16 %v460_v5, %v459_v4  ;;  %s1239_s26 = smov 80   ;;  %s1240_s27 = smov 96  }
  0x1d   : > { %v554_v20 = vsel %vm552_vm1, %v527_v17, 0  ;;  %v479_v21 = vsel %vm478_vm2, %v455_v0, 0.0  ;;  %v480_v22 = vsel %vm478_vm2, %v456_v1, 0.0  ;;  %v482_v23 = vsel %vm478_vm2, %v1354_v2, 0.0  ;;  %p1146_p8 = scmp.ne.s32.totalorder %s1220_s13, 1 }
  0x1e   : > { %563 = vmatpush.bf16.msra.mxu0 %v554_v20  ;;  %1150 = vmatpush.bf16.msra.mxu1 %v554_v20  ;;  %v481_v24 = vadd.f32 %v480_v22, %v479_v21  ;;  %v484_v25 = vsel %vm478_vm2, %v1356_v3, 0.0  ;;  %v486_v27 = vsel %vm478_vm2, %v459_v4, 0.0  ;;  %v523_v28 = vpack.c.bf16 %v464_v9, %v463_v8 }
  0x1f   : > { %1151 = vmatpush.bf16.msra.mxu2 %v554_v20  ;;  %1152 = vmatpush.bf16.msra.mxu3 %v554_v20  ;;  %v525_v30 = vpack.c.bf16 %v468_v13, %v467_v12  ;;  %v488_v31 = vsel %vm478_vm2, %v460_v5, 0.0  ;;  %v490_v33 = vsel %vm478_vm2, %v461_v6, 0.0  ;;  %v492_v35 = vsel %vm478_vm2, %v462_v7, 0.0 }
  0x20   : > { %v483_v26 = vadd.f32 %v482_v23, %v481_v24  ;;  %v494_v37 = vsel %vm478_vm2, %v463_v8, 0.0  ;;  %v496_v39 = vsel %vm478_vm2, %v464_v9, 0.0  ;;  %v498_v41 = vsel %vm478_vm2, %v465_v10, 0.0 }
  0x21   : > { %1138 = vmatmul.msk.bf16.vlgmr.msra.gmra.mxu0 %vm478_vm2, %v519_v18  ;;  %1140 = vmatmul.msk.bf16.vlgmr.msra.gmra.mxu1 %vm478_vm2, %v521_v19  ;;  %v522_v42 = vpack.c.bf16 %v462_v7, %v461_v6  ;;  %v520_v43 = vpack.c.bf16 %v1356_v3, %v1354_v2  ;;  %v500_v45 = vsel %vm478_vm2, %v466_v11, 0.0  ;;  %v524_v46 = vpack.c.bf16 %v466_v11, %v465_v10  ;;  %v1394_v2 = vld [vmem:[%s1623_s2] ss:$0 sm:$0xff] }
  0x22   : > { %v485_v29 = vadd.f32 %v484_v25, %v483_v26  ;;  %1142 = vmatmul.msk.bf16.vlgmr.msra.gmra.mxu2 %vm478_vm2, %v523_v28  ;;  %1144 = vmatmul.msk.bf16.vlgmr.msra.gmra.mxu3 %vm478_vm2, %v525_v30  ;;  %v526_v48 = vpack.c.bf16 %v470_v15, %v469_v14  ;;  %v502_v49 = vsel %vm478_vm2, %v467_v12, 0.0  ;;  %v504_v51 = vsel %vm478_vm2, %v468_v13, 0.0  ;;  %v477_v63 = vld [vmem:[#allocation2] sm:$0x1] }
  0x23   : > { %v506_v53 = vsel %vm478_vm2, %v469_v14, 0.0  ;;  %v508_v55 = vsel %vm478_vm2, %v470_v15, 0.0  ;;  %vm517_vm3 = vcmask 24576   ;;  %v1399_v3 = vld [vmem:[%s1624_s3] ss:$0 sm:$0xff]  ;;  %vm677_vm4 = vcmask 257024  }
  0x24   : > { %v487_v32 = vadd.f32 %v486_v27, %v485_v29  ;;  %vm758_vm5 = vcmask 125952  }
  0x26   : > { %v489_v34 = vadd.f32 %v488_v31, %v487_v32 }
  0x28   : > { %v491_v36 = vadd.f32 %v490_v33, %v489_v34 }
  0x2a   : > { %v493_v38 = vadd.f32 %v492_v35, %v491_v36 }
  0x2c   : > { %v495_v40 = vadd.f32 %v494_v37, %v493_v38 }
  0x2e   : > { %v497_v44 = vadd.f32 %v496_v39, %v495_v40 }
  0x30   : > { %v499_v47 = vadd.f32 %v498_v41, %v497_v44 }
  0x31   : > { %1141 = vmatmul.msk.bf16.gmra.mxu1 %vm478_vm2, %v522_v42  ;;  %1139 = vmatmul.msk.bf16.gmra.mxu0 %vm478_vm2, %v520_v43 }
  0x32   : > { %v501_v50 = vadd.f32 %v500_v45, %v499_v47  ;;  %1143 = vmatmul.msk.bf16.gmra.mxu2 %vm478_vm2, %v524_v46  ;;  %1145 = vmatmul.msk.bf16.gmra.mxu3 %vm478_vm2, %v526_v48 }
  0x34   : > { %v503_v52 = vadd.f32 %v502_v49, %v501_v50 }
  0x36   : > { %v505_v54 = vadd.f32 %v504_v51, %v503_v52 }
  0x38   : > { %v507_v56 = vadd.f32 %v506_v53, %v505_v54 }
  0x3a   : > { %v509_v57 = vadd.f32 %v508_v55, %v507_v56 }
  0x3c   : > { %v510_v58 = vrot.slane %v509_v57, 4 }
  0x3e   : > { %v511_v59 = vadd.f32 %v510_v58, %v509_v57 }
  0x40   : > { %v512_v60 = vrot.slane %v511_v59, 2 }
  0x42   : > { %v513_v61 = vadd.f32 %v512_v60, %v511_v59 }
  0x44   : > { %v514_v62 = vrot.slane %v513_v61, 1 }
  0x46   : > { %v515_v0 = vadd.f32 %v514_v62, %v513_v61 }
  0x48   : > { %v516_v1 = vadd.f32 %v515_v0, %v477_v63 }
  0x4a   : > { %518 = vst.msk [vmem:[#allocation2] sm:$0x1] %vm517_vm3, %v516_v1 }
  0x9e   : > { %v565_v4 = vpop.f32.mrf.mxu0  ;;  %v575_v5 = vpop.f32.mrf.mxu1 }
  0x9f   : > { %v609_v6 = vmul.f32 %v1394_v2, %v565_v4  ;;  %v613_v7 = vmul.f32 %v1394_v2, %v575_v5 }
  0xa1   : > { %v629_v8 = vadd.f32 %v1399_v3, %v609_v6  ;;  %v633_v9 = vadd.f32 %v1399_v3, %v613_v7 }
  0xa3   : > { %v779_v10 = vpack.c.bf16 %v633_v9, %v633_v9  ;;  %v775_v11 = vpack.c.bf16 %v629_v8, %v629_v8  ;;  %v645_v12 = vmax.f32 %v629_v8, 0.0  ;;  %v649_v13 = vmax.f32 %v633_v9, 0.0 }
  0xa5   : > { %815 = vrot.lane.b32.xlu2 %v779_v10, %s1239_s26  ;;  %807 = vrot.lane.b32.xlu1 %v775_v11, %s1239_s26  ;;  %v661_v14 = vpack.c.bf16 %v645_v12, %v645_v12  ;;  %v585_v15 = vpop.f32.mrf.mxu2  ;;  %v665_v17 = vpack.c.bf16 %v649_v13, %v649_v13  ;;  %v595_v19 = vpop.f32.mrf.mxu3 }
  0xa6   : > { %v567_v16 = vpop.f32.mrf.mxu0  ;;  %v617_v18 = vmul.f32 %v1394_v2, %v585_v15  ;;  %v577_v21 = vpop.f32.mrf.mxu1  ;;  %v621_v22 = vmul.f32 %v1394_v2, %v595_v19 }
  0xa7   : > { %v610_v20 = vmul.f32 %v1394_v2, %v567_v16  ;;  %710 = vrot.lane.b32.xlu0 %v661_v14, %s1240_s27  ;;  %678 = vst.msk [vmem:[%s1342_s19] sm:$0xf] %vm677_vm4, %v661_v14  ;;  %v614_v23 = vmul.f32 %v1394_v2, %v577_v21 }
  0xa8   : > { %682 = vst.msk [vmem:[%s1342_s19 + $0x10] sm:$0xf] %vm677_vm4, %v665_v17  ;;  %v637_v24 = vadd.f32 %v1399_v3, %v617_v18  ;;  %v641_v26 = vadd.f32 %v1399_v3, %v621_v22 }
  0xa9   : > { %v1418_v25 = vadd.f32 %v1399_v3, %v610_v20  ;;  %v1422_v27 = vadd.f32 %v1399_v3, %v614_v23 }
  0xaa   : > { %v783_v28 = vpack.c.bf16 %v637_v24, %v637_v24  ;;  %v653_v29 = vmax.f32 %v637_v24, 0.0  ;;  %v787_v31 = vpack.c.bf16 %v641_v26, %v641_v26  ;;  %v657_v32 = vmax.f32 %v641_v26, 0.0 }
  0xab   : > { %v646_v30 = vmax.f32 %v1418_v25, 0.0  ;;  %v650_v33 = vmax.f32 %v1422_v27, 0.0  ;;  %v776_v9 = vpack.c.bf16 %v1418_v25, %v1418_v25  ;;  %v780_v14 = vpack.c.bf16 %v1422_v27, %v1422_v27 }
  0xac   : > { %v669_v34 = vpack.c.bf16 %v653_v29, %v653_v29  ;;  %v673_v36 = vpack.c.bf16 %v657_v32, %v657_v32 }
  0xad   : > { %718 = vrot.lane.b32.xlu2 %v665_v17, %s1240_s27  ;;  %v587_v35 = vpop.f32.mrf.mxu2  ;;  %831 = vrot.lane.b32.xlu1 %v787_v31, %s1239_s26  ;;  %v1428_v38 = vpack.c.bf16 %v650_v33, %v650_v33  ;;  %v1430_v39 = vpack.c.bf16 %v646_v30, %v646_v30  ;;  %v597_v41 = vpop.f32.mrf.mxu3 }
  0xae   : > { %v570_v37 = vpop.f32.mrf.mxu0  ;;  %v618_v40 = vmul.f32 %v1394_v2, %v587_v35  ;;  %686 = vst.msk [vmem:[%s1342_s19 + $0x20] sm:$0xf] %vm677_vm4, %v669_v34  ;;  %v580_v42 = vpop.f32.mrf.mxu1  ;;  %v622_v44 = vmul.f32 %v1394_v2, %v597_v41 }
  0xaf   : > { %823 = vrot.lane.b32.xlu0 %v783_v28, %s1239_s26  ;;  %v611_v43 = vmul.f32 %v1394_v2, %v570_v37  ;;  %690 = vst.msk [vmem:[%s1342_s19 + $0x30] sm:$0xf] %vm677_vm4, %v673_v36  ;;  %v615_v45 = vmul.f32 %v1394_v2, %v580_v42 }
  0xb0   : > { %v638_v46 = vadd.f32 %v1399_v3, %v618_v40  ;;  %683 = vst.msk [vmem:[%s1342_s19 + $0x14] sm:$0xf] %vm677_vm4, %v1428_v38  ;;  %v1449_v48 = vadd.f32 %v1399_v3, %v622_v44 }
  0xb1   : > { %v1443_v47 = vadd.f32 %v1399_v3, %v611_v43  ;;  %v635_v49 = vadd.f32 %v1399_v3, %v615_v45  ;;  %679 = vst.msk [vmem:[%s1342_s19 + $0x4] sm:$0xf] %vm677_vm4, %v1430_v39 }
  0xb2   : > { %v654_v51 = vmax.f32 %v638_v46, 0.0  ;;  %v784_v52 = vpack.c.bf16 %v638_v46, %v638_v46  ;;  %v658_v53 = vmax.f32 %v1449_v48, 0.0  ;;  %v788_v33 = vpack.c.bf16 %v1449_v48, %v1449_v48 }
  0xb3   : > { %v647_v50 = vmax.f32 %v1443_v47, 0.0  ;;  %v651_v54 = vmax.f32 %v635_v49, 0.0  ;;  %v781_v24 = vpack.c.bf16 %v635_v49, %v635_v49 }
  0xb4   : > { %v670_v56 = vpack.c.bf16 %v654_v51, %v654_v51  ;;  %v674_v57 = vpack.c.bf16 %v658_v53, %v658_v53 }
  0xb5   : > { %726 = vrot.lane.b32.xlu2 %v669_v34, %s1240_s27  ;;  %v663_v55 = vpack.c.bf16 %v647_v50, %v647_v50  ;;  %825 = vrot.lane.b32.xlu1 %v784_v52, %s1239_s26  ;;  %v590_v59 = vpop.f32.mrf.mxu2  ;;  %v667_v60 = vpack.c.bf16 %v651_v54, %v651_v54  ;;  %v600_v0 = vpop.f32.mrf.mxu3 }
  0xb6   : > { %v572_v58 = vpop.f32.mrf.mxu0  ;;  %v582_v61 = vpop.f32.mrf.mxu1  ;;  %v619_v63 = vmul.f32 %v1394_v2, %v590_v59  ;;  %691 = vst.msk [vmem:[%s1342_s19 + $0x34] sm:$0xf] %vm677_vm4, %v674_v57  ;;  %v623_v4 = vmul.f32 %v1394_v2, %v600_v0 }
  0xb7   : > { %734 = vrot.lane.b32.xlu0 %v673_v36, %s1240_s27  ;;  %v612_v62 = vmul.f32 %v1394_v2, %v572_v58  ;;  %680 = vst.msk [vmem:[%s1342_s19 + $0x8] sm:$0xf] %vm677_vm4, %v663_v55  ;;  %v616_v1 = vmul.f32 %v1394_v2, %v582_v61 }
  0xb8   : > { %v639_v6 = vadd.f32 %v1399_v3, %v619_v63  ;;  %687 = vst.msk [vmem:[%s1342_s19 + $0x24] sm:$0xf] %vm677_vm4, %v670_v56  ;;  %v643_v8 = vadd.f32 %v1399_v3, %v623_v4 }
  0xb9   : > { %v632_v5 = vadd.f32 %v1399_v3, %v612_v62  ;;  %v636_v7 = vadd.f32 %v1399_v3, %v616_v1  ;;  %684 = vst.msk [vmem:[%s1342_s19 + $0x18] sm:$0xf] %vm677_vm4, %v667_v60 }
  0xba   : > { %v655_v10 = vmax.f32 %v639_v6, 0.0  ;;  %v659_v12 = vmax.f32 %v643_v8, 0.0  ;;  %v785_v28 = vpack.c.bf16 %v639_v6, %v639_v6  ;;  %v789_v35 = vpack.c.bf16 %v643_v8, %v643_v8 }
  0xbb   : > { %v648_v11 = vmax.f32 %v632_v5, 0.0  ;;  %v652_v13 = vmax.f32 %v636_v7, 0.0  ;;  %v782_v30 = vpack.c.bf16 %v636_v7, %v636_v7  ;;  %v778_v31 = vpack.c.bf16 %v632_v5, %v632_v5 }
  0xbc   : > { %v671_v15 = vpack.c.bf16 %v655_v10, %v655_v10  ;;  %v675_v18 = vpack.c.bf16 %v659_v12, %v659_v12 }
  0xbd   : > { %809 = vrot.lane.b32.xlu2 %v776_v9, %s1239_s26  ;;  %v664_v16 = vpack.c.bf16 %v648_v11, %v648_v11  ;;  %736 = vrot.lane.b32.xlu1 %v674_v57, %s1240_s27  ;;  %v592_v17 = vpop.f32.mrf.mxu2  ;;  %v668_v19 = vpack.c.bf16 %v652_v13, %v652_v13  ;;  %v602_v21 = vpop.f32.mrf.mxu3 }
  0xbe   : > { %v620_v20 = vmul.f32 %v1394_v2, %v592_v17  ;;  %688 = vst.msk [vmem:[%s1342_s19 + $0x28] sm:$0xf] %vm677_vm4, %v671_v15  ;;  %v624_v22 = vmul.f32 %v1394_v2, %v602_v21 }
  0xbf   : > { %817 = vrot.lane.b32.xlu0 %v780_v14, %s1239_s26  ;;  %692 = vst.msk [vmem:[%s1342_s19 + $0x38] sm:$0xf] %vm677_vm4, %v675_v18 }
  0xc0   : > { %v640_v23 = vadd.f32 %v1399_v3, %v620_v20  ;;  %681 = vst.msk [vmem:[%s1342_s19 + $0xc] sm:$0xf] %vm677_vm4, %v664_v16  ;;  %v644_v25 = vadd.f32 %v1399_v3, %v624_v22  ;;  %v777_v3 = vpack.c.bf16 %v1443_v47, %v1443_v47 }
  0xc1   : > { %685 = vst.msk [vmem:[%s1342_s19 + $0x1c] sm:$0xf] %vm677_vm4, %v668_v19 }
  0xc2   : > { %v656_v26 = vmax.f32 %v640_v23, 0.0  ;;  %v660_v2 = vmax.f32 %v644_v25, 0.0  ;;  %v786_v32 = vpack.c.bf16 %v640_v23, %v640_v23  ;;  %v790_v34 = vpack.c.bf16 %v644_v25, %v644_v25 }
  0xc4   : > { %v672_v27 = vpack.c.bf16 %v656_v26, %v656_v26  ;;  %v676_v29 = vpack.c.bf16 %v660_v2, %v660_v2 }
  0xc5   : > { %720 = vrot.lane.b32.xlu2 %v1428_v38, %s1240_s27  ;;  %819 = vrot.lane.b32.xlu1 %v781_v24, %s1239_s26 }
  0xc6   : > { %689 = vst.msk [vmem:[%s1342_s19 + $0x2c] sm:$0xf] %vm677_vm4, %v672_v27 }
  0xc7   : > { %712 = vrot.lane.b32.xlu0 %v1430_v39, %s1240_s27  ;;  %693 = vst.msk [vmem:[%s1342_s19 + $0x3c] sm:$0xf] %vm677_vm4, %v676_v29 }
  0xcd   : > { %827 = vrot.lane.b32.xlu2 %v785_v28, %s1239_s26  ;;  %714 = vrot.lane.b32.xlu1 %v663_v55, %s1240_s27 }
  0xcf   : > { %728 = vrot.lane.b32.xlu0 %v670_v56, %s1240_s27 }
  0xd5   : > { %738 = vrot.lane.b32.xlu2 %v675_v18, %s1240_s27  ;;  %730 = vrot.lane.b32.xlu1 %v671_v15, %s1240_s27 }
  0xd7   : > { %811 = vrot.lane.b32.xlu0 %v777_v3, %s1239_s26 }
  0xdd   : > { %821 = vrot.lane.b32.xlu2 %v782_v30, %s1239_s26  ;;  %813 = vrot.lane.b32.xlu1 %v778_v31, %s1239_s26 }
  0xdf   : > { %722 = vrot.lane.b32.xlu0 %v667_v60, %s1240_s27 }
  0xe5   : > { %732 = vrot.lane.b32.xlu2 %v672_v27, %s1240_s27  ;;  %716 = vrot.lane.b32.xlu1 %v664_v16, %s1240_s27 }
  0xe7   : > { %829 = vrot.lane.b32.xlu0 %v786_v32, %s1239_s26 }
  0xed   : > { %833 = vrot.lane.b32.xlu2 %v788_v33, %s1239_s26  ;;  %724 = vrot.lane.b32.xlu1 %v668_v19, %s1240_s27 }
  0xef   : > { %740 = vrot.lane.b32.xlu0 %v676_v29, %s1240_s27 }
  0xf5   : > { %837 = vrot.lane.b32.xlu1 %v790_v34, %s1239_s26 }
  0xf7   : > { %835 = vrot.lane.b32.xlu0 %v789_v35, %s1239_s26 }
  0xff   : > { %v816_v36 = vpop.permute.xlu2 %815 }
 0x100   : > { %859 = vst.msk [vmem:[%s1352_s20 + $0x10] sm:$0xf] %vm758_vm5, %v816_v36 }
 0x107   : > { %v719_v37 = vpop.permute.xlu2 %718 }
 0x108   : > { %763 = vst.msk [vmem:[%s1347_s15 + $0x10] sm:$0xf] %vm758_vm5, %v719_v37 }
 0x10f   : > { %v727_v38 = vpop.permute.xlu2 %726 }
 0x110   : > { %767 = vst.msk [vmem:[%s1347_s15 + $0x20] sm:$0xf] %vm758_vm5, %v727_v38 }
 0x117   : > { %v808_v39 = vpop.permute.xlu1 %807  ;;  %v810_v40 = vpop.permute.xlu2 %809 }
 0x118   : > { %855 = vst.msk [vmem:[%s1352_s20] sm:$0xf] %vm758_vm5, %v808_v39 }
 0x119   : > { %856 = vst.msk [vmem:[%s1352_s20 + $0x4] sm:$0xf] %vm758_vm5, %v810_v40  ;;  %v711_v41 = vpop.permute.xlu0 %710 }
 0x11a   : > { %759 = vst.msk [vmem:[%s1347_s15] sm:$0xf] %vm758_vm5, %v711_v41 }
 0x11f   : > { %v721_v42 = vpop.permute.xlu2 %720  ;;  %v832_v43 = vpop.permute.xlu1 %831 }
 0x120   : > { %764 = vst.msk [vmem:[%s1347_s15 + $0x14] sm:$0xf] %vm758_vm5, %v721_v42 }
 0x121   : > { %867 = vst.msk [vmem:[%s1352_s20 + $0x30] sm:$0xf] %vm758_vm5, %v832_v43  ;;  %v824_v44 = vpop.permute.xlu0 %823 }
 0x122   : > { %863 = vst.msk [vmem:[%s1352_s20 + $0x20] sm:$0xf] %vm758_vm5, %v824_v44 }
 0x127   : > { %v828_v45 = vpop.permute.xlu2 %827  ;;  %v826_v46 = vpop.permute.xlu1 %825 }
 0x128   : > { %865 = vst.msk [vmem:[%s1352_s20 + $0x28] sm:$0xf] %vm758_vm5, %v828_v45 }
 0x129   : > { %864 = vst.msk [vmem:[%s1352_s20 + $0x24] sm:$0xf] %vm758_vm5, %v826_v46  ;;  %v735_v47 = vpop.permute.xlu0 %734 }
 0x12a   : > { %771 = vst.msk [vmem:[%s1347_s15 + $0x30] sm:$0xf] %vm758_vm5, %v735_v47 }
 0x12f   : > { %v739_v48 = vpop.permute.xlu2 %738  ;;  %v737_v49 = vpop.permute.xlu1 %736 }
 0x130   : > { %773 = vst.msk [vmem:[%s1347_s15 + $0x38] sm:$0xf] %vm758_vm5, %v739_v48 }
 0x131   : > { %772 = vst.msk [vmem:[%s1347_s15 + $0x34] sm:$0xf] %vm758_vm5, %v737_v49  ;;  %v818_v50 = vpop.permute.xlu0 %817 }
 0x132   : > { %860 = vst.msk [vmem:[%s1352_s20 + $0x14] sm:$0xf] %vm758_vm5, %v818_v50 }
 0x137   : > { %v822_v51 = vpop.permute.xlu2 %821  ;;  %v820_v52 = vpop.permute.xlu1 %819 }
 0x138   : > { %862 = vst.msk [vmem:[%s1352_s20 + $0x1c] sm:$0xf] %vm758_vm5, %v822_v51 }
 0x139   : > { %861 = vst.msk [vmem:[%s1352_s20 + $0x18] sm:$0xf] %vm758_vm5, %v820_v52  ;;  %v713_v53 = vpop.permute.xlu0 %712 }
 0x13a   : > { %760 = vst.msk [vmem:[%s1347_s15 + $0x4] sm:$0xf] %vm758_vm5, %v713_v53 }
 0x13f   : > { %v733_v54 = vpop.permute.xlu2 %732  ;;  %v715_v55 = vpop.permute.xlu1 %714 }
 0x140   : > { %770 = vst.msk [vmem:[%s1347_s15 + $0x2c] sm:$0xf] %vm758_vm5, %v733_v54 }
 0x141   : > { %761 = vst.msk [vmem:[%s1347_s15 + $0x8] sm:$0xf] %vm758_vm5, %v715_v55  ;;  %v729_v56 = vpop.permute.xlu0 %728 }
 0x142   : > { %768 = vst.msk [vmem:[%s1347_s15 + $0x24] sm:$0xf] %vm758_vm5, %v729_v56 }
 0x147   : > { %v834_v57 = vpop.permute.xlu2 %833  ;;  %v731_v58 = vpop.permute.xlu1 %730 }
 0x148   : > { %868 = vst.msk [vmem:[%s1352_s20 + $0x34] sm:$0xf] %vm758_vm5, %v834_v57 }
 0x149   : > { %769 = vst.msk [vmem:[%s1347_s15 + $0x28] sm:$0xf] %vm758_vm5, %v731_v58  ;;  %v812_v59 = vpop.permute.xlu0 %811 }
 0x14a   : > { %857 = vst.msk [vmem:[%s1352_s20 + $0x8] sm:$0xf] %vm758_vm5, %v812_v59 }
 0x14f   : > { %v814_v60 = vpop.permute.xlu1 %813 }
 0x150   : > { %858 = vst.msk [vmem:[%s1352_s20 + $0xc] sm:$0xf] %vm758_vm5, %v814_v60 }
 0x151   : > { %v723_v61 = vpop.permute.xlu0 %722 }
 0x152   : > { %765 = vst.msk [vmem:[%s1347_s15 + $0x18] sm:$0xf] %vm758_vm5, %v723_v61 }
 0x157   : > { %v717_v62 = vpop.permute.xlu1 %716 }
 0x158   : > { %762 = vst.msk [vmem:[%s1347_s15 + $0xc] sm:$0xf] %vm758_vm5, %v717_v62 }
 0x159   : > { %v830_v63 = vpop.permute.xlu0 %829 }
 0x15a   : > { %866 = vst.msk [vmem:[%s1352_s20 + $0x2c] sm:$0xf] %vm758_vm5, %v830_v63 }
 0x15f   : > { %v725_v0 = vpop.permute.xlu1 %724 }
 0x160   : > { %766 = vst.msk [vmem:[%s1347_s15 + $0x1c] sm:$0xf] %vm758_vm5, %v725_v0 }
 0x161   : > { %v741_v1 = vpop.permute.xlu0 %740 }
 0x162   : > { %774 = vst.msk [vmem:[%s1347_s15 + $0x3c] sm:$0xf] %vm758_vm5, %v741_v1 }
 0x166   : > { %874 = sbr.rel (%p1146_p8) target bundleno = 503 (0x1f7), region = 56 }
 0x167   : > { %v838_v4 = vpop.permute.xlu1 %837 }
 0x168   : > { %870 = vst.msk [vmem:[%s1352_s20 + $0x3c] sm:$0xf] %vm758_vm5, %v838_v4 }
 0x169   : > { %v836_v5 = vpop.permute.xlu0 %835 }
 0x16a   : > { %869 = vst.msk [vmem:[%s1352_s20 + $0x38] sm:$0xf] %vm758_vm5, %v836_v5 }
 0x16b   : > { %v878_v6 = vld [vmem:[%s1625_s4] sm:$0x3]  ;;  %vm903_vm6 = vcmask 253952  }
 0x16c   : > { %v875_v7 = vld [vmem:[#allocation2] sm:$0x1]  ;;  %v883_v8 = vsel %vm552_vm1, %v878_v6, 0 }
 0x16d   : > { %v876_v9 = vmul.f32 0.00390625, %v875_v7  ;;  %892 = vmatpush.bf16.msra.mxu0 %v883_v8  ;;  %v898_v11 = vld [vmem:[%s1626_s5] sm:$0x1] }
 0x16e   : > { %v900_v13 = vld [vmem:[%s1627_s6] sm:$0x1] }
 0x16f   : > { %v877_v10 = vpack.c.bf16 %v876_v9, %v876_v9 }
 0x171   : > { %1147 = vmatmul.msk.bf16.vlgmr.msra.gmra.mxu0 %vm478_vm2, %v877_v10 }
 0x1ee   : > { %v894_v12 = vpop.f32.mrf.mxu0 }
 0x1ef   : > { %v899_v14 = vmul.f32 %v898_v11, %v894_v12 }
 0x1f1   : > { %v901_v15 = vadd.f32 %v900_v13, %v899_v14 }
 0x1f3   : > { %v902_v16 = vmax.f32 %v901_v15, 0.0 }
 0x1f5   : > { %904 = vst.msk [vmem:[%s453_s24] sm:$0x1] %vm903_vm6, %v902_v16 }
 0x1f6   : > { %v896_v17 = vpop.f32.mrf.mxu0 }
 0x1f7 PF: > { %s1640_s22 = sld [smem:[#allocation5_spill]] }
 0x1f8   : > { %s1641_s13 = sld [smem:[#allocation3_spill]] }
 0x1f9   : > { %s1642_s14 = sld [smem:[#allocation4_spill]] }
 0x1fa   : > { %s1643_s15 = sld [smem:[#allocation6_spill]] }
 0x1fb   : > { %s1644_s16 = sld [smem:[#allocation7_spill]] }
 0x1fd   : > { %s21_s17 = sadd.s32 1, %s1640_s22  }
 0x1fe   : > { %p18_p9 = scmp.ge.s32.totalorder %s21_s17, 6  }
 0x200   :  { %20 = sbr.rel (!%p18_p9) target bundleno = 3 (0x3), region = 122 }

// kernel: asp_oc_module_v5_forward.5
= control target key start
LH: loop header
LB: loop body
LE: loop exit
PB: predicated region body
PF: predicated region fallthrough
CT: control target
= control target key end

     0   :  { %s1906_s0 = inlined_call_operand.vmem [shape: bf16[2,256,16], index: 0, kind: input, shape index: {}]   ;;  %s1907_s1 = inlined_call_operand.vmem [shape: bf16[2,256,32], index: 1, kind: input, shape index: {}]   ;;  %s1908_s2 = inlined_call_operand.vmem [shape: f32[2,1,32], index: 2, kind: input, shape index: {}]   ;;  %s1909_s3 = inlined_call_operand.vmem [shape: bf16[16,32], index: 3, kind: input, shape index: {}]   ;;  %s1910_s4 = inlined_call_operand.vmem [shape: f32[1,32], index: 4, kind: input, shape index: {}]   ;;  %s1911_s5 = inlined_call_operand.vmem [shape: f32[1,32], index: 5, kind: input, shape index: {}]   ;;  %s1912_s6 = inlined_call_operand.vmem [shape: bf16[32,32], index: 6, kind: input, shape index: {}]   ;;  %s1913_s7 = inlined_call_operand.vmem [shape: bf16[32,32], index: 7, kind: input, shape index: {}]   ;;  %s1914_s8 = inlined_call_operand.vmem [shape: bf16[32,32], index: 8, kind: input, shape index: {}]   ;;  %s1915_s9 = inlined_call_operand.vmem [shape: f32[1,32], index: 9, kind: input, shape index: {}]   ;;  %s1916_s10 = inlined_call_operand.vmem [shape: f32[1,32], index: 10, kind: input, shape index: {}]   ;;  %s1917_s11 = inlined_call_operand.hbm [shape: f32[2,256,32], index: 11, kind: output, shape index: {}]  }
   0x1   :  { %1922 = sst [smem:[#allocation9_spill]] %s1906_s0 }
   0x2   :  { %1923 = sst [smem:[#allocation10_spill]] %s1909_s3 }
   0x3   :  { %16 = vsyncpa [#allocation3], 0 }
   0x4   :  { %18 = vsyncpa [#allocation3 + $0x1], 0  ;;  %s1568_s17 = smov 0   ;;  %s1570_s18 = smov 0  }
   0x5   :  { %s1572_s19 = smov 0   ;;  %s1574_s20 = smov 0  }
   0x6   :  { %s1576_s21 = smov 0   ;;  %s1578_s22 = smov 0  }
   0x7   :  { %s1580_s23 = smov 0   ;;  %s1582_s24 = smov 0  }
   0x8 LB: > { %1924 = sst [smem:[#allocation5_spill]] %s1496_s22  ;;  %s1170_s25 = sadd.s32 4294967295, %s1504_s24   ;;  %s1504_s24 = sphi %s1582_s24, %s24_s24   ;;  %s1500_s23 = sphi %s1580_s23, %s1935_s23   ;;  %s1496_s22 = sphi %s1578_s22, %s1934_s22   ;;  %s1492_s21 = sphi %s1576_s21, %s1933_s21   ;;  %s1488_s20 = sphi %s1574_s20, %s1932_s20   ;;  %s1484_s19 = sphi %s1572_s19, %s1938_s19   ;;  %s1480_s18 = sphi %s1570_s18, %s1937_s18   ;;  %s1476_s17 = sphi %s1568_s17, %s1936_s17  }
   0x9   : > { %1925 = sst [smem:[#allocation6_spill]] %s1500_s23  ;;  %s1171_s26 = sadd.s32 4294967294, %s1504_s24  }
   0xa   : > { %s33_s27 = sadd.s32 1, %s1496_s22  ;;  %s36_s28 = sadd.s32 1, %s1500_s23 }
   0xb   : > { %p34_p0 = scmp.ge.s32.totalorder %s33_s27, 2  ;;  %p305_p1 = scmp.ne.s32.totalorder %s1484_s19, %s1480_s18 }
   0xc   : > { %p306_p2 = scmp.eq.s32.totalorder %s1170_s25, 3  ;;  %p311_p5 = scmp.ne.s32.totalorder %s1480_s18, %s1476_s17 }
   0xd   : > { %s1940_s27 = smov (%p34_p0, %s33_s27), 0  ;;  %s1942_s28 = smov (!%p34_p0, %s36_s28), %s1500_s23 }
   0xe   : > { %1926 = sst [smem:[#allocation7_spill]] %s1940_s27  ;;  %s291_s29 = ssub.s32 %s1496_s22, %s1940_s27 }
   0xf   : > { %p1619_p3 = por %p306_p2, %p305_p1  ;;  %p38_p4 = scmp.ge.s32.totalorder %s1942_s28, 2 }
  0x10   : > { %p312_p6 = scmp.eq.s32.totalorder %s1171_s26, 3  ;;  %p1174_p7 = scmp.ge.s32.totalorder %s1504_s24, 1 }
  0x11   : > { %s1944_s28 = smov (%p38_p4, %s1942_s28), 0  ;;  %p386_p9 = scmp.lt.s32.totalorder %s1504_s24, 5 }
  0x12   : > { %1928 = sst [smem:[#allocation8_spill]] %s1944_s28  ;;  %p1628_p8 = por %p312_p6, %p311_p5 }
  0x13   : > { %s290_s13 = ssub.s32 %s1500_s23, %s1944_s28  ;;  %s295_s14 = sadd.s32 1, %s1484_s19 }
  0x14   : > { %s292_s15 = sor.u32 %s291_s29, %s290_s13  ;;  %p387_p10 = pnand %p1174_p7, %p386_p9 }
  0x15   : > { %p293_p11 = scmp.eq.s32.totalorder %s292_s15, 0  ;;  %s1930_s3 = sld [smem:[#allocation10_spill]] (!%p387_p10) }
  0x16   : > { %390 = sbr.rel (%p387_p10) target bundleno = 440 (0x1b8), region = 64  ;;  %s1643_s26 = sshll.u32 (!%p387_p10), %s1488_s20, 4 }
  0x17   : > { %s1637_s16 = scalar_select %p293_p11, %s1484_s19, %s295_s14  }
  0x18   : > { %p443_p12 = scmp.lt.s32.totalorder (!%p387_p10), %s1492_s21, 1  ;;  %p445_p13 = scmp.lt.s32.totalorder (!%p387_p10), %s1643_s26, 31 }
  0x19   : > { %s1931_s0 = sld [smem:[#allocation9_spill]] (!%p387_p10)  ;;  %s439_s25 = sand.u32 (!%p387_p10), 1, %s1480_s18  }
  0x1a   : > { %s1044_s22 = scalar_lea.sflag (!%p387_p10), [#allocation3], %s439_s25 }
  0x1b   : > { %v1321_v0 = vld [vmem:[%s1930_s3] sm:$0xff]  ;;  %s444_s29 = scalar_select %p443_p12, %s1492_s21, 1  ;;  %vm548_vm0 = vcmask 130048   ;;  %v1323_v7 = vld [vmem:[%s1912_s6 + $0x8] sm:$0xff]  ;;  %vm695_vm1 = vcmask 261120  }
  0x1c   : > { %580 = vmatpush.bf16.msra.mxu0 %v1321_v0  ;;  %1328 = vmatpush.bf16.msra.mxu1 %v1321_v0  ;;  %s446_s13 = scalar_select %p445_p13, %s1643_s26, 31  ;;  %v1325_v8 = vld [vmem:[%s1913_s7 + $0x8] sm:$0xff]  ;;  %v1322_v9 = vld [vmem:[%s1912_s6] sm:$0xff] }
  0x1d   : > { %s1177_s14 = sshll.u32 %s444_s29, 5  ;;  %s464_s23 = scalar_lea.vmem %s1908_s2, %s444_s29  ;;  %1329 = vmatpush.bf16.msra.mxu2 %v1325_v8  ;;  %v1324_v11 = vld [vmem:[%s1913_s7] sm:$0xff]  ;;  %v1327_v17 = vld [vmem:[%s1914_s8 + $0x8] sm:$0xff] }
  0x1e   : > { %s448_s15 = sadd.s32 %s1177_s14, %s446_s13  ;;  %v499_v10 = vld [vmem:[%s464_s23] sm:$0x1]  ;;  %1331 = vmatpush.bf16.msra.mxu3 %v1327_v17  ;;  %s1175_s3 = sshll.u32 %s439_s25, 7 }
  0x1f   : > { %s1178_s28 = sshll.u32 %s448_s15, 2  ;;  %v678_v12 = vpack.c.bf16 %v499_v10, %v499_v10  ;;  %v1326_v19 = vld [vmem:[%s1914_s8] sm:$0xff]  ;;  %s1301_s23 = sshll.u32 %s1492_s21, 5 }
  0x20   : > { %s1652_s27 = scalar_lea.vmem %s1931_s0, %s1178_s28  ;;  %705 = vmatpush.bf16.msrb.mxu1 %v1323_v7  ;;  %s1684_s13 = scalar_lea.vmem %s1907_s1, %s1178_s28  ;;  %v1708_v22 = vld [vmem:[%s1910_s4] ss:$0 sm:$0xff] }
  0x21   : > { %v1305_v1 = vld [vmem:[%s1652_s27] sm:$0xff]  ;;  %v1306_v2 = vld [vmem:[%s1652_s27 + $0x8] sm:$0xff]  ;;  %v1307_v3 = vld [vmem:[%s1652_s27 + $0x10] sm:$0xff]  ;;  %1330 = vmatpush.bf16.msra.mxu2 %v1324_v11  ;;  %s1782_s28 = scalar_lea.vmem [#allocation2], %s1175_s3 }
  0x22   : > { %1218 = vmatmul.msk.bf16.vlgmr.msra.gmra.mxu0 %vm548_vm0, %v1305_v1  ;;  %v1308_v4 = vld [vmem:[%s1652_s27 + $0x18] sm:$0xff]  ;;  %v1309_v6 = vld [vmem:[%s1652_s27 + $0x20] sm:$0xff]  ;;  %v1314_v13 = vld [vmem:[%s1684_s13 + $0x8] sm:$0xff]  ;;  %1332 = vmatpush.bf16.msra.mxu3 %v1326_v19  ;;  %s1058_s20 = sshll.u32 %s1782_s28, 4  ;;  %s1059_s20 = int_to_ptr.vmem [resolvable:$true] %s1058_s20 }
  0x23   : > { %v1312_v5 = vld [vmem:[%s1652_s27 + $0x38] sm:$0xff]  ;;  %v1310_v14 = vld [vmem:[%s1652_s27 + $0x28] sm:$0xff]  ;;  %v1311_v15 = vld [vmem:[%s1652_s27 + $0x30] sm:$0xff]  ;;  %s1055_s27 = sadd.s32 %s1301_s23, %s1643_s26 }
  0x24   : > { %1225 = vmatmul.msk.bf16.vlgmr.msra.gmra.mxu1 %vm548_vm0, %v1312_v5  ;;  %1276 = vmatmul.msk.bf16.vlgmr.msra.gmra.mxu2 %vm695_vm1, %v1314_v13  ;;  %v1313_v16 = vld [vmem:[%s1684_s13] sm:$0xff]  ;;  %v1315_v18 = vld [vmem:[%s1684_s13 + $0x10] sm:$0xff]  ;;  %v1316_v20 = vld [vmem:[%s1684_s13 + $0x18] sm:$0xff]  ;;  %s1302_s14 = sshll.u32 %s1055_s27, 3  ;;  %s1430_s27 = scalar_lea.hbm %s1917_s11, 512 }
  0x25   : > { %706 = vmatpush.bf16.msrb.mxu1 %v1322_v9  ;;  %v1714_v24 = vld [vmem:[%s1911_s5] ss:$0 sm:$0xff]  ;;  %v1318_v38 = vld [vmem:[%s1684_s13 + $0x28] sm:$0xff]  ;;  %v1319_v48 = vld [vmem:[%s1684_s13 + $0x30] sm:$0xff]  ;;  %s1057_s21 = scalar_lea.hbm %s1917_s11, %s1302_s14 }
  0x26   : > { %v1317_v28 = vld [vmem:[%s1684_s13 + $0x20] sm:$0xff]  ;;  %v1320_v58 = vld [vmem:[%s1684_s13 + $0x38] sm:$0xff]  ;;  %s1060_s26 = sshll.u32 %s1057_s21, 4  ;;  %s1061_s26 = int_to_ptr.hbm [resolvable:$true] %s1060_s26 }
  0x27   : > { %s1424_s13 = sshra.s32 %s1061_s26, 4  ;;  %s1425_s13 = int_to_ptr.hbm [resolvable:$true] %s1424_s13 }
  0x28   : > { %s1426_s0 = scalar_lea.hbm %s1425_s13, 128  ;;  %p1431_p4 = scmp.lt.s32.totalorder %s1425_s13, %s1917_s11 }
  0x29   : > { %798 = vmatpush.bf16.msra.mxu1 %v1325_v8  ;;  %p1427_p0 = scmp.ne.s32.totalorder %s1425_s13, %s1426_s0  ;;  %p1432_p5 = scmp.lt.s32.totalorder %s1430_s27, %s1426_s0 }
  0x2b   : > { %p1428_p1 = pnand %p1427_p0, %p1619_p3  ;;  %p1433_p6 = por %p1432_p5, %p1431_p4 }
  0x2d   : > { %799 = vmatpush.bf16.msra.mxu1 %v1324_v11  ;;  %p1429_p2 = pneg %p1428_p1 }
  0x2f   : > { %p1434_p7 = pnand %p1433_p6, %p1429_p2 }
  0x32   : > { %1219 = vmatmul.msk.bf16.gmra.mxu0 %vm548_vm0, %v1306_v2 }
  0x34   : > { %1234 = vmatmul.msk.bf16.vlgmr.msrb.gmra.mxu1 %vm695_vm1, %v678_v12  ;;  %1277 = vmatmul.msk.bf16.gmra.mxu2 %vm695_vm1, %v1315_v18 }
  0x35   : > { %912 = vmatpush.bf16.msrb.mxu1 %v1327_v17 }
  0x39   : > { %913 = vmatpush.bf16.msrb.mxu1 %v1326_v19 }
  0x42   : > { %1220 = vmatmul.msk.bf16.gmra.mxu0 %vm548_vm0, %v1307_v3 }
  0x44   : > { %1275 = vmatmul.msk.bf16.vlgmr.msra.gmra.mxu1 %vm695_vm1, %v1313_v16  ;;  %1278 = vmatmul.msk.bf16.gmra.mxu2 %vm695_vm1, %v1316_v20 }
  0x52   : > { %1221 = vmatmul.msk.bf16.gmra.mxu0 %vm548_vm0, %v1308_v4 }
  0x54   : > { %1279 = vmatmul.msk.bf16.gmra.mxu2 %vm695_vm1, %v1317_v28 }
  0x62   : > { %1222 = vmatmul.msk.bf16.gmra.mxu0 %vm548_vm0, %v1309_v6 }
  0x64   : > { %1280 = vmatmul.msk.bf16.gmra.mxu2 %vm695_vm1, %v1318_v38 }
  0x72   : > { %1223 = vmatmul.msk.bf16.gmra.mxu0 %vm548_vm0, %v1310_v14 }
  0x74   : > { %1281 = vmatmul.msk.bf16.gmra.mxu2 %vm695_vm1, %v1319_v48 }
  0x82   : > { %1224 = vmatmul.msk.bf16.gmra.mxu0 %vm548_vm0, %v1311_v15 }
  0x84   : > { %1282 = vmatmul.msk.bf16.gmra.mxu2 %vm695_vm1, %v1320_v58 }
  0x9f   : > { %v582_v21 = vpop.f32.mrf.mxu0 }
  0xa0   : > { %v626_v23 = vmul.f32 %v1708_v22, %v582_v21 }
  0xa1   : > { %v617_v62 = vpop.f32.mrf.mxu1 }
  0xa2   : > { %v646_v26 = vadd.f32 %v1714_v24, %v626_v23 }
  0xa4   : > { %v662_v30 = vmax.f32 %v646_v26, 0.0 }
  0xa7   : > { %v584_v25 = vpop.f32.mrf.mxu0 }
  0xa8   : > { %v627_v27 = vmul.f32 %v1708_v22, %v584_v25 }
  0xa9   : > { %v619_v2 = vpop.f32.mrf.mxu1 }
  0xaa   : > { %v647_v29 = vadd.f32 %v1714_v24, %v627_v27 }
  0xac   : > { %v663_v31 = vmax.f32 %v647_v29, 0.0 }
  0xae   : > { %v858_v32 = vpack.c.bf16 %v663_v31, %v662_v30 }
  0xaf   : > { %v587_v33 = vpop.f32.mrf.mxu0 }
  0xb0   : > { %1291 = vmatmul.msk.bf16.vlgmr.msrb.gmra.mxu1 %vm695_vm1, %v858_v32  ;;  %v628_v34 = vmul.f32 %v1708_v22, %v587_v33  ;;  %v640_v32 = vmul.f32 %v1708_v22, %v617_v62  ;;  %v641_v33 = vmul.f32 %v1708_v22, %v619_v2 }
  0xb1   : > { %v708_v9 = vpop.f32.mrf.mxu1 }
  0xb2   : > { %v648_v36 = vadd.f32 %v1714_v24, %v628_v34  ;;  %v660_v34 = vadd.f32 %v1714_v24, %v640_v32 }
  0xb4   : > { %v664_v40 = vmax.f32 %v648_v36, 0.0 }
  0xb7   : > { %v589_v35 = vpop.f32.mrf.mxu0 }
  0xb8   : > { %v629_v37 = vmul.f32 %v1708_v22, %v589_v35  ;;  %v661_v35 = vadd.f32 %v1714_v24, %v641_v33 }
  0xb9   : > { %v710_v13 = vpop.f32.mrf.mxu1 }
  0xba   : > { %v649_v39 = vadd.f32 %v1714_v24, %v629_v37  ;;  %v676_v37 = vmax.f32 %v660_v34, 0.0  ;;  %v677_v38 = vmax.f32 %v661_v35, 0.0 }
  0xbc   : > { %v665_v41 = vmax.f32 %v649_v39, 0.0  ;;  %v865_v39 = vpack.c.bf16 %v677_v38, %v676_v37 }
  0xbe   : > { %v859_v42 = vpack.c.bf16 %v665_v41, %v664_v40  ;;  %v806_v41 = vpop.f32.mrf.mxu2 }
  0xbf   : > { %v592_v43 = vpop.f32.mrf.mxu0 }
  0xc0   : > { %1292 = vmatmul.msk.bf16.vlgmr.msra.gmra.mxu3 %vm695_vm1, %v859_v42  ;;  %v630_v44 = vmul.f32 %v1708_v22, %v592_v43  ;;  %v1763_v42 = vperm.slane %v708_v9, 0 }
  0xc1   : > { %v801_v36 = vpop.f32.mrf.mxu1 }
  0xc2   : > { %v650_v46 = vadd.f32 %v1714_v24, %v630_v44  ;;  %v842_v43 = vadd.f32 %v1763_v42, %v801_v36 }
  0xc4   : > { %v666_v50 = vmax.f32 %v650_v46, 0.0 }
  0xc6   : > { %v808_v46 = vpop.f32.mrf.mxu2 }
  0xc7   : > { %v594_v45 = vpop.f32.mrf.mxu0 }
  0xc8   : > { %v631_v47 = vmul.f32 %v1708_v22, %v594_v45  ;;  %v1775_v45 = vld [vmem:[%s1916_s10] ss:$0 sm:$0xff] }
  0xc9   : > { %v803_v40 = vpop.f32.mrf.mxu1 }
  0xca   : > { %v651_v49 = vadd.f32 %v1714_v24, %v631_v47  ;;  %v843_v48 = vadd.f32 %v1763_v42, %v803_v40 }
  0xcc   : > { %v667_v51 = vmax.f32 %v651_v49, 0.0 }
  0xce   : > { %v860_v52 = vpack.c.bf16 %v667_v51, %v666_v50 }
  0xcf   : > { %v597_v53 = vpop.f32.mrf.mxu0 }
  0xd0   : > { %1293 = vmatmul.msk.bf16.gmra.mxu3 %vm695_vm1, %v860_v52  ;;  %v632_v54 = vmul.f32 %v1708_v22, %v597_v53 }
  0xd2   : > { %v652_v56 = vadd.f32 %v1714_v24, %v632_v54  ;;  %v811_v54 = vpop.f32.mrf.mxu2 }
  0xd4   : > { %v668_v60 = vmax.f32 %v652_v56, 0.0 }
  0xd7   : > { %v599_v55 = vpop.f32.mrf.mxu0 }
  0xd8   : > { %v633_v57 = vmul.f32 %v1708_v22, %v599_v55 }
  0xda   : > { %v653_v59 = vadd.f32 %v1714_v24, %v633_v57  ;;  %v844_v57 = vadd.f32 %v1763_v42, %v806_v41  ;;  %v813_v58 = vpop.f32.mrf.mxu2 }
  0xdb   : > { %v847_v13 = vadd.f32 %v1763_v42, %v813_v58 }
  0xdc   : > { %v669_v61 = vmax.f32 %v653_v59, 0.0 }
  0xde   : > { %v861_v63 = vpack.c.bf16 %v669_v61, %v668_v60 }
  0xdf   : > { %v602_v0 = vpop.f32.mrf.mxu0 }
  0xe0   : > { %1294 = vmatmul.msk.bf16.gmra.mxu3 %vm695_vm1, %v861_v63  ;;  %v634_v1 = vmul.f32 %v1708_v22, %v602_v0  ;;  %v845_v63 = vadd.f32 %v1763_v42, %v808_v46 }
  0xe2   : > { %v654_v4 = vadd.f32 %v1714_v24, %v634_v1 }
  0xe4   : > { %v670_v7 = vmax.f32 %v654_v4, 0.0 }
  0xe7   : > { %v604_v3 = vpop.f32.mrf.mxu0 }
  0xe8   : > { %v635_v5 = vmul.f32 %v1708_v22, %v604_v3  ;;  %v816_v3 = vpop.f32.mrf.mxu2 }
  0xea   : > { %v655_v6 = vadd.f32 %v1714_v24, %v635_v5  ;;  %v846_v5 = vadd.f32 %v1763_v42, %v811_v54 }
  0xec   : > { %v671_v8 = vmax.f32 %v655_v6, 0.0 }
  0xee   : > { %v862_v10 = vpack.c.bf16 %v671_v8, %v670_v7 }
  0xef   : > { %v607_v11 = vpop.f32.mrf.mxu0 }
  0xf0   : > { %1295 = vmatmul.msk.bf16.gmra.mxu3 %vm695_vm1, %v862_v10  ;;  %v636_v12 = vmul.f32 %v1708_v22, %v607_v11  ;;  %v818_v11 = vpop.f32.mrf.mxu2 }
  0xf2   : > { %v656_v15 = vadd.f32 %v1714_v24, %v636_v12 }
  0xf4   : > { %v672_v18 = vmax.f32 %v656_v15, 0.0 }
  0xf7   : > { %v609_v14 = vpop.f32.mrf.mxu0 }
  0xf8   : > { %v637_v16 = vmul.f32 %v1708_v22, %v609_v14 }
  0xfa   : > { %v657_v17 = vadd.f32 %v1714_v24, %v637_v16 }
  0xfc   : > { %v673_v19 = vmax.f32 %v657_v17, 0.0 }
  0xfe   : > { %v863_v20 = vpack.c.bf16 %v673_v19, %v672_v18  ;;  %v848_v18 = vadd.f32 %v1763_v42, %v816_v3 }
  0xff   : > { %v612_v21 = vpop.f32.mrf.mxu0 }
 0x100   : > { %1296 = vmatmul.msk.bf16.gmra.mxu3 %vm695_vm1, %v863_v20  ;;  %v638_v23 = vmul.f32 %v1708_v22, %v612_v21  ;;  %v821_v20 = vpop.f32.mrf.mxu2 }
 0x101   : > { %v850_v34 = vadd.f32 %v1763_v42, %v821_v20 }
 0x102   : > { %v658_v26 = vadd.f32 %v1714_v24, %v638_v23 }
 0x104   : > { %v674_v29 = vmax.f32 %v658_v26, 0.0 }
 0x107   : > { %v614_v25 = vpop.f32.mrf.mxu0 }
 0x108   : > { %v639_v27 = vmul.f32 %v1708_v22, %v614_v25  ;;  %v1769_v22 = vld [vmem:[%s1915_s9] ss:$0 sm:$0xff] }
 0x10a   : > { %v659_v28 = vadd.f32 %v1714_v24, %v639_v27 }
 0x10c   : > { %v675_v30 = vmax.f32 %v659_v28, 0.0  ;;  %v849_v28 = vadd.f32 %v1763_v42, %v818_v11 }
 0x10e   : > { %v864_v31 = vpack.c.bf16 %v675_v30, %v674_v29  ;;  %v823_v30 = vpop.f32.mrf.mxu2 }
 0x110   : > { %1297 = vmatmul.msk.bf16.gmra.mxu3 %vm695_vm1, %v864_v31 }
 0x120   : > { %1298 = vmatmul.msk.bf16.gmra.mxu3 %vm695_vm1, %v865_v39  ;;  %v826_v39 = vpop.f32.mrf.mxu2 }
 0x12d   : > { %v915_v24 = vpop.f32.mrf.mxu1 }
 0x12e   : > { %v955_v44 = vadd.f32 %v915_v24, %v842_v43  ;;  %v851_v43 = vadd.f32 %v1763_v42, %v823_v30 }
 0x130   : > { %v975_v47 = vmul.f32 %v1769_v22, %v955_v44 }
 0x132   : > { %v995_v49 = vadd.f32 %v1775_v45, %v975_v47 }
 0x134   : > { %v1011_v50 = vmax.f32 %v995_v49, 0.0  ;;  %v852_v49 = vadd.f32 %v1763_v42, %v826_v39 }
 0x135   : > { %v917_v51 = vpop.f32.mrf.mxu1 }
 0x136   : > { %1027 = vst.msk [vmem:[%s1782_s28] sm:$0xff] %vm695_vm1, %v1011_v50  ;;  %v956_v52 = vadd.f32 %v917_v51, %v843_v48  ;;  %v828_v48 = vpop.f32.mrf.mxu2 }
 0x138   : > { %v976_v53 = vmul.f32 %v1769_v22, %v956_v52 }
 0x13a   : > { %v996_v55 = vadd.f32 %v1775_v45, %v976_v53 }
 0x13c   : > { %v1012_v56 = vmax.f32 %v996_v55, 0.0 }
 0x13e   : > { %1028 = vst.msk [vmem:[%s1782_s28 + $0x8] sm:$0xff] %vm695_vm1, %v1012_v56  ;;  %v831_v56 = vpop.f32.mrf.mxu2 }
 0x143   : > { %v920_v59 = vpop.f32.mrf.mxu3 }
 0x144   : > { %v957_v60 = vadd.f32 %v920_v59, %v844_v57  ;;  %v853_v57 = vadd.f32 %v1763_v42, %v828_v48 }
 0x146   : > { %v977_v61 = vmul.f32 %v1769_v22, %v957_v60 }
 0x148   : > { %v997_v62 = vadd.f32 %v1775_v45, %v977_v61 }
 0x14a   : > { %v1013_v0 = vmax.f32 %v997_v62, 0.0 }
 0x14b   : > { %v922_v1 = vpop.f32.mrf.mxu3 }
 0x14c   : > { %1029 = vst.msk [vmem:[%s1782_s28 + $0x10] sm:$0xff] %vm695_vm1, %v1013_v0  ;;  %v958_v2 = vadd.f32 %v922_v1, %v845_v63  ;;  %v854_v63 = vadd.f32 %v1763_v42, %v831_v56  ;;  %v833_v1 = vpop.f32.mrf.mxu2 }
 0x14e   : > { %v978_v4 = vmul.f32 %v1769_v22, %v958_v2 }
 0x150   : > { %v998_v6 = vadd.f32 %v1775_v45, %v978_v4 }
 0x152   : > { %v1014_v7 = vmax.f32 %v998_v6, 0.0  ;;  %v855_v6 = vadd.f32 %v1763_v42, %v833_v1 }
 0x153   : > { %v925_v8 = vpop.f32.mrf.mxu3 }
 0x154   : > { %1030 = vst.msk [vmem:[%s1782_s28 + $0x18] sm:$0xff] %vm695_vm1, %v1014_v7  ;;  %v959_v9 = vadd.f32 %v925_v8, %v846_v5 }
 0x156   : > { %v979_v10 = vmul.f32 %v1769_v22, %v959_v9 }
 0x158   : > { %v999_v12 = vadd.f32 %v1775_v45, %v979_v10  ;;  %v836_v10 = vpop.f32.mrf.mxu2 }
 0x15a   : > { %v1015_v14 = vmax.f32 %v999_v12, 0.0 }
 0x15b   : > { %v927_v15 = vpop.f32.mrf.mxu3 }
 0x15c   : > { %1031 = vst.msk [vmem:[%s1782_s28 + $0x20] sm:$0xff] %vm695_vm1, %v1015_v14  ;;  %v960_v16 = vadd.f32 %v927_v15, %v847_v13  ;;  %v856_v13 = vadd.f32 %v1763_v42, %v836_v10 }
 0x15e   : > { %v980_v17 = vmul.f32 %v1769_v22, %v960_v16 }
 0x160   : > { %v1000_v19 = vadd.f32 %v1775_v45, %v980_v17 }
 0x162   : > { %v1016_v21 = vmax.f32 %v1000_v19, 0.0 }
 0x163   : > { %v930_v23 = vpop.f32.mrf.mxu3 }
 0x164   : > { %1032 = vst.msk [vmem:[%s1782_s28 + $0x28] sm:$0xff] %vm695_vm1, %v1016_v21  ;;  %v961_v25 = vadd.f32 %v930_v23, %v848_v18  ;;  %v838_v18 = vpop.f32.mrf.mxu2 }
 0x165   : > { %v857_v20 = vadd.f32 %v1763_v42, %v838_v18 }
 0x166   : > { %v981_v26 = vmul.f32 %v1769_v22, %v961_v25 }
 0x168   : > { %v1001_v27 = vadd.f32 %v1775_v45, %v981_v26 }
 0x16a   : > { %v1017_v29 = vmax.f32 %v1001_v27, 0.0 }
 0x16b   : > { %v932_v31 = vpop.f32.mrf.mxu3 }
 0x16c   : > { %1033 = vst.msk [vmem:[%s1782_s28 + $0x30] sm:$0xff] %vm695_vm1, %v1017_v29  ;;  %v962_v32 = vadd.f32 %v932_v31, %v849_v28 }
 0x16e   : > { %v982_v33 = vmul.f32 %v1769_v22, %v962_v32 }
 0x170   : > { %v1002_v35 = vadd.f32 %v1775_v45, %v982_v33 }
 0x172   : > { %v1018_v36 = vmax.f32 %v1002_v35, 0.0 }
 0x173   : > { %v935_v37 = vpop.f32.mrf.mxu3 }
 0x174   : > { %1034 = vst.msk [vmem:[%s1782_s28 + $0x38] sm:$0xff] %vm695_vm1, %v1018_v36  ;;  %v963_v38 = vadd.f32 %v935_v37, %v850_v34 }
 0x176   : > { %v983_v40 = vmul.f32 %v1769_v22, %v963_v38 }
 0x178   : > { %v1003_v41 = vadd.f32 %v1775_v45, %v983_v40 }
 0x17a   : > { %v1019_v24 = vmax.f32 %v1003_v41, 0.0 }
 0x17b   : > { %v937_v44 = vpop.f32.mrf.mxu3 }
 0x17c   : > { %1035 = vst.msk [vmem:[%s1782_s28 + $0x40] sm:$0xff] %vm695_vm1, %v1019_v24  ;;  %v964_v46 = vadd.f32 %v937_v44, %v851_v43 }
 0x17e   : > { %v984_v47 = vmul.f32 %v1769_v22, %v964_v46 }
 0x180   : > { %v1004_v50 = vadd.f32 %v1775_v45, %v984_v47 }
 0x182   : > { %v1020_v51 = vmax.f32 %v1004_v50, 0.0 }
 0x183   : > { %v940_v52 = vpop.f32.mrf.mxu3 }
 0x184   : > { %1036 = vst.msk [vmem:[%s1782_s28 + $0x48] sm:$0xff] %vm695_vm1, %v1020_v51  ;;  %v965_v53 = vadd.f32 %v940_v52, %v852_v49 }
 0x186   : > { %v985_v54 = vmul.f32 %v1769_v22, %v965_v53 }
 0x188   : > { %v1005_v55 = vadd.f32 %v1775_v45, %v985_v54 }
 0x18a   : > { %v1021_v58 = vmax.f32 %v1005_v55, 0.0 }
 0x18b   : > { %v942_v59 = vpop.f32.mrf.mxu3 }
 0x18c   : > { %1037 = vst.msk [vmem:[%s1782_s28 + $0x50] sm:$0xff] %vm695_vm1, %v1021_v58  ;;  %v966_v60 = vadd.f32 %v942_v59, %v853_v57 }
 0x18e   : > { %v986_v61 = vmul.f32 %v1769_v22, %v966_v60 }
 0x190   : > { %v1006_v62 = vadd.f32 %v1775_v45, %v986_v61 }
 0x192   : > { %v1022_v0 = vmax.f32 %v1006_v62, 0.0 }
 0x193   : > { %v945_v2 = vpop.f32.mrf.mxu3 }
 0x194   : > { %1038 = vst.msk [vmem:[%s1782_s28 + $0x58] sm:$0xff] %vm695_vm1, %v1022_v0  ;;  %v967_v3 = vadd.f32 %v945_v2, %v854_v63 }
 0x196   : > { %v987_v4 = vmul.f32 %v1769_v22, %v967_v3 }
 0x198   : > { %v1007_v5 = vadd.f32 %v1775_v45, %v987_v4 }
 0x19a   : > { %v1023_v7 = vmax.f32 %v1007_v5, 0.0 }
 0x19b   : > { %v947_v8 = vpop.f32.mrf.mxu3 }
 0x19c   : > { %1039 = vst.msk [vmem:[%s1782_s28 + $0x60] sm:$0xff] %vm695_vm1, %v1023_v7  ;;  %v968_v9 = vadd.f32 %v947_v8, %v855_v6 }
 0x19e   : > { %v988_v11 = vmul.f32 %v1769_v22, %v968_v9 }
 0x1a0   : > { %v1008_v12 = vadd.f32 %v1775_v45, %v988_v11 }
 0x1a2   : > { %v1024_v14 = vmax.f32 %v1008_v12, 0.0 }
 0x1a3   : > { %v950_v15 = vpop.f32.mrf.mxu3 }
 0x1a4   : > { %1040 = vst.msk [vmem:[%s1782_s28 + $0x68] sm:$0xff] %vm695_vm1, %v1024_v14  ;;  %v969_v16 = vadd.f32 %v950_v15, %v856_v13 }
 0x1a6   : > { %v989_v17 = vmul.f32 %v1769_v22, %v969_v16 }
 0x1a8   : > { %v1009_v19 = vadd.f32 %v1775_v45, %v989_v17 }
 0x1aa   : > { %v1025_v21 = vmax.f32 %v1009_v19, 0.0 }
 0x1ab   : > { %v952_v23 = vpop.f32.mrf.mxu3 }
 0x1ac   : > { %1041 = vst.msk [vmem:[%s1782_s28 + $0x70] sm:$0xff] %vm695_vm1, %v1025_v21  ;;  %v970_v25 = vadd.f32 %v952_v23, %v857_v20 }
 0x1ae   : > { %v990_v26 = vmul.f32 %v1769_v22, %v970_v25 }
 0x1b0   : > { %v1010_v27 = vadd.f32 %v1775_v45, %v990_v26 }
 0x1b2   : > { %v1026_v28 = vmax.f32 %v1010_v27, 0.0 }
 0x1b4   : > { %1042 = vst.msk [vmem:[%s1782_s28 + $0x78] sm:$0xff] %vm695_vm1, %v1026_v28 }
 0x1b5   : > { %1437 = shalt.err (!%p1434_p7)
}
 0x1b6   : > { %s1506_s25 = smov 128   ;;  %s1507_s28 = smov 8  }
 0x1b7   : > { %1333 = dma.vmem_to_hbm [thread:$0]  (%p1619_p3), %s1059_s20, 2048, %s1061_s26, %s1044_s22, %s1506_s25, %s1506_s25, %s1507_s28  }
 0x1b8 PF: > { %p1339_p9 = scmp.ge.s32.totalorder %s1504_s24, 2  ;;  %s1075_s29 = sand.u32 1, %s1476_s17  }
 0x1b9   : > { %s1076_s21 = scalar_lea.sflag [#allocation3], %s1075_s29 }
 0x1ba   : > { %p1336_p10 = pnand %p1339_p9, %p1628_p8 }
 0x1bc   : > { %p1337_p11 = pneg %p1336_p10 }
 0x1be   : > { %1471 = dma.done.wait (%p1337_p11), %s1076_s21, 2048  }
 0x1bf   : > { %1473 = vsyncadd (%p1337_p11), %s1076_s21, 4294965248  ;;  %s24_s24 = sadd.s32 1, %s1504_s24   ;;  %s1932_s20 = sld [smem:[#allocation5_spill]] }
 0x1c0   : > { %p21_p12 = scmp.ge.s32.totalorder %s24_s24, 6   ;;  %s1933_s21 = sld [smem:[#allocation6_spill]] }
 0x1c1   : > { %s1934_s22 = sld [smem:[#allocation7_spill]]  ;;  %s1936_s17 = smov %s1480_s18 }
 0x1c2   : > { %s1935_s23 = sld [smem:[#allocation8_spill]]  ;;  %s1937_s18 = smov %s1484_s19 }
 0x1c3   : > { %s1938_s19 = smov %s1637_s16  ;;  %23 = sbr.rel (!%p21_p12) target bundleno = 8 (0x8), region = 105 }
 0x1c8   :  { %1082 = vsyncpa [#allocation3], 1 }
 0x1c9   :  { %1084 = vsyncpa [#allocation3 + $0x1], 1 }

// kernel: asp_oc_module_v5_forward.4
= control target key start
LH: loop header
LB: loop body
LE: loop exit
PB: predicated region body
PF: predicated region fallthrough
CT: control target
= control target key end

     0   :  { %s1907_s12 = smov 0   ;;  %s1909_s13 = smov 0   ;;  %s2466_s0 = inlined_call_operand.vmem [shape: bf16[2,256,16], index: 0, kind: input, shape index: {}, may-alias: {0,1}]   ;;  %s2467_s1 = inlined_call_operand.vmem [shape: bf16[2,256,16], index: 1, kind: input, shape index: {}, may-alias: {0,1}]   ;;  %s2468_s2 = inlined_call_operand.vmem [shape: bf16[2,256,16], index: 2, kind: input, shape index: {}]   ;;  %s2469_s3 = inlined_call_operand.vmem [shape: bf16[2,256,16], index: 3, kind: output, shape index: {}]  }
   0x1   :  { %s1911_s14 = smov 0   ;;  %s1913_s15 = smov 0  }
   0x2   :  { %s1915_s16 = smov 0   ;;  %s1917_s17 = smov 0  }
   0x3   :  { %s1919_s18 = smov 0  }
   0x4 LB: > { %s25_s19 = sadd.s32 1, %s1869_s15  ;;  %s28_s20 = sadd.s32 1, %s1873_s16  ;;  %s1881_s18 = sphi %s1919_s18, %s13_s18   ;;  %s1877_s17 = sphi %s1917_s17, %s2475_s17   ;;  %s1873_s16 = sphi %s1915_s16, %s2474_s16   ;;  %s1869_s15 = sphi %s1913_s15, %s2473_s15   ;;  %s1865_s14 = sphi %s1911_s14, %s2472_s14   ;;  %s1861_s13 = sphi %s1909_s13, %s2471_s13   ;;  %s1857_s12 = sphi %s1907_s12, %s2470_s12  }
   0x5   : > { %p26_p0 = scmp.ge.s32.totalorder %s25_s19, 2  ;;  %p1504_p1 = scmp.ge.s32.totalorder %s1881_s18, 1 }
   0x6   : > { %p199_p2 = scmp.lt.s32.totalorder %s1881_s18, 9  ;;  %s32_s21 = sadd.s32 1, %s1877_s17 }
   0x7   : > { %s2477_s19 = smov (%p26_p0, %s25_s19), 0  ;;  %s2479_s20 = smov (!%p26_p0, %s28_s20), %s1873_s16 }
   0x8   : > { %p200_p3 = pnand %p1504_p1, %p199_p2  ;;  %p30_p4 = scmp.ge.s32.totalorder %s2479_s20, 2 }
   0x9   : > { %s1505_s22 = sshll.u32 (!%p200_p3), %s1861_s13, 4  ;;  %p250_p6 = scmp.lt.s32.totalorder (!%p200_p3), %s1865_s14, 1 }
   0xa   : > { %s2481_s20 = smov (%p30_p4, %s2479_s20), 0  ;;  %s2483_s21 = smov (!%p30_p4, %s32_s21), %s1877_s17 }
   0xb   : > { %p34_p5 = scmp.ge.s32.totalorder %s2483_s21, 2  ;;  %203 = sbr.rel (%p200_p3) target bundleno = 917 (0x395), region = 32 }
   0xc   : > { %p252_p7 = scmp.lt.s32.totalorder (!%p200_p3), %s1505_s22, 31  ;;  %s1508_s23 = sshll.u32 (!%p200_p3), %s1857_s12, 4 }
   0xd   : > { %s2485_s21 = smov (%p34_p5, %s2483_s21), 0  ;;  %p262_p8 = scmp.lt.s32.totalorder (!%p200_p3), %s1508_s23, 31 }
   0xe   : > { %p1517_p9 = scmp.ne.s32.totalorder (!%p200_p3), %s1857_s12, 0 }
  0x10   : > { %s2487_s14 = smov (!%p250_p6, %s1865_s14), 1  ;;  %s2489_s22 = smov (!%p252_p7, %s1505_s22), 31 }
  0x11   : > { %s1506_s24 = sshll.u32 %s2487_s14, 5  ;;  %s2491_s23 = smov (!%p262_p8, %s1508_s23), 31 }
  0x12   : > { %s255_s25 = sadd.s32 %s1506_s24, %s2489_s22  ;;  %s265_s6 = sadd.s32 %s1506_s24, %s2491_s23 }
  0x13   : > { %s1507_s26 = sshll.u32 %s255_s25, 2  ;;  %s1510_s7 = sshll.u32 %s265_s6, 2 }
  0x14   : > { %s1955_s29 = scalar_lea.vmem %s2466_s0, %s1507_s26  ;;  %s1960_s5 = scalar_lea.vmem %s2469_s3, %s1507_s26 }
  0x15   : > { %s1965_s10 = scalar_lea.vmem %s2467_s1, %s1510_s7  ;;  %s1970_s14 = scalar_lea.vmem %s2468_s2, %s1510_s7 }
  0x16   : > { %292 = sbr.rel (%p1517_p9) target bundleno = 76 (0x4c), region = 36 }
  0x1b   : > { %vm293_vm0 = vcmask 7168   ;;  %v1883_v0 = vmov -inf   ;;  %v1884_v1 = vmov 0.0   ;;  %vm326_vm1 = vcmask 130048  }
  0x1c   : > { %294 = vst.msk [vmem:[#allocation2] sm:$0xff] %vm293_vm0, %v1883_v0 }
  0x1d   : > { %295 = vst.msk [vmem:[#allocation2 + $0x8] sm:$0xff] %vm293_vm0, %v1883_v0 }
  0x1e   : > { %296 = vst.msk [vmem:[#allocation2 + $0x10] sm:$0xff] %vm293_vm0, %v1883_v0 }
  0x1f   : > { %297 = vst.msk [vmem:[#allocation2 + $0x18] sm:$0xff] %vm293_vm0, %v1883_v0 }
  0x20   : > { %298 = vst.msk [vmem:[#allocation2 + $0x20] sm:$0xff] %vm293_vm0, %v1883_v0 }
  0x21   : > { %299 = vst.msk [vmem:[#allocation2 + $0x28] sm:$0xff] %vm293_vm0, %v1883_v0 }
  0x22   : > { %300 = vst.msk [vmem:[#allocation2 + $0x30] sm:$0xff] %vm293_vm0, %v1883_v0 }
  0x23   : > { %301 = vst.msk [vmem:[#allocation2 + $0x38] sm:$0xff] %vm293_vm0, %v1883_v0 }
  0x24   : > { %302 = vst.msk [vmem:[#allocation2 + $0x40] sm:$0xff] %vm293_vm0, %v1883_v0 }
  0x25   : > { %303 = vst.msk [vmem:[#allocation2 + $0x48] sm:$0xff] %vm293_vm0, %v1883_v0 }
  0x26   : > { %304 = vst.msk [vmem:[#allocation2 + $0x50] sm:$0xff] %vm293_vm0, %v1883_v0 }
  0x27   : > { %305 = vst.msk [vmem:[#allocation2 + $0x58] sm:$0xff] %vm293_vm0, %v1883_v0 }
  0x28   : > { %306 = vst.msk [vmem:[#allocation2 + $0x60] sm:$0xff] %vm293_vm0, %v1883_v0 }
  0x29   : > { %307 = vst.msk [vmem:[#allocation2 + $0x68] sm:$0xff] %vm293_vm0, %v1883_v0 }
  0x2a   : > { %308 = vst.msk [vmem:[#allocation2 + $0x70] sm:$0xff] %vm293_vm0, %v1883_v0 }
  0x2b   : > { %309 = vst.msk [vmem:[#allocation2 + $0x78] sm:$0xff] %vm293_vm0, %v1883_v0 }
  0x2c   : > { %310 = vst.msk [vmem:[#allocation3] sm:$0xff] %vm293_vm0, %v1884_v1 }
  0x2d   : > { %311 = vst.msk [vmem:[#allocation3 + $0x8] sm:$0xff] %vm293_vm0, %v1884_v1 }
  0x2e   : > { %312 = vst.msk [vmem:[#allocation3 + $0x10] sm:$0xff] %vm293_vm0, %v1884_v1 }
  0x2f   : > { %313 = vst.msk [vmem:[#allocation3 + $0x18] sm:$0xff] %vm293_vm0, %v1884_v1 }
  0x30   : > { %314 = vst.msk [vmem:[#allocation3 + $0x20] sm:$0xff] %vm293_vm0, %v1884_v1 }
  0x31   : > { %315 = vst.msk [vmem:[#allocation3 + $0x28] sm:$0xff] %vm293_vm0, %v1884_v1 }
  0x32   : > { %316 = vst.msk [vmem:[#allocation3 + $0x30] sm:$0xff] %vm293_vm0, %v1884_v1 }
  0x33   : > { %317 = vst.msk [vmem:[#allocation3 + $0x38] sm:$0xff] %vm293_vm0, %v1884_v1 }
  0x34   : > { %318 = vst.msk [vmem:[#allocation3 + $0x40] sm:$0xff] %vm293_vm0, %v1884_v1 }
  0x35   : > { %319 = vst.msk [vmem:[#allocation3 + $0x48] sm:$0xff] %vm293_vm0, %v1884_v1 }
  0x36   : > { %320 = vst.msk [vmem:[#allocation3 + $0x50] sm:$0xff] %vm293_vm0, %v1884_v1 }
  0x37   : > { %321 = vst.msk [vmem:[#allocation3 + $0x58] sm:$0xff] %vm293_vm0, %v1884_v1 }
  0x38   : > { %322 = vst.msk [vmem:[#allocation3 + $0x60] sm:$0xff] %vm293_vm0, %v1884_v1 }
  0x39   : > { %323 = vst.msk [vmem:[#allocation3 + $0x68] sm:$0xff] %vm293_vm0, %v1884_v1 }
  0x3a   : > { %324 = vst.msk [vmem:[#allocation3 + $0x70] sm:$0xff] %vm293_vm0, %v1884_v1 }
  0x3b   : > { %325 = vst.msk [vmem:[#allocation3 + $0x78] sm:$0xff] %vm293_vm0, %v1884_v1 }
  0x3c   : > { %327 = vst.msk [vmem:[#allocation4] sm:$0xff] %vm326_vm1, %v1884_v1 }
  0x3d   : > { %328 = vst.msk [vmem:[#allocation4 + $0x8] sm:$0xff] %vm326_vm1, %v1884_v1 }
  0x3e   : > { %329 = vst.msk [vmem:[#allocation4 + $0x10] sm:$0xff] %vm326_vm1, %v1884_v1 }
  0x3f   : > { %330 = vst.msk [vmem:[#allocation4 + $0x18] sm:$0xff] %vm326_vm1, %v1884_v1 }
  0x40   : > { %331 = vst.msk [vmem:[#allocation4 + $0x20] sm:$0xff] %vm326_vm1, %v1884_v1 }
  0x41   : > { %332 = vst.msk [vmem:[#allocation4 + $0x28] sm:$0xff] %vm326_vm1, %v1884_v1 }
  0x42   : > { %333 = vst.msk [vmem:[#allocation4 + $0x30] sm:$0xff] %vm326_vm1, %v1884_v1 }
  0x43   : > { %334 = vst.msk [vmem:[#allocation4 + $0x38] sm:$0xff] %vm326_vm1, %v1884_v1 }
  0x44   : > { %335 = vst.msk [vmem:[#allocation4 + $0x40] sm:$0xff] %vm326_vm1, %v1884_v1 }
  0x45   : > { %336 = vst.msk [vmem:[#allocation4 + $0x48] sm:$0xff] %vm326_vm1, %v1884_v1 }
  0x46   : > { %337 = vst.msk [vmem:[#allocation4 + $0x50] sm:$0xff] %vm326_vm1, %v1884_v1 }
  0x47   : > { %338 = vst.msk [vmem:[#allocation4 + $0x58] sm:$0xff] %vm326_vm1, %v1884_v1 }
  0x48   : > { %339 = vst.msk [vmem:[#allocation4 + $0x60] sm:$0xff] %vm326_vm1, %v1884_v1 }
  0x49   : > { %340 = vst.msk [vmem:[#allocation4 + $0x68] sm:$0xff] %vm326_vm1, %v1884_v1 }
  0x4a   : > { %341 = vst.msk [vmem:[#allocation4 + $0x70] sm:$0xff] %vm326_vm1, %v1884_v1 }
  0x4b   : > { %342 = vst.msk [vmem:[#allocation4 + $0x78] sm:$0xff] %vm326_vm1, %v1884_v1 }
  0x4c PF: > { %v1640_v2 = vld [vmem:[%s1965_s10 + $0x38] sm:$0xff]  ;;  %vm471_vm2 = vcmask 130048   ;;  %v1639_v4 = vld [vmem:[%s1965_s10 + $0x30] sm:$0xff]  ;;  %v1638_v6 = vld [vmem:[%s1965_s10 + $0x28] sm:$0xff]  ;;  %v1885_v58 = vmov 0   ;;  %vm905_vm3 = vcmask 7168  }
  0x4d   : > { %v518_v3 = vsel %vm471_vm2, %v1640_v2, 0  ;;  %v515_v5 = vsel %vm471_vm2, %v1639_v4, 0  ;;  %v512_v7 = vsel %vm471_vm2, %v1638_v6, 0  ;;  %v1637_v8 = vld [vmem:[%s1965_s10 + $0x20] sm:$0xff]  ;;  %v1636_v10 = vld [vmem:[%s1965_s10 + $0x18] sm:$0xff]  ;;  %v1635_v12 = vld [vmem:[%s1965_s10 + $0x10] sm:$0xff]  ;;  %1725 = vset.pattern.permute.xlu1 %v1885_v58  ;;  %1726 = vset.pattern.permute.xlu2 %v1885_v58 }
  0x4e   : > { %520 = vmatpush.bf16.xpose.msra.mxu0 %v518_v3  ;;  %1649 = vmatpush.bf16.xpose.msra.mxu2 %v518_v3  ;;  %v509_v9 = vsel %vm471_vm2, %v1637_v8, 0  ;;  %v506_v11 = vsel %vm471_vm2, %v1636_v10, 0  ;;  %v503_v13 = vsel %vm471_vm2, %v1635_v12, 0  ;;  %v1634_v14 = vld [vmem:[%s1965_s10 + $0x8] sm:$0xff]  ;;  %v1633_v16 = vld [vmem:[%s1965_s10] sm:$0xff]  ;;  %v1628_v19 = vld [vmem:[%s1955_s29 + $0x18] sm:$0xff] }
  0x4f   : > { %v500_v15 = vsel %vm471_vm2, %v1634_v14, 0  ;;  %v497_v17 = vsel %vm471_vm2, %v1633_v16, 0  ;;  %v1625_v18 = vld [vmem:[%s1955_s29] sm:$0xff]  ;;  %v1626_v20 = vld [vmem:[%s1955_s29 + $0x8] sm:$0xff]  ;;  %v1627_v22 = vld [vmem:[%s1955_s29 + $0x10] sm:$0xff]  ;;  %1727 = vset.pattern.permute.xlu0 %v1885_v58  ;;  %p1622_p10 = scmp.ne.s32.totalorder %s1857_s12, 1 }
  0x50   : > { %v1629_v21 = vld [vmem:[%s1955_s29 + $0x20] sm:$0xff]  ;;  %v1630_v23 = vld [vmem:[%s1955_s29 + $0x28] sm:$0xff]  ;;  %v1631_v24 = vld [vmem:[%s1955_s29 + $0x30] sm:$0xff] }
  0x51   : > { %v1632_v25 = vld [vmem:[%s1955_s29 + $0x38] sm:$0xff]  ;;  %v2101_v59 = vld [vmem:[#allocation2] sm:$0xff]  ;;  %v2109_v62 = vld [vmem:[#allocation2 + $0x30] sm:$0xff] }
  0x52   : > { %v2118_v2 = vld [vmem:[#allocation2 + $0x38] sm:$0xff]  ;;  %v2120_v4 = vld [vmem:[#allocation2 + $0x8] sm:$0xff]  ;;  %v2137_v10 = vld [vmem:[#allocation2 + $0x10] sm:$0xff] }
  0x53   : > { %v2152_v16 = vld [vmem:[#allocation2 + $0x48] sm:$0xff] }
  0x56   : > { %521 = vmatpush.bf16.xpose.msra.mxu0 %v515_v5  ;;  %1650 = vmatpush.bf16.xpose.msra.mxu2 %v515_v5 }
  0x5e   : > { %522 = vmatpush.bf16.xpose.msra.mxu0 %v512_v7  ;;  %1651 = vmatpush.bf16.xpose.msra.mxu2 %v512_v7 }
  0x66   : > { %523 = vmatpush.bf16.xpose.msra.mxu0 %v509_v9  ;;  %1652 = vmatpush.bf16.xpose.msra.mxu2 %v509_v9  ;;  %v2135_v9 = vld [vmem:[#allocation2 + $0x40] sm:$0xff] }
  0x6e   : > { %524 = vmatpush.bf16.xpose.msra.mxu0 %v506_v11  ;;  %1653 = vmatpush.bf16.xpose.msra.mxu2 %v506_v11 }
  0x76   : > { %525 = vmatpush.bf16.xpose.msra.mxu0 %v503_v13  ;;  %1654 = vmatpush.bf16.xpose.msra.mxu2 %v503_v13 }
  0x7e   : > { %526 = vmatpush.bf16.xpose.msra.mxu0 %v500_v15  ;;  %1655 = vmatpush.bf16.xpose.msra.mxu2 %v500_v15 }
  0x86   : > { %527 = vmatpush.bf16.xpose.msra.mxu0 %v497_v17  ;;  %1656 = vmatpush.bf16.xpose.msra.mxu2 %v497_v17  ;;  %v588_v17 = vld [vmem:[#allocation2 + $0x18] sm:$0xff] }
  0x8d   : > { %1582 = vmatmul.msk.bf16.vlgmr.msra.gmra.mxu0 %vm471_vm2, %v1625_v18  ;;  %1585 = vmatmul.msk.bf16.vlgmr.msra.gmra.mxu2 %vm471_vm2, %v1628_v19 }
  0x9d   : > { %1583 = vmatmul.msk.bf16.gmra.mxu0 %vm471_vm2, %v1626_v20  ;;  %1586 = vmatmul.msk.bf16.gmra.mxu2 %vm471_vm2, %v1629_v21  ;;  %v2154_v20 = vld [vmem:[#allocation2 + $0x20] sm:$0xff] }
  0xad   : > { %1584 = vmatmul.msk.bf16.gmra.mxu0 %vm471_vm2, %v1627_v22  ;;  %1587 = vmatmul.msk.bf16.gmra.mxu2 %vm471_vm2, %v1630_v23 }
  0xbd   : > { %1588 = vmatmul.msk.bf16.gmra.mxu2 %vm471_vm2, %v1631_v24 }
  0xcd   : > { %1589 = vmatmul.msk.bf16.gmra.mxu2 %vm471_vm2, %v1632_v25  ;;  %v2168_v25 = vld [vmem:[#allocation2 + $0x50] sm:$0xff] }
 0x10a   : > { %v529_v26 = vpop.f32.mrf.mxu0 }
 0x10b   : > { %v2053_v27 = vmul.f32 0.25, %v529_v26 }
 0x10d   : > { %601 = vmax.xlane.f32.xlu0 %v2053_v27 }
 0x110   : > { %v544_v28 = vpop.f32.mrf.mxu2 }
 0x111   : > { %v2056_v30 = vmul.f32 0.25, %v544_v28  ;;  %v2170_v28 = vld [vmem:[#allocation2 + $0x28] sm:$0xff] }
 0x112   : > { %v531_v29 = vpop.f32.mrf.mxu0 }
 0x113   : > { %v2061_v34 = vmul.f32 0.25, %v531_v29 }
 0x115   : > { %613 = vmax.xlane.f32.xlu0 %v2056_v30 }
 0x118   : > { %v546_v31 = vpop.f32.mrf.mxu2 }
 0x119   : > { %v2059_v32 = vmul.f32 0.25, %v546_v31 }
 0x11a   : > { %v534_v33 = vpop.f32.mrf.mxu0 }
 0x11b   : > { %615 = vmax.xlane.f32.xlu1 %v2059_v32  ;;  %v2065_v35 = vmul.f32 0.25, %v534_v33 }
 0x11d   : > { %603 = vmax.xlane.f32.xlu0 %v2061_v34 }
 0x120   : > { %v549_v36 = vpop.f32.mrf.mxu2 }
 0x121   : > { %v2067_v37 = vmul.f32 0.25, %v549_v36  ;;  %v2184_v36 = vld [vmem:[#allocation2 + $0x58] sm:$0xff] }
 0x122   : > { %v536_v38 = vpop.f32.mrf.mxu0 }
 0x123   : > { %617 = vmax.xlane.f32.xlu2 %v2067_v37  ;;  %605 = vmax.xlane.f32.xlu1 %v2065_v35  ;;  %v2071_v40 = vmul.f32 0.25, %v536_v38 }
 0x128   : > { %v551_v39 = vpop.f32.mrf.mxu2 }
 0x129   : > { %v2073_v41 = vmul.f32 0.25, %v551_v39 }
 0x12a   : > { %v539_v42 = vpop.f32.mrf.mxu0 }
 0x12b   : > { %v2075_v43 = vmul.f32 0.25, %v539_v42  ;;  %619 = vmax.xlane.f32.xlu0 %v2073_v41  ;;  %607 = vmax.xlane.f32.xlu1 %v2071_v40  ;;  %v2193_v42 = vld [vmem:[#allocation2 + $0x60] sm:$0xff] }
 0x12d   : > { %609 = vmax.xlane.f32.xlu2 %v2075_v43 }
 0x130   : > { %v554_v44 = vpop.f32.mrf.mxu2 }
 0x131   : > { %v2080_v45 = vmul.f32 0.25, %v554_v44 }
 0x132   : > { %v541_v46 = vpop.f32.mrf.mxu0 }
 0x133   : > { %v2082_v47 = vmul.f32 0.25, %v541_v46  ;;  %621 = vmax.xlane.f32.xlu1 %v2080_v45 }
 0x135   : > { %611 = vmax.xlane.f32.xlu2 %v2082_v47 }
 0x138   : > { %v556_v48 = vpop.f32.mrf.mxu2 }
 0x139   : > { %v2086_v49 = vmul.f32 0.25, %v556_v48 }
 0x13d   : > { %623 = vmax.xlane.f32.xlu2 %v2086_v49 }
 0x140   : > { %v559_v50 = vpop.f32.mrf.mxu2 }
 0x141   : > { %v2089_v51 = vmul.f32 0.25, %v559_v50  ;;  %v2204_v50 = vld [vmem:[#allocation2 + $0x68] sm:$0xff] }
 0x143   : > { %625 = vmax.xlane.f32.xlu0 %v2089_v51 }
 0x148   : > { %v561_v52 = vpop.f32.mrf.mxu2 }
 0x149   : > { %v2092_v53 = vmul.f32 0.25, %v561_v52 }
 0x14b   : > { %627 = vmax.xlane.f32.xlu1 %v2092_v53 }
 0x150   : > { %v564_v54 = vpop.f32.mrf.mxu2 }
 0x151   : > { %v2095_v55 = vmul.f32 0.25, %v564_v54 }
 0x153   : > { %629 = vmax.xlane.f32.xlu2 %v2095_v55 }
 0x158   : > { %v566_v56 = vpop.f32.mrf.mxu2 }
 0x159   : > { %v2098_v57 = vmul.f32 0.25, %v566_v56 }
 0x15b   : > { %631 = vmax.xlane.f32.xlu0 %v2098_v57 }
 0x180   : > { %v602_v60 = vpop.xlane.xlu0 %601 }
 0x181   : > { %v2104_v61 = vmax.f32 %v2101_v59, %v602_v60  ;;  %v1648_v60 = vld [vmem:[%s1970_s14 + $0x38] sm:$0xff] }
 0x182   : > { %1090 = vmatpush.bf16.msra.mxu1 %v1648_v60  ;;  %1657 = vmatpush.bf16.msra.mxu3 %v1648_v60 }
 0x183   : > { %1171 = vst.msk [vmem:[#allocation2] sm:$0xff] %vm905_vm3, %v2104_v61  ;;  %699 = vperm.xlu1 %1725, %v2104_v61   ;;  %v649_v48 = vsub.f32 %v2101_v59, %v2104_v61  ;;  %v2216_v61 = vld [vmem:[#allocation2 + $0x70] sm:$0xff] }
 0x185   : > { %v665_v56 = vmul.f32 1.442695, %v649_v48 }
 0x187   : > { %1728 = vpow2.f32 %v665_v56  ;;  %v1643_v56 = vld [vmem:[%s1970_s14 + $0x10] sm:$0xff] }
 0x188   : > { %v614_v63 = vpop.xlane.xlu0 %613 }
 0x189   : > { %v2112_v0 = vmax.f32 %v2109_v62, %v614_v63  ;;  %v1647_v63 = vld [vmem:[%s1970_s14 + $0x30] sm:$0xff] }
 0x18a   : > { %1091 = vmatpush.bf16.msra.mxu1 %v1647_v63  ;;  %1658 = vmatpush.bf16.msra.mxu3 %v1647_v63 }
 0x18b   : > { %v655_v1 = vsub.f32 %v2109_v62, %v2112_v0  ;;  %1177 = vst.msk [vmem:[#allocation2 + $0x30] sm:$0xff] %vm905_vm3, %v2112_v0 }
 0x18e   : > { %v616_v3 = vpop.xlane.xlu1 %615 }
 0x18f   : > { %v2123_v5 = vmax.f32 %v2118_v2, %v616_v3 }
 0x190   : > { %v604_v6 = vpop.xlane.xlu0 %603 }
 0x191   : > { %v656_v7 = vsub.f32 %v2118_v2, %v2123_v5  ;;  %1178 = vst.msk [vmem:[#allocation2 + $0x38] sm:$0xff] %vm905_vm3, %v2123_v5  ;;  %v2130_v8 = vmax.f32 %v2120_v4, %v604_v6 }
 0x193   : > { %1172 = vst.msk [vmem:[#allocation2 + $0x8] sm:$0xff] %vm905_vm3, %v2130_v8  ;;  %704 = vperm.xlu2 %1726, %v2130_v8  }
 0x196   : > { %v618_v11 = vpop.xlane.xlu2 %617  ;;  %v606_v12 = vpop.xlane.xlu1 %605 }
 0x197   : > { %v2140_v13 = vmax.f32 %v2135_v9, %v618_v11  ;;  %v2143_v14 = vmax.f32 %v2137_v10, %v606_v12  ;;  %v650_v12 = vsub.f32 %v2120_v4, %v2130_v8  ;;  %v2235_v4 = vld [vmem:[#allocation2 + $0x78] sm:$0xff] }
 0x199   : > { %v657_v15 = vsub.f32 %v2135_v9, %v2140_v13  ;;  %1179 = vst.msk [vmem:[#allocation2 + $0x40] sm:$0xff] %vm905_vm3, %v2140_v13  ;;  %709 = vperm.xlu0 %1727, %v2143_v14   ;;  %v667_v8 = vmul.f32 1.442695, %v650_v12 }
 0x19a   : > { %1173 = vst.msk [vmem:[#allocation2 + $0x10] sm:$0xff] %vm905_vm3, %v2143_v14 }
 0x19b   : > { %v681_v63 = vmul.f32 1.442695, %v657_v15 }
 0x19e   : > { %v620_v18 = vpop.xlane.xlu0 %619  ;;  %v608_v19 = vpop.xlane.xlu1 %607 }
 0x19f   : > { %v2157_v21 = vmax.f32 %v2152_v16, %v620_v18  ;;  %v636_v22 = vmax.f32 %v588_v17, %v608_v19  ;;  %v651_v19 = vsub.f32 %v2137_v10, %v2143_v14  ;;  %v677_v10 = vmul.f32 1.442695, %v655_v1 }
 0x1a0   : > { %v610_v23 = vpop.xlane.xlu2 %609 }
 0x1a1   : > { %1180 = vst.msk [vmem:[#allocation2 + $0x48] sm:$0xff] %vm905_vm3, %v2157_v21  ;;  %v2162_v24 = vmax.f32 %v2154_v20, %v610_v23  ;;  %714 = vperm.xlu2 %1726, %v636_v22   ;;  %v652_v59 = vsub.f32 %v588_v17, %v636_v22  ;;  %v2229_v17 = vpop.eup %1728  ;;  %v669_v23 = vmul.f32 1.442695, %v651_v19  ;;  %v658_v1 = vsub.f32 %v2152_v16, %v2157_v21  ;;  %v1642_v16 = vld [vmem:[%s1970_s14 + $0x8] sm:$0xff] }
 0x1a2   : > { %1174 = vst.msk [vmem:[#allocation2 + $0x18] sm:$0xff] %vm905_vm3, %v636_v22  ;;  %v1646_v22 = vld [vmem:[%s1970_s14 + $0x28] sm:$0xff] }
 0x1a3   : > { %1175 = vst.msk [vmem:[#allocation2 + $0x20] sm:$0xff] %vm905_vm3, %v2162_v24  ;;  %719 = vperm.xlu1 %1725, %v2162_v24   ;;  %v671_v11 = vmul.f32 1.442695, %v652_v59  ;;  %1092 = vmatpush.bf16.msra.mxu1 %v1646_v22  ;;  %v653_v14 = vsub.f32 %v2154_v20, %v2162_v24  ;;  %v679_v59 = vmul.f32 1.442695, %v656_v7 }
 0x1a4   : > { %1659 = vmatpush.bf16.msra.mxu3 %v1646_v22 }
 0x1a5   : > { %1730 = vpow2.f32 %v671_v11  ;;  %v673_v20 = vmul.f32 1.442695, %v653_v14  ;;  %v1641_v11 = vld [vmem:[%s1970_s14] sm:$0xff] }
 0x1a6   : > { %v622_v26 = vpop.xlane.xlu1 %621  ;;  %1732 = vpow2.f32 %v667_v8 }
 0x1a7   : > { %v2173_v29 = vmax.f32 %v2168_v25, %v622_v26  ;;  %1734 = vpow2.f32 %v669_v23 }
 0x1a8   : > { %v612_v31 = vpop.xlane.xlu2 %611  ;;  %1736 = vpow2.f32 %v677_v10 }
 0x1a9   : > { %1181 = vst.msk [vmem:[#allocation2 + $0x50] sm:$0xff] %vm905_vm3, %v2173_v29  ;;  %v2178_v33 = vmax.f32 %v2170_v28, %v612_v31  ;;  %1738 = vpow2.f32 %v673_v20 }
 0x1ab   : > { %1176 = vst.msk [vmem:[#allocation2 + $0x28] sm:$0xff] %vm905_vm3, %v2178_v33  ;;  %749 = vperm.xlu1 %1725, %v2173_v29   ;;  %724 = vperm.xlu2 %1726, %v2178_v33   ;;  %v2252_v48 = vpop.eup %1730  ;;  %v654_v62 = vsub.f32 %v2170_v28, %v2178_v33  ;;  %v683_v28 = vmul.f32 1.442695, %v658_v1 }
 0x1ad   : > { %v675_v24 = vmul.f32 1.442695, %v654_v62 }
 0x1af   : > { %1740 = vpow2.f32 %v675_v24 }
 0x1b0   : > { %v624_v38 = vpop.xlane.xlu2 %623  ;;  %1742 = vpow2.f32 %v683_v28 }
 0x1b1   : > { %v2187_v39 = vmax.f32 %v2184_v36, %v624_v38  ;;  %v1645_v38 = vld [vmem:[%s1970_s14 + $0x20] sm:$0xff]  ;;  %1744 = vpow2.f32 %v679_v59 }
 0x1b2   : > { %1093 = vmatpush.bf16.msra.mxu1 %v1645_v38  ;;  %1660 = vmatpush.bf16.msra.mxu3 %v1645_v38  ;;  %1746 = vpow2.f32 %v681_v63 }
 0x1b3   : > { %1182 = vst.msk [vmem:[#allocation2 + $0x58] sm:$0xff] %vm905_vm3, %v2187_v39  ;;  %729 = vperm.xlu1 %1725, %v2112_v0   ;;  %754 = vperm.xlu2 %1726, %v2187_v39   ;;  %v1644_v0 = vld [vmem:[%s1970_s14 + $0x18] sm:$0xff] }
 0x1b6   : > { %v626_v44 = vpop.xlane.xlu0 %625  ;;  %1094 = vmatpush.bf16.msra.mxu1 %v1644_v0  ;;  %1661 = vmatpush.bf16.msra.mxu3 %v1644_v0 }
 0x1b7   : > { %v2196_v46 = vmax.f32 %v2193_v42, %v626_v44 }
 0x1b9   : > { %1183 = vst.msk [vmem:[#allocation2 + $0x60] sm:$0xff] %vm905_vm3, %v2196_v46  ;;  %759 = vperm.xlu0 %1727, %v2196_v46  }
 0x1ba   : > { %1095 = vmatpush.bf16.msra.mxu1 %v1643_v56  ;;  %1662 = vmatpush.bf16.msra.mxu3 %v1643_v56 }
 0x1bb   : > { %734 = vperm.xlu1 %1725, %v2123_v5   ;;  %v660_v5 = vsub.f32 %v2184_v36, %v2187_v39 }
 0x1bd   : > { %v687_v9 = vmul.f32 1.442695, %v660_v5 }
 0x1be   : > { %v628_v52 = vpop.xlane.xlu1 %627  ;;  %1096 = vmatpush.bf16.msra.mxu1 %v1642_v16  ;;  %1663 = vmatpush.bf16.msra.mxu3 %v1642_v16 }
 0x1bf   : > { %v2207_v54 = vmax.f32 %v2204_v50, %v628_v52  ;;  %v2260_v52 = vpop.eup %1732 }
 0x1c0   : > { %v2263_v60 = vpop.eup %1734 }
 0x1c1   : > { %v662_v58 = vsub.f32 %v2204_v50, %v2207_v54  ;;  %1184 = vst.msk [vmem:[#allocation2 + $0x68] sm:$0xff] %vm905_vm3, %v2207_v54  ;;  %764 = vperm.xlu2 %1726, %v2207_v54   ;;  %v2267_v33 = vpop.eup %1736 }
 0x1c2   : > { %1097 = vmatpush.bf16.msra.mxu1 %v1641_v11  ;;  %1664 = vmatpush.bf16.msra.mxu3 %v1641_v11 }
 0x1c3   : > { %739 = vperm.xlu1 %1725, %v2140_v13  }
 0x1c6   : > { %v630_v3 = vpop.xlane.xlu2 %629 }
 0x1c7   : > { %v2220_v6 = vmax.f32 %v2216_v61, %v630_v3  ;;  %v2279_v3 = vpop.eup %1738 }
 0x1c8   : > { %v2282_v12 = vpop.eup %1740 }
 0x1c9   : > { %v663_v18 = vsub.f32 %v2216_v61, %v2220_v6  ;;  %1185 = vst.msk [vmem:[#allocation2 + $0x70] sm:$0xff] %vm905_vm3, %v2220_v6  ;;  %769 = vperm.xlu0 %1727, %v2220_v6   ;;  %v2288_v2 = vpop.eup %1742 }
 0x1ca   : > { %v2293_v13 = vpop.eup %1744 }
 0x1cb   : > { %940 = vperm.xlu1 %1725, %v2229_v17   ;;  %v2295_v15 = vpop.eup %1746 }
 0x1ce   : > { %v632_v26 = vpop.xlane.xlu0 %631 }
 0x1cf   : > { %v2238_v31 = vmax.f32 %v2235_v4, %v632_v26 }
 0x1d1   : > { %v664_v44 = vsub.f32 %v2235_v4, %v2238_v31  ;;  %1186 = vst.msk [vmem:[#allocation2 + $0x78] sm:$0xff] %vm905_vm3, %v2238_v31  ;;  %774 = vperm.xlu2 %1726, %v2238_v31   ;;  %744 = vperm.xlu0 %1727, %v2157_v21   ;;  %v661_v21 = vsub.f32 %v2193_v42, %v2196_v46  ;;  %v693_v4 = vmul.f32 1.442695, %v663_v18  ;;  %v923_v18 = vld [vmem:[#allocation4 + $0x8] sm:$0xff] }
 0x1d2   : > { %v659_v42 = vsub.f32 %v2168_v25, %v2173_v29 }
 0x1d3   : > { %955 = vperm.xlu1 %1725, %v2252_v48   ;;  %v689_v19 = vmul.f32 1.442695, %v661_v21 }
 0x1d4   : > { %v685_v7 = vmul.f32 1.442695, %v659_v42 }
 0x1d5   : > { %1748 = vpow2.f32 %v689_v19 }
 0x1d6   : > { %1750 = vpow2.f32 %v685_v7 }
 0x1d7   : > { %1752 = vpow2.f32 %v687_v9 }
 0x1d9   : > { %945 = vperm.xlu2 %1726, %v2260_v52   ;;  %950 = vperm.xlu0 %1727, %v2263_v60  }
 0x1db   : > { %970 = vperm.xlu1 %1725, %v2267_v33   ;;  %v2299_v25 = vpop.eup %1748 }
 0x1dc   : > { %v2302_v36 = vpop.eup %1750 }
 0x1dd   : > { %v2304_v39 = vpop.eup %1752 }
 0x1e1   : > { %965 = vperm.xlu2 %1726, %v2282_v12   ;;  %960 = vperm.xlu0 %1727, %v2279_v3  }
 0x1e3   : > { %985 = vperm.xlu1 %1725, %v2288_v2  }
 0x1e9   : > { %980 = vperm.xlu2 %1726, %v2295_v15   ;;  %975 = vperm.xlu0 %1727, %v2293_v13  }
 0x1eb   : > { %1000 = vperm.xlu1 %1725, %v2299_v25  }
 0x1ed   : > { %v705_v29 = vpop.permute.xlu2 %704 }
 0x1ee   : > { %v778_v46 = vsub.f32 %v2061_v34, %v705_v29 }
 0x1f0   : > { %v795_v22 = vmul.f32 1.442695, %v778_v46 }
 0x1f1   : > { %995 = vperm.xlu2 %1726, %v2304_v39   ;;  %990 = vperm.xlu0 %1727, %v2302_v36  }
 0x1f2   : > { %1754 = vpow2.f32 %v795_v22 }
 0x1f5   : > { %v700_v8 = vpop.permute.xlu1 %699 }
 0x1f6   : > { %v777_v23 = vsub.f32 %v2053_v27, %v700_v8 }
 0x1f8   : > { %v793_v26 = vmul.f32 1.442695, %v777_v23  ;;  %v1755_v38 = vpop.eup %1754 }
 0x1fa   : > { %1756 = vpow2.f32 %v793_v26 }
 0x1fb   : > { %v715_v62 = vpop.permute.xlu2 %714 }
 0x1fc   : > { %v780_v0 = vsub.f32 %v2071_v40, %v715_v62 }
 0x1fe   : > { %v799_v1 = vmul.f32 1.442695, %v780_v0 }
 0x200   : > { %v1757_v10 = vpop.eup %1756  ;;  %1758 = vpow2.f32 %v799_v1 }
 0x201   : > { %v1034_v14 = vpack.c.bf16 %v1755_v38, %v1757_v10 }
 0x203   : > { %1098 = vmatmul.bf16.vlgmr.msra.gmra.mxu1 %v1034_v14 }
 0x205   : > { %v725_v20 = vpop.permute.xlu2 %724 }
 0x206   : > { %v2312_v28 = vpop.eup %1758  ;;  %v782_v40 = vsub.f32 %v2082_v47, %v725_v20 }
 0x20b   : > { %v710_v34 = vpop.permute.xlu0 %709 }
 0x20c   : > { %v779_v24 = vsub.f32 %v2065_v35, %v710_v34  ;;  %v803_v35 = vmul.f32 1.442695, %v782_v40 }
 0x20d   : > { %v755_v21 = vpop.permute.xlu2 %754 }
 0x20e   : > { %v797_v56 = vmul.f32 1.442695, %v779_v24  ;;  %v788_v11 = vsub.f32 %v2086_v49, %v755_v21 }
 0x210   : > { %1760 = vpow2.f32 %v797_v56  ;;  %v815_v42 = vmul.f32 1.442695, %v788_v11 }
 0x215   : > { %v720_v27 = vpop.permute.xlu1 %719  ;;  %859 = vadd.xlane.f32.xlu1 %v1755_v38 }
 0x216   : > { %v1761_v16 = vpop.eup %1760  ;;  %v781_v59 = vsub.f32 %v2075_v43, %v720_v27 }
 0x217   : > { %v1035_v63 = vpack.c.bf16 %v2312_v28, %v1761_v16 }
 0x218   : > { %v801_v19 = vmul.f32 1.442695, %v781_v59 }
 0x219   : > { %1103 = vmatmul.bf16.gmra.mxu1 %v1035_v63 }
 0x21a   : > { %857 = vadd.xlane.f32.xlu2 %v1757_v10  ;;  %1762 = vpow2.f32 %v801_v19 }
 0x21b   : > { %1764 = vpow2.f32 %v803_v35  ;;  %v765_v22 = vpop.permute.xlu2 %764 }
 0x21c   : > { %1766 = vpow2.f32 %v815_v42  ;;  %v790_v38 = vsub.f32 %v2092_v53, %v765_v22 }
 0x21d   : > { %v750_v5 = vpop.permute.xlu1 %749 }
 0x21e   : > { %v787_v7 = vsub.f32 %v2080_v45, %v750_v5  ;;  %v819_v62 = vmul.f32 1.442695, %v790_v38 }
 0x220   : > { %v813_v9 = vmul.f32 1.442695, %v787_v7  ;;  %v1763_v43 = vpop.eup %1762 }
 0x221   : > { %v1765_v46 = vpop.eup %1764 }
 0x222   : > { %1768 = vpow2.f32 %v813_v9  ;;  %v1767_v49 = vpop.eup %1766  ;;  %v1036_v8 = vpack.c.bf16 %v1765_v46, %v1763_v43 }
 0x225   : > { %v730_v29 = vpop.permute.xlu1 %729 }
 0x226   : > { %v783_v47 = vsub.f32 %v2056_v30, %v730_v29 }
 0x228   : > { %v1769_v23 = vpop.eup %1768  ;;  %v805_v26 = vmul.f32 1.442695, %v783_v47 }
 0x229   : > { %1108 = vmatmul.bf16.gmra.mxu1 %v1036_v8  ;;  %v1039_v10 = vpack.c.bf16 %v1767_v49, %v1769_v23  ;;  %v691_v8 = vmul.f32 1.442695, %v662_v58  ;;  %v922_v58 = vld [vmem:[#allocation4] sm:$0xff] }
 0x22a   : > { %1770 = vpow2.f32 %v805_v26 }
 0x22b   : > { %v760_v45 = vpop.permute.xlu0 %759  ;;  %1123 = vmatmul.bf16.vlgmr.msra.gmra.mxu3 %v1039_v10  ;;  %v775_v21 = vpop.permute.xlu2 %774 }
 0x22c   : > { %v789_v14 = vsub.f32 %v2089_v51, %v760_v45  ;;  %v826_v45 = vld [vmem:[#allocation3 + $0x8] sm:$0xff] }
 0x22d   : > { %v735_v0 = vpop.permute.xlu1 %734 }
 0x22e   : > { %v817_v1 = vmul.f32 1.442695, %v789_v14  ;;  %v784_v34 = vsub.f32 %v2059_v32, %v735_v0  ;;  %v792_v32 = vsub.f32 %v2098_v57, %v775_v21 }
 0x230   : > { %v1771_v20 = vpop.eup %1770  ;;  %1772 = vpow2.f32 %v817_v1  ;;  %v807_v30 = vmul.f32 1.442695, %v784_v34  ;;  %v823_v35 = vmul.f32 1.442695, %v792_v32  ;;  %v842_v1 = vmul.f32 %v2260_v52, %v826_v45  ;;  %v925_v32 = vld [vmem:[#allocation4 + $0x18] sm:$0xff] }
 0x231   : > { %1774 = vpow2.f32 %v819_v62  ;;  %869 = vadd.xlane.f32.xlu0 %v1771_v20 }
 0x232   : > { %1776 = vpow2.f32 %v807_v30 }
 0x235   : > { %v740_v24 = vpop.permute.xlu1 %739 }
 0x236   : > { %v1773_v53 = vpop.eup %1772  ;;  %v785_v56 = vsub.f32 %v2067_v37, %v740_v24 }
 0x237   : > { %v1775_v27 = vpop.eup %1774 }
 0x238   : > { %v1777_v59 = vpop.eup %1776  ;;  %v809_v63 = vmul.f32 1.442695, %v785_v56  ;;  %v1040_v40 = vpack.c.bf16 %v1775_v27, %v1773_v53 }
 0x239   : > { %861 = vadd.xlane.f32.xlu0 %v1761_v16  ;;  %871 = vadd.xlane.f32.xlu1 %v1777_v59  ;;  %v1037_v51 = vpack.c.bf16 %v1777_v59, %v1771_v20  ;;  %v924_v59 = vld [vmem:[#allocation4 + $0x10] sm:$0xff] }
 0x23a   : > { %1778 = vpow2.f32 %v809_v63 }
 0x23b   : > { %v770_v11 = vpop.permute.xlu0 %769  ;;  %1113 = vmatmul.bf16.gmra.mxu1 %v1037_v51  ;;  %1128 = vmatmul.bf16.gmra.mxu3 %v1040_v40 }
 0x23c   : > { %v791_v19 = vsub.f32 %v2095_v55, %v770_v11 }
 0x23e   : > { %v821_v42 = vmul.f32 1.442695, %v791_v19 }
 0x240   : > { %v1779_v5 = vpop.eup %1778  ;;  %1780 = vpow2.f32 %v821_v42 }
 0x241   : > { %873 = vadd.xlane.f32.xlu2 %v1779_v5  ;;  %865 = vadd.xlane.f32.xlu1 %v1763_v43  ;;  %1782 = vpow2.f32 %v823_v35  ;;  %v941_v43 = vpop.permute.xlu1 %940 }
 0x242   : > { %v1018_v38 = vmul.f32 %v941_v43, %v922_v58  ;;  %v927_v43 = vld [vmem:[#allocation4 + $0x28] sm:$0xff] }
 0x243   : > { %v745_v37 = vpop.permute.xlu0 %744 }
 0x244   : > { %v786_v16 = vsub.f32 %v2073_v41, %v745_v37  ;;  %v695_v41 = vmul.f32 1.442695, %v664_v44 }
 0x246   : > { %v1781_v7 = vpop.eup %1780  ;;  %v811_v9 = vmul.f32 1.442695, %v786_v16 }
 0x247   : > { %v1783_v29 = vpop.eup %1782 }
 0x248   : > { %1784 = vpow2.f32 %v811_v9  ;;  %v1041_v57 = vpack.c.bf16 %v1783_v29, %v1781_v7 }
 0x249   : > { %877 = vadd.xlane.f32.xlu1 %v1769_v23  ;;  %863 = vadd.xlane.f32.xlu2 %v2312_v28  ;;  %v956_v47 = vpop.permute.xlu1 %955  ;;  %1786 = vpow2.f32 %v695_v41  ;;  %v946_v28 = vpop.permute.xlu2 %945  ;;  %v932_v41 = vld [vmem:[#allocation4 + $0x50] sm:$0xff] }
 0x24a   : > { %1788 = vpow2.f32 %v691_v8  ;;  %v1019_v62 = vmul.f32 %v946_v28, %v923_v18  ;;  %v1021_v19 = vmul.f32 %v956_v47, %v925_v32  ;;  %v929_v32 = vld [vmem:[#allocation4 + $0x38] sm:$0xff] }
 0x24b   : > { %1133 = vmatmul.bf16.gmra.mxu3 %v1041_v57  ;;  %1790 = vpow2.f32 %v693_v4  ;;  %v951_v26 = vpop.permute.xlu0 %950 }
 0x24c   : > { %v1020_v51 = vmul.f32 %v951_v26, %v924_v59 }
 0x24e   : > { %v1785_v55 = vpop.eup %1784 }
 0x24f   : > { %875 = vadd.xlane.f32.xlu0 %v1785_v55  ;;  %v1038_v22 = vpack.c.bf16 %v1785_v55, %v1779_v5  ;;  %v2334_v23 = vpop.eup %1786  ;;  %v831_v5 = vld [vmem:[#allocation3 + $0x30] sm:$0xff] }
 0x250   : > { %v2342_v44 = vpop.eup %1788  ;;  %v847_v37 = vmul.f32 %v2267_v33, %v831_v5  ;;  %v827_v55 = vld [vmem:[#allocation3 + $0x10] sm:$0xff] }
 0x251   : > { %867 = vadd.xlane.f32.xlu2 %v1765_v46  ;;  %1118 = vmatmul.bf16.gmra.mxu1 %v1038_v22  ;;  %v2337_v46 = vpop.permute.xlu1 %970  ;;  %v966_v31 = vpop.permute.xlu2 %965  ;;  %v832_v22 = vld [vmem:[#allocation3 + $0x38] sm:$0xff]  ;;  %v843_v47 = vmul.f32 %v2263_v60, %v827_v55 }
 0x252   : > { %883 = vadd.xlane.f32.xlu1 %v1775_v27  ;;  %v2347_v50 = vpop.eup %1790  ;;  %v848_v28 = vmul.f32 %v2293_v13, %v832_v22  ;;  %v1023_v33 = vmul.f32 %v966_v31, %v927_v43  ;;  %v933_v60 = vld [vmem:[#allocation4 + $0x58] sm:$0xff] }
 0x253   : > { %v961_v0 = vpop.permute.xlu0 %960 }
 0x257   : > { %881 = vadd.xlane.f32.xlu0 %v1773_v53  ;;  %v825_v53 = vld [vmem:[#allocation3] sm:$0xff] }
 0x258   : > { %v841_v56 = vmul.f32 %v2229_v17, %v825_v53  ;;  %v926_v17 = vld [vmem:[#allocation4 + $0x20] sm:$0xff] }
 0x259   : > { %879 = vadd.xlane.f32.xlu2 %v1767_v49  ;;  %v2345_v49 = vpop.permute.xlu1 %985  ;;  %v2350_v54 = vpop.permute.xlu2 %980 }
 0x25b   : > { %v2362_v63 = vpop.permute.xlu0 %975 }
 0x25f   : > { %887 = vadd.xlane.f32.xlu0 %v1783_v29 }
 0x261   : > { %885 = vadd.xlane.f32.xlu2 %v1781_v7  ;;  %v2352_v10 = vpop.permute.xlu1 %1000  ;;  %v2355_v14 = vpop.permute.xlu2 %995  ;;  %v1022_v7 = vmul.f32 %v961_v0, %v926_v17  ;;  %v833_v0 = vld [vmem:[#allocation3 + $0x40] sm:$0xff]  ;;  %v834_v17 = vld [vmem:[#allocation3 + $0x48] sm:$0xff] }
 0x262   : > { %v849_v31 = vmul.f32 %v2295_v15, %v833_v0  ;;  %v931_v0 = vld [vmem:[#allocation4 + $0x48] sm:$0xff] }
 0x263   : > { %v991_v11 = vpop.permute.xlu0 %990 }
 0x264   : > { %v1028_v58 = vmul.f32 %v991_v11, %v932_v41 }
 0x26b   : > { %1015 = vperm.xlu1 %1725, %v2334_v23  }
 0x273   : > { %1005 = vperm.xlu0 %1727, %v2342_v44  }
 0x279   : > { %1010 = vperm.xlu2 %1726, %v2347_v50  }
 0x280   : > { %v1099_v61 = vpop.f32.mrf.mxu1 }
 0x281   : > { %v1139_v6 = vadd.f32 %v1099_v61, %v1018_v38 }
 0x283   : > { %1155 = vst.msk [vmem:[#allocation4] sm:$0xff] %vm471_vm2, %v1139_v6 }
 0x288   : > { %v860_v34 = vpop.xlane.xlu1 %859  ;;  %v1101_v20 = vpop.f32.mrf.mxu1 }
 0x289   : > { %v890_v30 = vadd.f32 %v860_v34, %v842_v1  ;;  %v1140_v24 = vadd.f32 %v1101_v20, %v1019_v62  ;;  %v829_v62 = vld [vmem:[#allocation3 + $0x20] sm:$0xff]  ;;  %v928_v1 = vld [vmem:[#allocation4 + $0x30] sm:$0xff] }
 0x28a   : > { %v845_v13 = vmul.f32 %v2279_v3, %v829_v62  ;;  %v828_v3 = vld [vmem:[#allocation3 + $0x18] sm:$0xff]  ;;  %v839_v62 = vld [vmem:[#allocation3 + $0x70] sm:$0xff] }
 0x28b   : > { %907 = vst.msk [vmem:[#allocation3 + $0x8] sm:$0xff] %vm905_vm3, %v890_v30  ;;  %v1029_v30 = vmul.f32 %v2355_v14, %v933_v60 }
 0x28c   : > { %1156 = vst.msk [vmem:[#allocation4 + $0x8] sm:$0xff] %vm471_vm2, %v1140_v24 }
 0x28d   : > { %v858_v27 = vpop.xlane.xlu2 %857 }
 0x28e   : > { %v889_v21 = vadd.f32 %v858_v27, %v841_v56  ;;  %v1024_v27 = vmul.f32 %v2337_v46, %v928_v1 }
 0x290   : > { %906 = vst.msk [vmem:[#allocation3] sm:$0xff] %vm905_vm3, %v889_v21 }
 0x296   : > { %v1104_v52 = vpop.f32.mrf.mxu1 }
 0x297   : > { %v1141_v40 = vadd.f32 %v1104_v52, %v1020_v51  ;;  %v835_v51 = vld [vmem:[#allocation3 + $0x50] sm:$0xff]  ;;  %v934_v52 = vld [vmem:[#allocation4 + $0x60] sm:$0xff] }
 0x298   : > { %v851_v14 = vmul.f32 %v2302_v36, %v835_v51  ;;  %v830_v36 = vld [vmem:[#allocation3 + $0x28] sm:$0xff] }
 0x299   : > { %1157 = vst.msk [vmem:[#allocation4 + $0x10] sm:$0xff] %vm471_vm2, %v1141_v40  ;;  %v844_v40 = vmul.f32 %v2252_v48, %v828_v3  ;;  %v846_v55 = vmul.f32 %v2282_v12, %v830_v36 }
 0x29e   : > { %v1106_v35 = vpop.f32.mrf.mxu1 }
 0x29f   : > { %v1142_v42 = vadd.f32 %v1106_v35, %v1021_v19  ;;  %v1030_v19 = vmul.f32 %v2352_v10, %v934_v52 }
 0x2a1   : > { %1158 = vst.msk [vmem:[#allocation4 + $0x18] sm:$0xff] %vm471_vm2, %v1142_v42 }
 0x2a4   : > { %v870_v16 = vpop.xlane.xlu0 %869 }
 0x2a5   : > { %v895_v9 = vadd.f32 %v870_v16, %v847_v37  ;;  %v1025_v37 = vmul.f32 %v2362_v63, %v929_v32 }
 0x2a6   : > { %v1109_v29 = vpop.f32.mrf.mxu1 }
 0x2a7   : > { %912 = vst.msk [vmem:[#allocation3 + $0x30] sm:$0xff] %vm905_vm3, %v895_v9  ;;  %v1143_v57 = vadd.f32 %v1109_v29, %v1022_v7  ;;  %v850_v9 = vmul.f32 %v2288_v2, %v834_v17  ;;  %v838_v29 = vld [vmem:[#allocation3 + $0x68] sm:$0xff]  ;;  %v836_v2 = vld [vmem:[#allocation3 + $0x58] sm:$0xff] }
 0x2a8   : > { %v854_v63 = vmul.f32 %v2342_v44, %v838_v29  ;;  %v852_v44 = vmul.f32 %v2304_v39, %v836_v2  ;;  %v855_v39 = vmul.f32 %v2347_v50, %v839_v62 }
 0x2a9   : > { %1159 = vst.msk [vmem:[#allocation4 + $0x20] sm:$0xff] %vm471_vm2, %v1143_v57 }
 0x2ac   : > { %v862_v8 = vpop.xlane.xlu0 %861  ;;  %v872_v4 = vpop.xlane.xlu1 %871 }
 0x2ad   : > { %v891_v26 = vadd.f32 %v862_v8, %v843_v47  ;;  %v896_v38 = vadd.f32 %v872_v4, %v848_v28  ;;  %v837_v28 = vld [vmem:[#allocation3 + $0x60] sm:$0xff] }
 0x2ae   : > { %v1111_v61 = vpop.f32.mrf.mxu1  ;;  %v1124_v6 = vpop.f32.mrf.mxu3  ;;  %v853_v8 = vmul.f32 %v2299_v25, %v837_v28  ;;  %v930_v4 = vld [vmem:[#allocation4 + $0x40] sm:$0xff] }
 0x2af   : > { %908 = vst.msk [vmem:[#allocation3 + $0x10] sm:$0xff] %vm905_vm3, %v891_v26  ;;  %v1144_v18 = vadd.f32 %v1111_v61, %v1023_v33  ;;  %v1149_v45 = vadd.f32 %v1124_v6, %v1028_v58 }
 0x2b0   : > { %913 = vst.msk [vmem:[#allocation3 + $0x38] sm:$0xff] %vm905_vm3, %v896_v38  ;;  %v1026_v38 = vmul.f32 %v2350_v54, %v930_v4  ;;  %v1027_v54 = vmul.f32 %v2345_v49, %v931_v0  ;;  %v935_v49 = vld [vmem:[#allocation4 + $0x68] sm:$0xff] }
 0x2b1   : > { %1160 = vst.msk [vmem:[#allocation4 + $0x28] sm:$0xff] %vm471_vm2, %v1144_v18  ;;  %v840_v18 = vld [vmem:[#allocation3 + $0x78] sm:$0xff] }
 0x2b2   : > { %1165 = vst.msk [vmem:[#allocation4 + $0x50] sm:$0xff] %vm471_vm2, %v1149_v45  ;;  %v856_v25 = vmul.f32 %v2334_v23, %v840_v18  ;;  %v937_v23 = vld [vmem:[#allocation4 + $0x78] sm:$0xff] }
 0x2b4   : > { %v866_v34 = vpop.xlane.xlu1 %865  ;;  %v874_v20 = vpop.xlane.xlu2 %873 }
 0x2b5   : > { %v893_v24 = vadd.f32 %v866_v34, %v845_v13  ;;  %v897_v53 = vadd.f32 %v874_v20, %v849_v31 }
 0x2b6   : > { %v1126_v56 = vpop.f32.mrf.mxu3 }
 0x2b7   : > { %910 = vst.msk [vmem:[#allocation3 + $0x20] sm:$0xff] %vm905_vm3, %v893_v24  ;;  %v1150_v21 = vadd.f32 %v1126_v56, %v1029_v30  ;;  %v936_v24 = vld [vmem:[#allocation4 + $0x70] sm:$0xff] }
 0x2b8   : > { %914 = vst.msk [vmem:[#allocation3 + $0x40] sm:$0xff] %vm905_vm3, %v897_v53  ;;  %v1114_v59 = vpop.f32.mrf.mxu1 }
 0x2b9   : > { %1166 = vst.msk [vmem:[#allocation4 + $0x58] sm:$0xff] %vm471_vm2, %v1150_v21  ;;  %v1145_v15 = vadd.f32 %v1114_v59, %v1024_v27 }
 0x2bb   : > { %1161 = vst.msk [vmem:[#allocation4 + $0x30] sm:$0xff] %vm471_vm2, %v1145_v15 }
 0x2bc   : > { %v878_v46 = vpop.xlane.xlu1 %877  ;;  %v864_v11 = vpop.xlane.xlu2 %863 }
 0x2bd   : > { %v899_v35 = vadd.f32 %v878_v46, %v851_v14  ;;  %v892_v42 = vadd.f32 %v864_v11, %v844_v40 }
 0x2be   : > { %v1129_v5 = vpop.f32.mrf.mxu3 }
 0x2bf   : > { %916 = vst.msk [vmem:[#allocation3 + $0x50] sm:$0xff] %vm905_vm3, %v899_v35  ;;  %v1151_v16 = vadd.f32 %v1129_v5, %v1030_v19 }
 0x2c0   : > { %909 = vst.msk [vmem:[#allocation3 + $0x18] sm:$0xff] %vm905_vm3, %v892_v42  ;;  %v1116_v7 = vpop.f32.mrf.mxu1 }
 0x2c1   : > { %1167 = vst.msk [vmem:[#allocation4 + $0x60] sm:$0xff] %vm471_vm2, %v1151_v16  ;;  %v1146_v48 = vadd.f32 %v1116_v7, %v1025_v37 }
 0x2c2   : > { %v876_v10 = vpop.xlane.xlu0 %875 }
 0x2c3   : > { %1162 = vst.msk [vmem:[#allocation4 + $0x38] sm:$0xff] %vm471_vm2, %v1146_v48  ;;  %v898_v57 = vadd.f32 %v876_v10, %v850_v9 }
 0x2c4   : > { %v868_v22 = vpop.xlane.xlu2 %867 }
 0x2c5   : > { %915 = vst.msk [vmem:[#allocation3 + $0x48] sm:$0xff] %vm905_vm3, %v898_v57  ;;  %v884_v43 = vpop.xlane.xlu1 %883  ;;  %v894_v41 = vadd.f32 %v868_v22, %v846_v55 }
 0x2c6   : > { %v902_v47 = vadd.f32 %v884_v43, %v854_v63  ;;  %v1131_v58 = vpop.f32.mrf.mxu3 }
 0x2c7   : > { %911 = vst.msk [vmem:[#allocation3 + $0x28] sm:$0xff] %vm905_vm3, %v894_v41 }
 0x2c8   : > { %919 = vst.msk [vmem:[#allocation3 + $0x68] sm:$0xff] %vm905_vm3, %v902_v47 }
 0x2ca   : > { %v882_v33 = vpop.xlane.xlu0 %881 }
 0x2cb   : > { %v901_v12 = vadd.f32 %v882_v33, %v853_v8 }
 0x2cc   : > { %v880_v26 = vpop.xlane.xlu2 %879 }
 0x2cd   : > { %918 = vst.msk [vmem:[#allocation3 + $0x60] sm:$0xff] %vm905_vm3, %v901_v12  ;;  %v900_v61 = vadd.f32 %v880_v26, %v852_v44 }
 0x2ce   : > { %v1119_v6 = vpop.f32.mrf.mxu1  ;;  %v1134_v1 = vpop.f32.mrf.mxu3 }
 0x2cf   : > { %917 = vst.msk [vmem:[#allocation3 + $0x58] sm:$0xff] %vm905_vm3, %v900_v61  ;;  %v1147_v45 = vadd.f32 %v1119_v6, %v1026_v38 }
 0x2d1   : > { %1163 = vst.msk [vmem:[#allocation4 + $0x40] sm:$0xff] %vm471_vm2, %v1147_v45 }
 0x2d2   : > { %v888_v60 = vpop.xlane.xlu0 %887 }
 0x2d3   : > { %v904_v13 = vadd.f32 %v888_v60, %v856_v25 }
 0x2d4   : > { %v886_v31 = vpop.xlane.xlu2 %885 }
 0x2d5   : > { %921 = vst.msk [vmem:[#allocation3 + $0x78] sm:$0xff] %vm905_vm3, %v904_v13  ;;  %v903_v34 = vadd.f32 %v886_v31, %v855_v39 }
 0x2d6   : > { %v1121_v20 = vpop.f32.mrf.mxu1  ;;  %v1136_v50 = vpop.f32.mrf.mxu3 }
 0x2d7   : > { %920 = vst.msk [vmem:[#allocation3 + $0x70] sm:$0xff] %vm905_vm3, %v903_v34  ;;  %v1148_v30 = vadd.f32 %v1121_v20, %v1027_v54 }
 0x2d9   : > { %1164 = vst.msk [vmem:[#allocation4 + $0x48] sm:$0xff] %vm471_vm2, %v1148_v30 }
 0x2dc   : > { %v1011_v53 = vpop.permute.xlu2 %1010 }
 0x2dd   : > { %v1016_v56 = vpop.permute.xlu1 %1015  ;;  %v1032_v27 = vmul.f32 %v1011_v53, %v936_v24 }
 0x2de   : > { %v1033_v21 = vmul.f32 %v1016_v56, %v937_v23 }
 0x2df   : > { %v1153_v59 = vadd.f32 %v1134_v1, %v1032_v27 }
 0x2e0   : > { %v1154_v51 = vadd.f32 %v1136_v50, %v1033_v21 }
 0x2e1   : > { %1169 = vst.msk [vmem:[#allocation4 + $0x70] sm:$0xff] %vm471_vm2, %v1153_v59 }
 0x2e2   : > { %1170 = vst.msk [vmem:[#allocation4 + $0x78] sm:$0xff] %vm471_vm2, %v1154_v51 }
 0x2e5   : > { %v1006_v3 = vpop.permute.xlu0 %1005 }
 0x2e6   : > { %v1031_v15 = vmul.f32 %v1006_v3, %v935_v49  ;;  %1190 = sbr.rel (%p1622_p10) target bundleno = 917 (0x395), region = 40 }
 0x2e8   : > { %v1152_v52 = vadd.f32 %v1131_v58, %v1031_v15 }
 0x2ea   : > { %1168 = vst.msk [vmem:[#allocation4 + $0x68] sm:$0xff] %vm471_vm2, %v1152_v52 }
 0x2eb   : > { %v1211_v14 = vld [vmem:[#allocation3 + $0x20] sm:$0xff]  ;;  %v1209_v40 = vld [vmem:[#allocation3 + $0x10] sm:$0xff]  ;;  %v1886_v46 = vmov 0   ;;  %v1212_v11 = vld [vmem:[#allocation3 + $0x28] sm:$0xff]  ;;  %vm1351_vm4 = vcmask 125952  }
 0x2ec   : > { %v1207_v32 = vld [vmem:[#allocation3] sm:$0xff]  ;;  %1794 = vset.pattern.permute.xlu2 %v1886_v46  ;;  %1793 = vset.pattern.permute.xlu1 %v1886_v46  ;;  %1795 = vrcp.f32 %v1211_v14  ;;  %v1210_v19 = vld [vmem:[#allocation3 + $0x18] sm:$0xff]  ;;  %v1208_v35 = vld [vmem:[#allocation3 + $0x8] sm:$0xff] }
 0x2ed   : > { %1792 = vset.pattern.permute.xlu0 %v1886_v46  ;;  %1797 = vrcp.f32 %v1209_v40  ;;  %v1215_v37 = vld [vmem:[#allocation3 + $0x40] sm:$0xff]  ;;  %v1214_v7 = vld [vmem:[#allocation3 + $0x38] sm:$0xff]  ;;  %v1213_v48 = vld [vmem:[#allocation3 + $0x30] sm:$0xff] }
 0x2ee   : > { %1799 = vrcp.f32 %v1207_v32  ;;  %v1218_v29 = vld [vmem:[#allocation3 + $0x58] sm:$0xff]  ;;  %v1217_v57 = vld [vmem:[#allocation3 + $0x50] sm:$0xff]  ;;  %v1216_v63 = vld [vmem:[#allocation3 + $0x48] sm:$0xff] }
 0x2ef   : > { %1801 = vrcp.f32 %v1212_v11  ;;  %v1221_v43 = vld [vmem:[#allocation3 + $0x70] sm:$0xff]  ;;  %v1220_v47 = vld [vmem:[#allocation3 + $0x68] sm:$0xff]  ;;  %v1219_v2 = vld [vmem:[#allocation3 + $0x60] sm:$0xff] }
 0x2f0   : > { %1803 = vrcp.f32 %v1210_v19  ;;  %v1222_v58 = vld [vmem:[#allocation3 + $0x78] sm:$0xff]  ;;  %v1195_v26 = vld [vmem:[#allocation4 + $0x20] sm:$0xff]  ;;  %v1196_v18 = vld [vmem:[#allocation4 + $0x28] sm:$0xff] }
 0x2f1   : > { %1805 = vrcp.f32 %v1208_v35  ;;  %v1199_v0 = vld [vmem:[#allocation4 + $0x40] sm:$0xff]  ;;  %v1202_v31 = vld [vmem:[#allocation4 + $0x58] sm:$0xff]  ;;  %v1193_v54 = vld [vmem:[#allocation4 + $0x10] sm:$0xff] }
 0x2f2   : > { %v1796_v42 = vpop.eup %1795  ;;  %1807 = vrcp.f32 %v1215_v37  ;;  %v1191_v34 = vld [vmem:[#allocation4] sm:$0xff]  ;;  %v1205_v50 = vld [vmem:[#allocation4 + $0x70] sm:$0xff]  ;;  %v1194_v59 = vld [vmem:[#allocation4 + $0x18] sm:$0xff] }
 0x2f3   : > { %v1798_v5 = vpop.eup %1797  ;;  %1261 = vperm.xlu2 %1794, %v1796_v42   ;;  %1809 = vrcp.f32 %v1214_v7  ;;  %v1192_v49 = vld [vmem:[#allocation4 + $0x8] sm:$0xff]  ;;  %v1198_v19 = vld [vmem:[#allocation4 + $0x38] sm:$0xff]  ;;  %v1197_v35 = vld [vmem:[#allocation4 + $0x30] sm:$0xff] }
 0x2f4   : > { %v1800_v17 = vpop.eup %1799  ;;  %1251 = vperm.xlu1 %1793, %v1798_v5   ;;  %1811 = vrcp.f32 %v1213_v48  ;;  %v1200_v48 = vld [vmem:[#allocation4 + $0x48] sm:$0xff] }
 0x2f5   : > { %1241 = vperm.xlu0 %1792, %v1800_v17   ;;  %v1802_v16 = vpop.eup %1801  ;;  %1813 = vrcp.f32 %v1218_v29 }
 0x2f6   : > { %v1804_v36 = vpop.eup %1803  ;;  %1815 = vrcp.f32 %v1217_v57 }
 0x2f7   : > { %v1806_v9 = vpop.eup %1805  ;;  %1817 = vrcp.f32 %v1216_v63 }
 0x2f8   : > { %v1808_v10 = vpop.eup %1807  ;;  %1819 = vrcp.f32 %v1221_v43  ;;  %v1203_v43 = vld [vmem:[#allocation4 + $0x60] sm:$0xff] }
 0x2f9   : > { %v1810_v55 = vpop.eup %1809  ;;  %1821 = vrcp.f32 %v1220_v47 }
 0x2fa   : > { %v1812_v22 = vpop.eup %1811  ;;  %1823 = vrcp.f32 %v1219_v2 }
 0x2fb   : > { %1266 = vperm.xlu2 %1794, %v1802_v16   ;;  %v1814_v41 = vpop.eup %1813  ;;  %1825 = vrcp.f32 %v1222_v58 }
 0x2fc   : > { %1256 = vperm.xlu1 %1793, %v1804_v36   ;;  %v1816_v28 = vpop.eup %1815  ;;  %v1201_v36 = vld [vmem:[#allocation4 + $0x50] sm:$0xff] }
 0x2fd   : > { %1246 = vperm.xlu0 %1792, %v1806_v9   ;;  %v1818_v8 = vpop.eup %1817 }
 0x2fe   : > { %v1820_v4 = vpop.eup %1819 }
 0x2ff   : > { %v1822_v33 = vpop.eup %1821 }
 0x300   : > { %v1824_v12 = vpop.eup %1823 }
 0x301   : > { %v1826_v44 = vpop.eup %1825 }
 0x303   : > { %1281 = vperm.xlu2 %1794, %v1808_v10  }
 0x304   : > { %1276 = vperm.xlu1 %1793, %v1810_v55  }
 0x305   : > { %1271 = vperm.xlu0 %1792, %v1812_v22   ;;  %v1204_v22 = vld [vmem:[#allocation4 + $0x68] sm:$0xff] }
 0x30b   : > { %1296 = vperm.xlu2 %1794, %v1814_v41  }
 0x30c   : > { %1291 = vperm.xlu1 %1793, %v1816_v28  }
 0x30d   : > { %1286 = vperm.xlu0 %1792, %v1818_v8  }
 0x313   : > { %1311 = vperm.xlu2 %1794, %v1820_v4  }
 0x314   : > { %1306 = vperm.xlu1 %1793, %v1822_v33   ;;  %v1206_v33 = vld [vmem:[#allocation4 + $0x78] sm:$0xff] }
 0x315   : > { %1301 = vperm.xlu0 %1792, %v1824_v12  }
 0x31d   : > { %1316 = vperm.xlu0 %1792, %v1826_v44  }
 0x34d   : > { %v1262_v38 = vpop.permute.xlu2 %1261 }
 0x34e   : > { %v1323_v61 = vmul.f32 %v1262_v38, %v1195_v26 }
 0x350   : > { %v1339_v6 = vpack.c.bf16 %v1323_v61, %v1323_v61 }
 0x352   : > { %1356 = vst.msk [vmem:[%s1960_s5 + $0x10] sm:$0xf] %vm1351_vm4, %v1339_v6 }
 0x355   : > { %v1267_v45 = vpop.permute.xlu2 %1266 }
 0x356   : > { %v1324_v62 = vmul.f32 %v1267_v45, %v1196_v18 }
 0x358   : > { %v1340_v25 = vpack.c.bf16 %v1324_v62, %v1324_v62 }
 0x35a   : > { %1357 = vst.msk [vmem:[%s1960_s5 + $0x14] sm:$0xf] %vm1351_vm4, %v1340_v25 }
 0x35d   : > { %v1282_v60 = vpop.permute.xlu2 %1281 }
 0x35e   : > { %v1327_v13 = vmul.f32 %v1282_v60, %v1199_v0 }
 0x360   : > { %v1343_v39 = vpack.c.bf16 %v1327_v13, %v1327_v13 }
 0x362   : > { %1360 = vst.msk [vmem:[%s1960_s5 + $0x20] sm:$0xf] %vm1351_vm4, %v1343_v39 }
 0x365   : > { %v1297_v1 = vpop.permute.xlu2 %1296 }
 0x366   : > { %v1330_v20 = vmul.f32 %v1297_v1, %v1202_v31  ;;  %v1252_v30 = vpop.permute.xlu1 %1251 }
 0x367   : > { %v1321_v24 = vmul.f32 %v1252_v30, %v1193_v54  ;;  %v1242_v23 = vpop.permute.xlu0 %1241 }
 0x368   : > { %v1346_v53 = vpack.c.bf16 %v1330_v20, %v1330_v20  ;;  %v1319_v56 = vmul.f32 %v1242_v23, %v1191_v34 }
 0x369   : > { %v1337_v27 = vpack.c.bf16 %v1321_v24, %v1321_v24 }
 0x36a   : > { %1363 = vst.msk [vmem:[%s1960_s5 + $0x2c] sm:$0xf] %vm1351_vm4, %v1346_v53  ;;  %v1335_v21 = vpack.c.bf16 %v1319_v56, %v1319_v56 }
 0x36b   : > { %1354 = vst.msk [vmem:[%s1960_s5 + $0x8] sm:$0xf] %vm1351_vm4, %v1337_v27 }
 0x36c   : > { %1352 = vst.msk [vmem:[%s1960_s5] sm:$0xf] %vm1351_vm4, %v1335_v21 }
 0x36d   : > { %v1312_v51 = vpop.permute.xlu2 %1311 }
 0x36e   : > { %v1333_v3 = vmul.f32 %v1312_v51, %v1205_v50  ;;  %v1257_v15 = vpop.permute.xlu1 %1256 }
 0x36f   : > { %v1322_v52 = vmul.f32 %v1257_v15, %v1194_v59  ;;  %v1247_v14 = vpop.permute.xlu0 %1246 }
 0x370   : > { %v1349_v40 = vpack.c.bf16 %v1333_v3, %v1333_v3  ;;  %v1320_v32 = vmul.f32 %v1247_v14, %v1192_v49 }
 0x371   : > { %v1338_v46 = vpack.c.bf16 %v1322_v52, %v1322_v52 }
 0x372   : > { %1366 = vst.msk [vmem:[%s1960_s5 + $0x38] sm:$0xf] %vm1351_vm4, %v1349_v40  ;;  %v1336_v11 = vpack.c.bf16 %v1320_v32, %v1320_v32 }
 0x373   : > { %1355 = vst.msk [vmem:[%s1960_s5 + $0xc] sm:$0xf] %vm1351_vm4, %v1338_v46 }
 0x374   : > { %1353 = vst.msk [vmem:[%s1960_s5 + $0x4] sm:$0xf] %vm1351_vm4, %v1336_v11 }
 0x376   : > { %v1277_v42 = vpop.permute.xlu1 %1276 }
 0x377   : > { %v1326_v5 = vmul.f32 %v1277_v42, %v1198_v19  ;;  %v1272_v17 = vpop.permute.xlu0 %1271 }
 0x378   : > { %v1325_v37 = vmul.f32 %v1272_v17, %v1197_v35 }
 0x379   : > { %v1342_v16 = vpack.c.bf16 %v1326_v5, %v1326_v5 }
 0x37a   : > { %v1341_v7 = vpack.c.bf16 %v1325_v37, %v1325_v37 }
 0x37b   : > { %1359 = vst.msk [vmem:[%s1960_s5 + $0x1c] sm:$0xf] %vm1351_vm4, %v1342_v16 }
 0x37c   : > { %1358 = vst.msk [vmem:[%s1960_s5 + $0x18] sm:$0xf] %vm1351_vm4, %v1341_v7 }
 0x37e   : > { %v1292_v9 = vpop.permute.xlu1 %1291 }
 0x37f   : > { %v1329_v29 = vmul.f32 %v1292_v9, %v1201_v36  ;;  %v1287_v10 = vpop.permute.xlu0 %1286 }
 0x380   : > { %v1328_v57 = vmul.f32 %v1287_v10, %v1200_v48 }
 0x381   : > { %v1345_v55 = vpack.c.bf16 %v1329_v29, %v1329_v29 }
 0x382   : > { %v1344_v63 = vpack.c.bf16 %v1328_v57, %v1328_v57 }
 0x383   : > { %1362 = vst.msk [vmem:[%s1960_s5 + $0x28] sm:$0xf] %vm1351_vm4, %v1345_v55 }
 0x384   : > { %1361 = vst.msk [vmem:[%s1960_s5 + $0x24] sm:$0xf] %vm1351_vm4, %v1344_v63 }
 0x386   : > { %v1307_v41 = vpop.permute.xlu1 %1306 }
 0x387   : > { %v1332_v47 = vmul.f32 %v1307_v41, %v1204_v22  ;;  %v1302_v28 = vpop.permute.xlu0 %1301 }
 0x388   : > { %v1331_v2 = vmul.f32 %v1302_v28, %v1203_v43 }
 0x389   : > { %v1348_v8 = vpack.c.bf16 %v1332_v47, %v1332_v47 }
 0x38a   : > { %v1347_v4 = vpack.c.bf16 %v1331_v2, %v1331_v2 }
 0x38b   : > { %1365 = vst.msk [vmem:[%s1960_s5 + $0x34] sm:$0xf] %vm1351_vm4, %v1348_v8 }
 0x38c   : > { %1364 = vst.msk [vmem:[%s1960_s5 + $0x30] sm:$0xf] %vm1351_vm4, %v1347_v4 }
 0x38f   : > { %v1317_v58 = vpop.permute.xlu0 %1316 }
 0x390   : > { %v1334_v12 = vmul.f32 %v1317_v58, %v1206_v33 }
 0x392   : > { %v1350_v44 = vpack.c.bf16 %v1334_v12, %v1334_v12 }
 0x394   : > { %1367 = vst.msk [vmem:[%s1960_s5 + $0x3c] sm:$0xf] %vm1351_vm4, %v1350_v44 }
 0x395 PF: > { %s13_s18 = sadd.s32 1, %s1881_s18   ;;  %s2470_s12 = smov %s1869_s15 }
 0x396   : > { %p10_p11 = scmp.ge.s32.totalorder %s13_s18, 10   ;;  %s2471_s13 = smov %s1873_s16 }
 0x397   : > { %s2472_s14 = smov %s1877_s17  ;;  %s2473_s15 = smov %s2477_s19 }
 0x398   : > { %s2474_s16 = smov %s2481_s20  ;;  %s2475_s17 = smov %s2485_s21 }
 0x399   :  { %12 = sbr.rel (!%p10_p11) target bundleno = 4 (0x4), region = 76 }

</bundles_post_ra>
